<compile_context>
chip_gen: v7x
topology: tpu7x:2x2x1
jax: 0.10.0
libtpu: 0.0.40
codegen_flags: <defaults>
</compile_context>

<pallas_src>
import functools

import jax
import jax.numpy as jnp
from jax.experimental import pallas as pl
from jax.experimental.pallas import tpu as pltpu

_TQ = 128      # target-node row tile ("parallel" grid axis)
_A_PAD = 128   # lane-padded width of the per-node attention-score output of kernel 1


def _round_up(n, m):
    return ((n + m - 1) // m) * m


def _pick_tk(n_pad):
    """Largest source tile in {512, 256, 128} that divides n_pad (n_pad % 128 == 0)."""
    for tk in (512, 256, 128):
        if tk <= n_pad and n_pad % tk == 0:
            return tk
    return n_pad


@functools.lru_cache(maxsize=None)
def _vmem_limit_bytes():
    """Per-generation VMEM budget: ~3/4 of physical, capped; conservative fallback."""
    try:
        cap = int(getattr(pltpu.get_tpu_info(), "vmem_capacity_bytes", 0))
    except Exception:
        cap = 0
    if cap <= 0:
        return 32 * 1024 * 1024                       # safe on every generation
    return min(cap * 3 // 4, 100 * 1024 * 1024)       # ~48 MiB (v7x), ~96 MiB (v5e/v6e)


def _gat_linear_kernel(x_ref, w_ref, att_ref, xl_ref, a_ref, *, ones_col):
    """xl = x @ W (bf16 MXU, f32 acc), ones column inserted; a = xl @ att_mat (lane-dense)."""
    x = x_ref[...].astype(jnp.bfloat16)
    xl = jnp.dot(x, w_ref[...], preferred_element_type=jnp.float32)       # [TQ, XL_pad]
    a = jnp.dot(xl.astype(jnp.bfloat16), att_ref[...],
                preferred_element_type=jnp.float32)                       # [TQ, A_PAD]
    # Insert the ones column (softmax-denominator trick) into an already-zero padded lane.
    lane = jax.lax.broadcasted_iota(jnp.int32, xl.shape, 1)
    xl = jnp.where(lane == ones_col, 1.0, xl)
    xl_ref[...] = xl.astype(jnp.bfloat16)
    a_ref[...] = a


def _gat_attn_kernel(cnt_ref, xl_ref, asrc_ref, adst_ref, adj_ref, bias_ref, hmask_ref,
                     out_ref, acc_ref, m_ref, *, num_heads, f_out, hf, concat, apply_elu):
    """Online-softmax GAT aggregation for one (target-row tile, source tile) grid step.

      cnt_ref:   [nI, nK]  int32 (SMEM, scalar-prefetched)  edges per adjacency block
      xl_ref:    [TK, XL_pad] bf16   source features (ones column at `hf`)
      asrc_ref:  [H, TK]      f32    att_src . xl_j   (source scores, nodes on lanes)
      adst_ref:  [TQ, H]      f32    att_dst . xl_i   (target scores, this row tile)
      adj_ref:   [TQ, TK]     int8   adj[i, j] = 1 iff edge j -> i (incl. self-loop)
      bias_ref:  [1, XL_pad]  f32
      hmask_ref: [H, XL_pad]  f32    lane mask selecting head h's output columns
      out_ref:   [TQ, XL_pad] bf16/f32
      acc_ref:   [H, TQ, XL_pad] f32 scratch (running numerator; col `hf` = running denom)
      m_ref:     [H, TQ, 1]      f32 scratch (running max, floored at 0)
    """
    i = pl.program_id(0)
    k = pl.program_id(1)
    nk = pl.num_programs(1)

    @pl.when(k == 0)
    def _init():
        acc_ref[...] = jnp.zeros_like(acc_ref)
        m_ref[...] = jnp.zeros_like(m_ref)

    @pl.when(cnt_ref[i, k] > 0)                       # skip empty adjacency blocks
    def _block():
        adj_b = adj_ref[...] != 0                     # [TQ, TK] built once per block
        xl = xl_ref[...]                              # [TK, XL_pad] bf16
        for h in range(num_heads):                    # few heads, static -> unrolled
            e = adst_ref[:, h:h + 1] + asrc_ref[h:h + 1, :]       # [TQ, TK]
            e = jnp.maximum(e, 0.2 * e)                            # leaky_relu(0.2)
            e = jnp.where(adj_b, e, -1e9)                          # mask non-edges
            m_old = m_ref[h]                                       # [TQ, 1]
            m_new = jnp.maximum(m_old, jnp.max(e, axis=-1, keepdims=True))
            alpha = jnp.exp(m_old - m_new)                         # [TQ, 1]
            p = jnp.exp(e - m_new)                                 # exactly 0 at non-edges
            acc_ref[h] = alpha * acc_ref[h] + jnp.dot(
                p.astype(jnp.bfloat16), xl, preferred_element_type=jnp.float32)
            m_ref[h] = m_new

    @pl.when(k == nk - 1)
    def _finalize():
        tq, xlp = out_ref.shape
        out = jnp.zeros((tq, xlp), jnp.float32)
        if concat or num_heads == 1:
            for h in range(num_heads):
                acc_h = acc_ref[h]                                 # [TQ, XL_pad]
                s = acc_h[:, hf:hf + 1]                            # MXU-accumulated rowsum
                inv = pl.reciprocal(jnp.maximum(s, 1e-20))         # exact; rows w/o edges -> 0
                out = out + hmask_ref[h:h + 1, :] * (acc_h * inv)
        else:
            # General multi-head mean (not used by this encoder: layer 2 has H=1).
            t = jnp.zeros((tq, f_out), jnp.float32)
            for h in range(num_heads):
                acc_h = acc_ref[h]
                s = acc_h[:, hf:hf + 1]
                inv = pl.reciprocal(jnp.maximum(s, 1e-20))
                t = t + acc_h[:, h * f_out:(h + 1) * f_out] * inv
            t = t * (1.0 / num_heads)
            out = jnp.concatenate(
                [t, jnp.zeros((tq, xlp - f_out), jnp.float32)], axis=-1)
        out = out + bias_ref[...]                                  # fused bias
        if apply_elu:                                              # fused ELU (layer 1)
            out = jnp.where(out > 0, out, jnp.exp(jnp.minimum(out, 0.0)) - 1.0)
        out_ref[...] = out.astype(out_ref.dtype)                   # single lane-dense store


def gat_conv(x, adj_i8, w, att_src, att_dst, bias, *, concat, apply_elu, out_dtype):
    """One GATConv layer (eval mode; dropout no-op).

    x: [N_pad, F_in] (rows padded to a multiple of _TQ; padded rows are zero),
    adj_i8: [N_pad, N_pad] int8 (adj[i, j] = 1 iff edge j -> i; padded rows/cols zero).
    Returns [N_pad, XL_pad] `out_dtype` (real output columns first, padded columns 0).
    """
    n_pad, f_in = x.shape
    assert n_pad % _TQ == 0
    num_heads, f_out = att_src.shape
    assert 2 * num_heads <= _A_PAD
    hf = num_heads * f_out
    xl_pad = _round_up(hf + 1, 128)            # +1 guarantees a spare lane for the ones col
    out_dim = hf if concat else f_out
    vmem = _vmem_limit_bytes()

    # --- host-side parameter packing (tiny, once per layer) ---------------------------
    w_pad = jnp.zeros((f_in, xl_pad), jnp.float32)
    w_pad = w_pad.at[:w.shape[0], :hf].set(w).astype(jnp.bfloat16)
    att_mat = jnp.zeros((xl_pad, _A_PAD), jnp.float32)
    for h in range(num_heads):
        att_mat = att_mat.at[h * f_out:(h + 1) * f_out, h].set(att_src[h])
        att_mat = att_mat.at[h * f_out:(h + 1) * f_out, num_heads + h].set(att_dst[h])
    att_mat = att_mat.astype(jnp.bfloat16)
    bias_pad = jnp.zeros((1, xl_pad), jnp.float32).at[0, :out_dim].set(bias)
    hmask = jnp.zeros((num_heads, xl_pad), jnp.float32)
    for h in range(num_heads):
        hmask = hmask.at[h, h * f_out:(h + 1) * f_out].set(1.0)

    # --- kernel 1: linear transform + all per-head attention scores (one MXU pass) ----
    grid1 = (n_pad // _TQ,)
    xl, a = pl.pallas_call(
        functools.partial(_gat_linear_kernel, ones_col=hf),
        grid=grid1,
        in_specs=[pl.BlockSpec((_TQ, f_in), lambda i: (i, 0)),
                  pl.BlockSpec((f_in, xl_pad), lambda i: (0, 0)),
                  pl.BlockSpec((xl_pad, _A_PAD), lambda i: (0, 0))],
        out_specs=[pl.BlockSpec((_TQ, xl_pad), lambda i: (i, 0)),
                   pl.BlockSpec((_TQ, _A_PAD), lambda i: (i, 0))],
        out_shape=[jax.ShapeDtypeStruct((n_pad, xl_pad), jnp.bfloat16),
                   jax.ShapeDtypeStruct((n_pad, _A_PAD), jnp.float32)],
        compiler_params=pltpu.CompilerParams(
            dimension_semantics=("parallel",), vmem_limit_bytes=vmem),
    )(x, w_pad, att_mat)

    a_src_t = a[:, :num_heads].T               # [H, N_pad]  source scores, nodes on lanes
    a_dst = a[:, num_heads:2 * num_heads]      # [N_pad, H]  target scores per node

    # --- kernel 2: source-tiled online-softmax attention + aggregation ----------------
    tk = _pick_tk(n_pad)
    n_i, n_k = n_pad // _TQ, n_pad // tk
    counts = jnp.sum(adj_i8.reshape(n_i, _TQ, n_k, tk), axis=(1, 3), dtype=jnp.int32)

    grid_spec = pltpu.PrefetchScalarGridSpec(
        num_scalar_prefetch=1,
        grid=(n_i, n_k),
        in_specs=[pl.BlockSpec((tk, xl_pad), lambda i, k, c: (k, 0)),        # xl (sources)
                  pl.BlockSpec((num_heads, tk), lambda i, k, c: (0, k)),     # a_src^T
                  pl.BlockSpec((_TQ, num_heads), lambda i, k, c: (i, 0)),    # a_dst tile
                  pl.BlockSpec((_TQ, tk), lambda i, k, c: (i, k)),           # adj tile int8
                  pl.BlockSpec((1, xl_pad), lambda i, k, c: (0, 0)),         # bias
                  pl.BlockSpec((num_heads, xl_pad), lambda i, k, c: (0, 0))],  # head masks
        out_specs=pl.BlockSpec((_TQ, xl_pad), lambda i, k, c: (i, 0)),
        scratch_shapes=[pltpu.VMEM((num_heads, _TQ, xl_pad), jnp.float32),   # acc (+denom)
                        pltpu.VMEM((num_heads, _TQ, 1), jnp.float32)],       # running max
    )
    out = pl.pallas_call(
        functools.partial(_gat_attn_kernel, num_heads=num_heads, f_out=f_out, hf=hf,
                          concat=concat, apply_elu=apply_elu),
        grid_spec=grid_spec,
        out_shape=jax.ShapeDtypeStruct((n_pad, xl_pad), out_dtype),
        compiler_params=pltpu.CompilerParams(
            dimension_semantics=("parallel", "arbitrary"), vmem_limit_bytes=vmem),
    )(counts, xl, a_src_t, a_dst, adj_i8, bias_pad, hmask)
    return out


def gat_encoder_forward(params, x, adj_i8):
    """F.elu(gat1(x, edge_index)) -> gat2(...).  adj_i8[i, j] = 1 iff edge j -> i (+ self loops)."""
    n = x.shape[0]
    n_pad = _round_up(n, _TQ)
    x_p = jnp.zeros((n_pad, x.shape[1]), x.dtype).at[:n, :].set(x)
    adj_p = jnp.zeros((n_pad, n_pad), jnp.int8).at[:n, :n].set(adj_i8)
    h = gat_conv(x_p, adj_p, params["w1"], params["att_src1"], params["att_dst1"],
                 params["b1"], concat=True, apply_elu=True,
                 out_dtype=jnp.bfloat16)       # bf16 inter-layer handoff (MXU input dtype)
    out = gat_conv(h, adj_p, params["w2"], params["att_src2"], params["att_dst2"],
                   params["b2"], concat=False, apply_elu=False, out_dtype=jnp.float32)
    return out[:n, :params["b2"].shape[0]]


def build_adj(edge_index, num_nodes):
    """Dense int8 mask: adj[i, j] = 1 iff edge j -> i; self-loops added (PyG default)."""
    src, dst = edge_index[0], edge_index[1]
    adj = jnp.zeros((num_nodes, num_nodes), jnp.int8)
    adj = adj.at[dst, src].set(1)
    idx = jnp.arange(num_nodes)
    adj = adj.at[idx, idx].set(1)
    return adj


def init_params(key, in_channels, out_channels, hidden_dim, head):
    ks = jax.random.split(key, 6)

    def glorot(k, shape):
        fan_in, fan_out = shape[0], shape[-1]
        s = (6.0 / (fan_in + fan_out)) ** 0.5
        return jax.random.uniform(k, shape, jnp.float32, -s, s)

    return {
        # gat1: GATConv(in_channels, hidden_dim, heads=head, concat=True)
        "w1": glorot(ks[0], (in_channels, head * hidden_dim)),
        "att_src1": glorot(ks[1], (head, hidden_dim)),
        "att_dst1": glorot(ks[2], (head, hidden_dim)),
        "b1": jnp.zeros((head * hidden_dim,), jnp.float32),
        # gat2: GATConv(hidden_dim * head, out_channels, heads=1, concat=False)
        "w2": glorot(ks[3], (head * hidden_dim, out_channels)),
        "att_src2": glorot(ks[4], (1, out_channels)),
        "att_dst2": glorot(ks[5], (1, out_channels)),
        "b2": jnp.zeros((out_channels,), jnp.float32),
    }


if __name__ == "__main__":
    # Small, deterministic problem.
    N = 8                # nodes
    E = 24               # directed edges
    in_channels = 16
    hidden_dim = 32
    head = 2
    out_channels = 8

    key = jax.random.PRNGKey(0)
    k_x, k_src, k_dst, k_param = jax.random.split(key, 4)

    x = jax.random.normal(k_x, (N, in_channels), jnp.float32)
    edge_index = jnp.stack([
        jax.random.randint(k_src, (E,), 0, N),
        jax.random.randint(k_dst, (E,), 0, N),
    ], axis=0)                                   # [2, E]  (row 0 = src, row 1 = dst)

    adj = build_adj(edge_index, N)
    params = init_params(k_param, in_channels, out_channels, hidden_dim, head)

    fwd = jax.jit(gat_encoder_forward)
    out = jax.block_until_ready(fwd(params, x, adj))
    assert out.shape == (N, out_channels)
    assert bool(jnp.all(jnp.isfinite(out)))
    print("KERNEL_OK")
</pallas_src>

<mosaic_0001>
module attributes {stable_mosaic.version = 11 : i64} {
  func.func @_gat_linear_kernel(%arg0: i32, %arg1: memref<128x16xf32, #tpu.memory_space<vmem>>, %arg2: memref<16x128xbf16, #tpu.memory_space<vmem>>, %arg3: memref<128x128xbf16, #tpu.memory_space<vmem>>, %arg4: memref<128x128xbf16, #tpu.memory_space<vmem>>, %arg5: memref<128x128xf32, #tpu.memory_space<vmem>>) attributes {dimension_semantics = [#tpu.dimension_semantics<parallel>], iteration_bounds = array<i64: 1>, scalar_prefetch = 0 : i64, scratch_operands = 0 : i64, tpu.core_type = #tpu.core_type<tc>, window_params = [{transform_indices = @transform_0, window_bounds = array<i64: 128, 16>}, {pipeline_mode = #tpu.pipeline_mode<synchronous>, transform_indices = @transform_1, window_bounds = array<i64: 16, 128>}, {pipeline_mode = #tpu.pipeline_mode<synchronous>, transform_indices = @transform_2, window_bounds = array<i64: 128, 128>}, {transform_indices = @transform_3, window_bounds = array<i64: 128, 128>}, {transform_indices = @transform_4, window_bounds = array<i64: 128, 128>}]} {
    %c0 = arith.constant 0 : index
    %c0_0 = arith.constant 0 : index
    %0 = vector.load %arg1[%c0, %c0_0] : memref<128x16xf32, #tpu.memory_space<vmem>>, vector<128x16xf32>
    %1 = arith.truncf %0 : vector<128x16xf32> to vector<128x16xbf16>
    %c0_1 = arith.constant 0 : index
    %c0_2 = arith.constant 0 : index
    %2 = vector.load %arg2[%c0_1, %c0_2] : memref<16x128xbf16, #tpu.memory_space<vmem>>, vector<16x128xbf16>
    %cst = arith.constant dense<0.000000e+00> : vector<128x128xf32>
    %3 = tpu.matmul %1, %2, %cst {dimension_numbers = #tpu.dot_dimension_numbers<[1], [0], [0], [1], [0, 0, 1, 1], [], []>} : vector<128x16xbf16>, vector<16x128xbf16>, vector<128x128xf32> -> vector<128x128xf32>
    %4 = arith.truncf %3 : vector<128x128xf32> to vector<128x128xbf16>
    %c0_3 = arith.constant 0 : index
    %c0_4 = arith.constant 0 : index
    %5 = vector.load %arg3[%c0_3, %c0_4] : memref<128x128xbf16, #tpu.memory_space<vmem>>, vector<128x128xbf16>
    %cst_5 = arith.constant dense<0.000000e+00> : vector<128x128xf32>
    %6 = tpu.matmul %4, %5, %cst_5 {dimension_numbers = #tpu.dot_dimension_numbers<[1], [0], [0], [1], [0, 0, 1, 1], [], []>} : vector<128x128xbf16>, vector<128x128xbf16>, vector<128x128xf32> -> vector<128x128xf32>
    %7 = tpu.iota {dimensions = array<i32: 1>} : vector<128x128xi32>
    %c64_i32 = arith.constant 64 : i32
    %8 = vector.broadcast %c64_i32 : i32 to vector<128x128xi32>
    %9 = arith.cmpi eq, %7, %8 : vector<128x128xi32>
    %cst_6 = arith.constant 1.000000e+00 : f32
    %10 = vector.broadcast %cst_6 : f32 to vector<128x128xf32>
    %11 = arith.select %9, %10, %3 : vector<128x128xi1>, vector<128x128xf32>
    %12 = arith.truncf %11 : vector<128x128xf32> to vector<128x128xbf16>
    %c0_7 = arith.constant 0 : index
    %c0_8 = arith.constant 0 : index
    %13 = vector.load %arg4[%c0_7, %c0_8] : memref<128x128xbf16, #tpu.memory_space<vmem>>, vector<128x128xbf16>
    tpu.vector_store %arg4[%c0_7, %c0_8], %12 {strides = array<i32>} : memref<128x128xbf16, #tpu.memory_space<vmem>>, vector<128x128xbf16>,
    %c0_9 = arith.constant 0 : index
    %c0_10 = arith.constant 0 : index
    %14 = vector.load %arg5[%c0_9, %c0_10] : memref<128x128xf32, #tpu.memory_space<vmem>>, vector<128x128xf32>
    tpu.vector_store %arg5[%c0_9, %c0_10], %6 {strides = array<i32>} : memref<128x128xf32, #tpu.memory_space<vmem>>, vector<128x128xf32>,
    return
  }
  func.func @transform_0(%arg0: i32) -> (i32, i32) {
    %c0_i32 = arith.constant 0 : i32
    %c0_i32_0 = arith.constant 0 : i32
    return %arg0, %c0_i32 : i32, i32
  }
  func.func @transform_1(%arg0: i32) -> (i32, i32) {
    %c0_i32 = arith.constant 0 : i32
    %c0_i32_0 = arith.constant 0 : i32
    %c0_i32_1 = arith.constant 0 : i32
    return %c0_i32, %c0_i32_0 : i32, i32
  }
  func.func @transform_2(%arg0: i32) -> (i32, i32) {
    %c0_i32 = arith.constant 0 : i32
    %c0_i32_0 = arith.constant 0 : i32
    %c0_i32_1 = arith.constant 0 : i32
    return %c0_i32, %c0_i32_0 : i32, i32
  }
  func.func @transform_3(%arg0: i32) -> (i32, i32) {
    %c0_i32 = arith.constant 0 : i32
    %c0_i32_0 = arith.constant 0 : i32
    return %arg0, %c0_i32 : i32, i32
  }
  func.func @transform_4(%arg0: i32) -> (i32, i32) {
    %c0_i32 = arith.constant 0 : i32
    %c0_i32_0 = arith.constant 0 : i32
    return %arg0, %c0_i32 : i32, i32
  }
}

module attributes {stable_mosaic.version = 11 : i64} {
  func.func @_gat_attn_kernel(%arg0: i32, %arg1: i32, %arg2: memref<1x1xi32, #tpu.memory_space<smem>>, %arg3: memref<128x128xbf16, #tpu.memory_space<vmem>>, %arg4: memref<2x128xf32, #tpu.memory_space<vmem>>, %arg5: memref<128x2xf32, #tpu.memory_space<vmem>>, %arg6: memref<128x128xi8, #tpu.memory_space<vmem>>, %arg7: memref<1x128xf32, #tpu.memory_space<vmem>>, %arg8: memref<2x128xf32, #tpu.memory_space<vmem>>, %arg9: memref<128x128xbf16, #tpu.memory_space<vmem>>, %arg10: memref<2x128x128xf32, #tpu.memory_space<vmem>>, %arg11: memref<2x128x1xf32, #tpu.memory_space<vmem>>) attributes {dimension_semantics = [#tpu.dimension_semantics<parallel>, #tpu.dimension_semantics<arbitrary>], iteration_bounds = array<i64: 1, 1>, scalar_prefetch = 1 : i64, scratch_operands = 2 : i64, tpu.core_type = #tpu.core_type<tc>, window_params = [{transform_indices = @transform_0, window_bounds = array<i64: 128, 128>}, {transform_indices = @transform_1, window_bounds = array<i64: 2, 128>}, {transform_indices = @transform_2, window_bounds = array<i64: 128, 2>}, {transform_indices = @transform_3, window_bounds = array<i64: 128, 128>}, {pipeline_mode = #tpu.pipeline_mode<synchronous>, transform_indices = @transform_4, window_bounds = array<i64: 1, 128>}, {pipeline_mode = #tpu.pipeline_mode<synchronous>, transform_indices = @transform_5, window_bounds = array<i64: 2, 128>}, {transform_indices = @transform_6, window_bounds = array<i64: 128, 128>}]} {
    %c0_i32 = arith.constant 0 : i32
    %0 = arith.cmpi eq, %arg1, %c0_i32 : i32
    %1 = arith.extui %0 : i1 to i32
    %c0_i32_0 = arith.constant 0 : i32
    %2 = arith.cmpi ne, %1, %c0_i32_0 : i32
    scf.if %2 {
      %cst = arith.constant 0.000000e+00 : f32
      %12 = vector.broadcast %cst : f32 to vector<2x128x128xf32>
      %c0 = arith.constant 0 : index
      %c0_5 = arith.constant 0 : index
      %c0_6 = arith.constant 0 : index
      %13 = vector.load %arg10[%c0, %c0_5, %c0_6] : memref<2x128x128xf32, #tpu.memory_space<vmem>>, vector<2x128x128xf32>
      tpu.vector_store %arg10[%c0, %c0_5, %c0_6], %12 {strides = array<i32>} : memref<2x128x128xf32, #tpu.memory_space<vmem>>, vector<2x128x128xf32>,
      %cst_7 = arith.constant 0.000000e+00 : f32
      %14 = vector.broadcast %cst_7 : f32 to vector<2x128x1xf32>
      %c0_8 = arith.constant 0 : index
      %c0_9 = arith.constant 0 : index
      %c0_10 = arith.constant 0 : index
      %15 = vector.load %arg11[%c0_8, %c0_9, %c0_10] : memref<2x128x1xf32, #tpu.memory_space<vmem>>, vector<2x128x1xf32>
      tpu.vector_store %arg11[%c0_8, %c0_9, %c0_10], %14 {strides = array<i32>} : memref<2x128x1xf32, #tpu.memory_space<vmem>>, vector<2x128x1xf32>,
    } else {
    }
    %3 = arith.index_cast %arg0 : i32 to index
    %4 = arith.index_cast %arg1 : i32 to index
    %5 = memref.load %arg2[%3, %4] : memref<1x1xi32, #tpu.memory_space<smem>>
    %c0_i32_1 = arith.constant 0 : i32
    %6 = arith.cmpi sgt, %5, %c0_i32_1 : i32
    %7 = arith.extui %6 : i1 to i32
    %c0_i32_2 = arith.constant 0 : i32
    %8 = arith.cmpi ne, %7, %c0_i32_2 : i32
    scf.if %8 {
      %c0 = arith.constant 0 : index
      %c0_5 = arith.constant 0 : index
      %12 = vector.load %arg6[%c0, %c0_5] : memref<128x128xi8, #tpu.memory_space<vmem>>, vector<128x128xi8>
      %c0_i8 = arith.constant 0 : i8
      %13 = vector.broadcast %c0_i8 : i8 to vector<128x128xi8>
      %14 = arith.cmpi ne, %12, %13 : vector<128x128xi8>
      %c0_6 = arith.constant 0 : index
      %c0_7 = arith.constant 0 : index
      %15 = vector.load %arg3[%c0_6, %c0_7] : memref<128x128xbf16, #tpu.memory_space<vmem>>, vector<128x128xbf16>
      %c0_8 = arith.constant 0 : index
      %c0_9 = arith.constant 0 : index
      %16 = vector.load %arg5[%c0_8, %c0_9] : memref<128x2xf32, #tpu.memory_space<vmem>>, vector<128x1xf32>
      %c0_10 = arith.constant 0 : index
      %c0_11 = arith.constant 0 : index
      %17 = vector.load %arg4[%c0_10, %c0_11] : memref<2x128xf32, #tpu.memory_space<vmem>>, vector<1x128xf32>
      %18 = vector.broadcast %16 : vector<128x1xf32> to vector<128x128xf32>
      %19 = vector.broadcast %17 : vector<1x128xf32> to vector<128x128xf32>
      %20 = arith.addf %18, %19 : vector<128x128xf32>
      %cst = arith.constant 2.000000e-01 : f32
      %21 = vector.broadcast %cst : f32 to vector<128x128xf32>
      %22 = arith.mulf %21, %20 : vector<128x128xf32>
      %23 = arith.maximumf %20, %22 : vector<128x128xf32>
      %cst_12 = arith.constant -1.000000e+09 : f32
      %24 = vector.broadcast %cst_12 : f32 to vector<128x128xf32>
      %25 = arith.select %14, %23, %24 : vector<128x128xi1>, vector<128x128xf32>
      %c0_13 = arith.constant 0 : index
      %c0_14 = arith.constant 0 : index
      %c0_15 = arith.constant 0 : index
      %26 = vector.load %arg11[%c0_13, %c0_14, %c0_15] : memref<2x128x1xf32, #tpu.memory_space<vmem>>, vector<1x128x1xf32>
      %27 = vector.shape_cast %26 : vector<1x128x1xf32> to vector<128x1xf32>
      %cst_16 = arith.constant dense<0xFF800000> : vector<128xf32>
      %28 = vector.multi_reduction <maximumf>, %25, %cst_16 [1] : vector<128x128xf32> to vector<128xf32>
      %29 = vector.shape_cast %28 : vector<128xf32> to vector<128x1xf32>
      %30 = arith.maximumf %27, %29 : vector<128x1xf32>
      %31 = arith.subf %27, %30 : vector<128x1xf32>
      %32 = math.exp %31 : vector<128x1xf32>
      %33 = vector.broadcast %30 : vector<128x1xf32> to vector<128x128xf32>
      %34 = arith.subf %25, %33 : vector<128x128xf32>
      %35 = math.exp %34 : vector<128x128xf32>
      %c0_17 = arith.constant 0 : index
      %c0_18 = arith.constant 0 : index
      %c0_19 = arith.constant 0 : index
      %36 = vector.load %arg10[%c0_17, %c0_18, %c0_19] : memref<2x128x128xf32, #tpu.memory_space<vmem>>, vector<1x128x128xf32>
      %37 = vector.shape_cast %36 : vector<1x128x128xf32> to vector<128x128xf32>
      %38 = vector.broadcast %32 : vector<128x1xf32> to vector<128x128xf32>
      %39 = arith.mulf %38, %37 : vector<128x128xf32>
      %40 = arith.truncf %35 : vector<128x128xf32> to vector<128x128xbf16>
      %cst_20 = arith.constant dense<0.000000e+00> : vector<128x128xf32>
      %41 = tpu.matmul %40, %15, %cst_20 {dimension_numbers = #tpu.dot_dimension_numbers<[1], [0], [0], [1], [0, 0, 1, 1], [], []>} : vector<128x128xbf16>, vector<128x128xbf16>, vector<128x128xf32> -> vector<128x128xf32>
      %42 = arith.addf %39, %41 : vector<128x128xf32>
      %c0_21 = arith.constant 0 : index
      %c0_22 = arith.constant 0 : index
      %c0_23 = arith.constant 0 : index
      %43 = vector.load %arg10[%c0_21, %c0_22, %c0_23] : memref<2x128x128xf32, #tpu.memory_space<vmem>>, vector<1x128x128xf32>
      %44 = vector.shape_cast %43 : vector<1x128x128xf32> to vector<128x128xf32>
      %45 = vector.shape_cast %42 : vector<128x128xf32> to vector<1x128x128xf32>
      tpu.vector_store %arg10[%c0_21, %c0_22, %c0_23], %45 {strides = array<i32>} : memref<2x128x128xf32, #tpu.memory_space<vmem>>, vector<1x128x128xf32>,
      %c0_24 = arith.constant 0 : index
      %c0_25 = arith.constant 0 : index
      %c0_26 = arith.constant 0 : index
      %46 = vector.load %arg11[%c0_24, %c0_25, %c0_26] : memref<2x128x1xf32, #tpu.memory_space<vmem>>, vector<1x128x1xf32>
      %47 = vector.shape_cast %46 : vector<1x128x1xf32> to vector<128x1xf32>
      %48 = vector.shape_cast %30 : vector<128x1xf32> to vector<1x128x1xf32>
      tpu.vector_store %arg11[%c0_24, %c0_25, %c0_26], %48 {strides = array<i32>} : memref<2x128x1xf32, #tpu.memory_space<vmem>>, vector<1x128x1xf32>,
      %c0_27 = arith.constant 0 : index
      %c1 = arith.constant 1 : index
      %49 = vector.load %arg5[%c0_27, %c1] : memref<128x2xf32, #tpu.memory_space<vmem>>, vector<128x1xf32>
      %c1_28 = arith.constant 1 : index
      %c0_29 = arith.constant 0 : index
      %50 = vector.load %arg4[%c1_28, %c0_29] : memref<2x128xf32, #tpu.memory_space<vmem>>, vector<1x128xf32>
      %51 = vector.broadcast %49 : vector<128x1xf32> to vector<128x128xf32>
      %52 = vector.broadcast %50 : vector<1x128xf32> to vector<128x128xf32>
      %53 = arith.addf %51, %52 : vector<128x128xf32>
      %cst_30 = arith.constant 2.000000e-01 : f32
      %54 = vector.broadcast %cst_30 : f32 to vector<128x128xf32>
      %55 = arith.mulf %54, %53 : vector<128x128xf32>
      %56 = arith.maximumf %53, %55 : vector<128x128xf32>
      %cst_31 = arith.constant -1.000000e+09 : f32
      %57 = vector.broadcast %cst_31 : f32 to vector<128x128xf32>
      %58 = arith.select %14, %56, %57 : vector<128x128xi1>, vector<128x128xf32>
      %c1_32 = arith.constant 1 : index
      %c0_33 = arith.constant 0 : index
      %c0_34 = arith.constant 0 : index
      %59 = vector.load %arg11[%c1_32, %c0_33, %c0_34] : memref<2x128x1xf32, #tpu.memory_space<vmem>>, vector<1x128x1xf32>
      %60 = vector.shape_cast %59 : vector<1x128x1xf32> to vector<128x1xf32>
      %cst_35 = arith.constant dense<0xFF800000> : vector<128xf32>
      %61 = vector.multi_reduction <maximumf>, %58, %cst_35 [1] : vector<128x128xf32> to vector<128xf32>
      %62 = vector.shape_cast %61 : vector<128xf32> to vector<128x1xf32>
      %63 = arith.maximumf %60, %62 : vector<128x1xf32>
      %64 = arith.subf %60, %63 : vector<128x1xf32>
      %65 = math.exp %64 : vector<128x1xf32>
      %66 = vector.broadcast %63 : vector<128x1xf32> to vector<128x128xf32>
      %67 = arith.subf %58, %66 : vector<128x128xf32>
      %68 = math.exp %67 : vector<128x128xf32>
      %c1_36 = arith.constant 1 : index
      %c0_37 = arith.constant 0 : index
      %c0_38 = arith.constant 0 : index
      %69 = vector.load %arg10[%c1_36, %c0_37, %c0_38] : memref<2x128x128xf32, #tpu.memory_space<vmem>>, vector<1x128x128xf32>
      %70 = vector.shape_cast %69 : vector<1x128x128xf32> to vector<128x128xf32>
      %71 = vector.broadcast %65 : vector<128x1xf32> to vector<128x128xf32>
      %72 = arith.mulf %71, %70 : vector<128x128xf32>
      %73 = arith.truncf %68 : vector<128x128xf32> to vector<128x128xbf16>
      %cst_39 = arith.constant dense<0.000000e+00> : vector<128x128xf32>
      %74 = tpu.matmul %73, %15, %cst_39 {dimension_numbers = #tpu.dot_dimension_numbers<[1], [0], [0], [1], [0, 0, 1, 1], [], []>} : vector<128x128xbf16>, vector<128x128xbf16>, vector<128x128xf32> -> vector<128x128xf32>
      %75 = arith.addf %72, %74 : vector<128x128xf32>
      %c1_40 = arith.constant 1 : index
      %c0_41 = arith.constant 0 : index
      %c0_42 = arith.constant 0 : index
      %76 = vector.load %arg10[%c1_40, %c0_41, %c0_42] : memref<2x128x128xf32, #tpu.memory_space<vmem>>, vector<1x128x128xf32>
      %77 = vector.shape_cast %76 : vector<1x128x128xf32> to vector<128x128xf32>
      %78 = vector.shape_cast %75 : vector<128x128xf32> to vector<1x128x128xf32>
      tpu.vector_store %arg10[%c1_40, %c0_41, %c0_42], %78 {strides = array<i32>} : memref<2x128x128xf32, #tpu.memory_space<vmem>>, vector<1x128x128xf32>,
      %c1_43 = arith.constant 1 : index
      %c0_44 = arith.constant 0 : index
      %c0_45 = arith.constant 0 : index
      %79 = vector.load %arg11[%c1_43, %c0_44, %c0_45] : memref<2x128x1xf32, #tpu.memory_space<vmem>>, vector<1x128x1xf32>
      %80 = vector.shape_cast %79 : vector<1x128x1xf32> to vector<128x1xf32>
      %81 = vector.shape_cast %63 : vector<128x1xf32> to vector<1x128x1xf32>
      tpu.vector_store %arg11[%c1_43, %c0_44, %c0_45], %81 {strides = array<i32>} : memref<2x128x1xf32, #tpu.memory_space<vmem>>, vector<1x128x1xf32>,
    } else {
    }
    %c0_i32_3 = arith.constant 0 : i32
    %9 = arith.cmpi eq, %arg1, %c0_i32_3 : i32
    %10 = arith.extui %9 : i1 to i32
    %c0_i32_4 = arith.constant 0 : i32
    %11 = arith.cmpi ne, %10, %c0_i32_4 : i32
    scf.if %11 {
      %cst = arith.constant 0.000000e+00 : f32
      %12 = vector.broadcast %cst : f32 to vector<128x128xf32>
      %c0 = arith.constant 0 : index
      %c0_5 = arith.constant 0 : index
      %c0_6 = arith.constant 0 : index
      %13 = vector.load %arg10[%c0, %c0_5, %c0_6] : memref<2x128x128xf32, #tpu.memory_space<vmem>>, vector<1x128x128xf32>
      %14 = vector.shape_cast %13 : vector<1x128x128xf32> to vector<128x128xf32>
      %15 = vector.extract_strided_slice %14 {offsets = [0, 64], sizes = [128, 1], strides = [1, 1]} : vector<128x128xf32> to vector<128x1xf32>
      %cst_7 = arith.constant 9.99999968E-21 : f32
      %16 = vector.broadcast %cst_7 : f32 to vector<128x1xf32>
      %17 = arith.maximumf %15, %16 : vector<128x1xf32>
      %18 = tpu.reciprocal %17 : vector<128x1xf32> -> vector<128x1xf32>
      %c0_8 = arith.constant 0 : index
      %c0_9 = arith.constant 0 : index
      %19 = vector.load %arg8[%c0_8, %c0_9] : memref<2x128xf32, #tpu.memory_space<vmem>>, vector<1x128xf32>
      %20 = vector.broadcast %18 : vector<128x1xf32> to vector<128x128xf32>
      %21 = arith.mulf %14, %20 : vector<128x128xf32>
      %22 = vector.broadcast %19 : vector<1x128xf32> to vector<128x128xf32>
      %23 = arith.mulf %22, %21 : vector<128x128xf32>
      %24 = arith.addf %12, %23 : vector<128x128xf32>
      %c1 = arith.constant 1 : index
      %c0_10 = arith.constant 0 : index
      %c0_11 = arith.constant 0 : index
      %25 = vector.load %arg10[%c1, %c0_10, %c0_11] : memref<2x128x128xf32, #tpu.memory_space<vmem>>, vector<1x128x128xf32>
      %26 = vector.shape_cast %25 : vector<1x128x128xf32> to vector<128x128xf32>
      %27 = vector.extract_strided_slice %26 {offsets = [0, 64], sizes = [128, 1], strides = [1, 1]} : vector<128x128xf32> to vector<128x1xf32>
      %cst_12 = arith.constant 9.99999968E-21 : f32
      %28 = vector.broadcast %cst_12 : f32 to vector<128x1xf32>
      %29 = arith.maximumf %27, %28 : vector<128x1xf32>
      %30 = tpu.reciprocal %29 : vector<128x1xf32> -> vector<128x1xf32>
      %c1_13 = arith.constant 1 : index
      %c0_14 = arith.constant 0 : index
      %31 = vector.load %arg8[%c1_13, %c0_14] : memref<2x128xf32, #tpu.memory_space<vmem>>, vector<1x128xf32>
      %32 = vector.broadcast %30 : vector<128x1xf32> to vector<128x128xf32>
      %33 = arith.mulf %26, %32 : vector<128x128xf32>
      %34 = vector.broadcast %31 : vector<1x128xf32> to vector<128x128xf32>
      %35 = arith.mulf %34, %33 : vector<128x128xf32>
      %36 = arith.addf %24, %35 : vector<128x128xf32>
      %c0_15 = arith.constant 0 : index
      %c0_16 = arith.constant 0 : index
      %37 = vector.load %arg7[%c0_15, %c0_16] : memref<1x128xf32, #tpu.memory_space<vmem>>, vector<1x128xf32>
      %38 = vector.broadcast %37 : vector<1x128xf32> to vector<128x128xf32>
      %39 = arith.addf %36, %38 : vector<128x128xf32>
      %cst_17 = arith.constant 0.000000e+00 : f32
      %40 = vector.broadcast %cst_17 : f32 to vector<128x128xf32>
      %41 = arith.cmpf ogt, %39, %40 : vector<128x128xf32>
      %cst_18 = arith.constant 0.000000e+00 : f32
      %42 = vector.broadcast %cst_18 : f32 to vector<128x128xf32>
      %43 = arith.minimumf %39, %42 : vector<128x128xf32>
      %44 = math.exp %43 : vector<128x128xf32>
      %cst_19 = arith.constant 1.000000e+00 : f32
      %45 = vector.broadcast %cst_19 : f32 to vector<128x128xf32>
      %46 = arith.subf %44, %45 : vector<128x128xf32>
      %47 = arith.select %41, %39, %46 : vector<128x128xi1>, vector<128x128xf32>
      %48 = arith.truncf %47 : vector<128x128xf32> to vector<128x128xbf16>
      %c0_20 = arith.constant 0 : index
      %c0_21 = arith.constant 0 : index
      %49 = vector.load %arg9[%c0_20, %c0_21] : memref<128x128xbf16, #tpu.memory_space<vmem>>, vector<128x128xbf16>
      tpu.vector_store %arg9[%c0_20, %c0_21], %48 {strides = array<i32>} : memref<128x128xbf16, #tpu.memory_space<vmem>>, vector<128x128xbf16>,
    } else {
    }
    return
  }
  func.func @transform_0(%arg0: i32, %arg1: i32, %arg2: memref<1x1xi32, #tpu.memory_space<smem>>) -> (i32, i32) {
    %c0_i32 = arith.constant 0 : i32
    %c0_i32_0 = arith.constant 0 : i32
    return %arg1, %c0_i32 : i32, i32
  }
  func.func @transform_1(%arg0: i32, %arg1: i32, %arg2: memref<1x1xi32, #tpu.memory_space<smem>>) -> (i32, i32) {
    %c0_i32 = arith.constant 0 : i32
    %c0_i32_0 = arith.constant 0 : i32
    return %c0_i32, %arg1 : i32, i32
  }
  func.func @transform_2(%arg0: i32, %arg1: i32, %arg2: memref<1x1xi32, #tpu.memory_space<smem>>) -> (i32, i32) {
    %c0_i32 = arith.constant 0 : i32
    %c0_i32_0 = arith.constant 0 : i32
    return %arg0, %c0_i32 : i32, i32
  }
  func.func @transform_3(%arg0: i32, %arg1: i32, %arg2: memref<1x1xi32, #tpu.memory_space<smem>>) -> (i32, i32) {
    %c0_i32 = arith.constant 0 : i32
    return %arg0, %arg1 : i32, i32
  }
  func.func @transform_4(%arg0: i32, %arg1: i32, %arg2: memref<1x1xi32, #tpu.memory_space<smem>>) -> (i32, i32) {
    %c0_i32 = arith.constant 0 : i32
    %c0_i32_0 = arith.constant 0 : i32
    %c0_i32_1 = arith.constant 0 : i32
    return %c0_i32, %c0_i32_0 : i32, i32
  }
  func.func @transform_5(%arg0: i32, %arg1: i32, %arg2: memref<1x1xi32, #tpu.memory_space<smem>>) -> (i32, i32) {
    %c0_i32 = arith.constant 0 : i32
    %c0_i32_0 = arith.constant 0 : i32
    %c0_i32_1 = arith.constant 0 : i32
    return %c0_i32, %c0_i32_0 : i32, i32
  }
  func.func @transform_6(%arg0: i32, %arg1: i32, %arg2: memref<1x1xi32, #tpu.memory_space<smem>>) -> (i32, i32) {
    %c0_i32 = arith.constant 0 : i32
    %c0_i32_0 = arith.constant 0 : i32
    return %arg0, %c0_i32 : i32, i32
  }
}

module attributes {stable_mosaic.version = 11 : i64} {
  func.func @_gat_linear_kernel(%arg0: i32, %arg1: memref<128x128xbf16, #tpu.memory_space<vmem>>, %arg2: memref<128x128xbf16, #tpu.memory_space<vmem>>, %arg3: memref<128x128xbf16, #tpu.memory_space<vmem>>, %arg4: memref<128x128xbf16, #tpu.memory_space<vmem>>, %arg5: memref<128x128xf32, #tpu.memory_space<vmem>>) attributes {dimension_semantics = [#tpu.dimension_semantics<parallel>], iteration_bounds = array<i64: 1>, scalar_prefetch = 0 : i64, scratch_operands = 0 : i64, tpu.core_type = #tpu.core_type<tc>, window_params = [{transform_indices = @transform_0, window_bounds = array<i64: 128, 128>}, {pipeline_mode = #tpu.pipeline_mode<synchronous>, transform_indices = @transform_1, window_bounds = array<i64: 128, 128>}, {pipeline_mode = #tpu.pipeline_mode<synchronous>, transform_indices = @transform_2, window_bounds = array<i64: 128, 128>}, {transform_indices = @transform_3, window_bounds = array<i64: 128, 128>}, {transform_indices = @transform_4, window_bounds = array<i64: 128, 128>}]} {
    %c0 = arith.constant 0 : index
    %c0_0 = arith.constant 0 : index
    %0 = vector.load %arg1[%c0, %c0_0] : memref<128x128xbf16, #tpu.memory_space<vmem>>, vector<128x128xbf16>
    %c0_1 = arith.constant 0 : index
    %c0_2 = arith.constant 0 : index
    %1 = vector.load %arg2[%c0_1, %c0_2] : memref<128x128xbf16, #tpu.memory_space<vmem>>, vector<128x128xbf16>
    %cst = arith.constant dense<0.000000e+00> : vector<128x128xf32>
    %2 = tpu.matmul %0, %1, %cst {dimension_numbers = #tpu.dot_dimension_numbers<[1], [0], [0], [1], [0, 0, 1, 1], [], []>} : vector<128x128xbf16>, vector<128x128xbf16>, vector<128x128xf32> -> vector<128x128xf32>
    %3 = arith.truncf %2 : vector<128x128xf32> to vector<128x128xbf16>
    %c0_3 = arith.constant 0 : index
    %c0_4 = arith.constant 0 : index
    %4 = vector.load %arg3[%c0_3, %c0_4] : memref<128x128xbf16, #tpu.memory_space<vmem>>, vector<128x128xbf16>
    %cst_5 = arith.constant dense<0.000000e+00> : vector<128x128xf32>
    %5 = tpu.matmul %3, %4, %cst_5 {dimension_numbers = #tpu.dot_dimension_numbers<[1], [0], [0], [1], [0, 0, 1, 1], [], []>} : vector<128x128xbf16>, vector<128x128xbf16>, vector<128x128xf32> -> vector<128x128xf32>
    %6 = tpu.iota {dimensions = array<i32: 1>} : vector<128x128xi32>
    %c8_i32 = arith.constant 8 : i32
    %7 = vector.broadcast %c8_i32 : i32 to vector<128x128xi32>
    %8 = arith.cmpi eq, %6, %7 : vector<128x128xi32>
    %cst_6 = arith.constant 1.000000e+00 : f32
    %9 = vector.broadcast %cst_6 : f32 to vector<128x128xf32>
    %10 = arith.select %8, %9, %2 : vector<128x128xi1>, vector<128x128xf32>
    %11 = arith.truncf %10 : vector<128x128xf32> to vector<128x128xbf16>
    %c0_7 = arith.constant 0 : index
    %c0_8 = arith.constant 0 : index
    %12 = vector.load %arg4[%c0_7, %c0_8] : memref<128x128xbf16, #tpu.memory_space<vmem>>, vector<128x128xbf16>
    tpu.vector_store %arg4[%c0_7, %c0_8], %11 {strides = array<i32>} : memref<128x128xbf16, #tpu.memory_space<vmem>>, vector<128x128xbf16>,
    %c0_9 = arith.constant 0 : index
    %c0_10 = arith.constant 0 : index
    %13 = vector.load %arg5[%c0_9, %c0_10] : memref<128x128xf32, #tpu.memory_space<vmem>>, vector<128x128xf32>
    tpu.vector_store %arg5[%c0_9, %c0_10], %5 {strides = array<i32>} : memref<128x128xf32, #tpu.memory_space<vmem>>, vector<128x128xf32>,
    return
  }
  func.func @transform_0(%arg0: i32) -> (i32, i32) {
    %c0_i32 = arith.constant 0 : i32
    %c0_i32_0 = arith.constant 0 : i32
    return %arg0, %c0_i32 : i32, i32
  }
  func.func @transform_1(%arg0: i32) -> (i32, i32) {
    %c0_i32 = arith.constant 0 : i32
    %c0_i32_0 = arith.constant 0 : i32
    %c0_i32_1 = arith.constant 0 : i32
    return %c0_i32, %c0_i32_0 : i32, i32
  }
  func.func @transform_2(%arg0: i32) -> (i32, i32) {
    %c0_i32 = arith.constant 0 : i32
    %c0_i32_0 = arith.constant 0 : i32
    %c0_i32_1 = arith.constant 0 : i32
    return %c0_i32, %c0_i32_0 : i32, i32
  }
  func.func @transform_3(%arg0: i32) -> (i32, i32) {
    %c0_i32 = arith.constant 0 : i32
    %c0_i32_0 = arith.constant 0 : i32
    return %arg0, %c0_i32 : i32, i32
  }
  func.func @transform_4(%arg0: i32) -> (i32, i32) {
    %c0_i32 = arith.constant 0 : i32
    %c0_i32_0 = arith.constant 0 : i32
    return %arg0, %c0_i32 : i32, i32
  }
}

module attributes {stable_mosaic.version = 11 : i64} {
  func.func @_gat_attn_kernel(%arg0: i32, %arg1: i32, %arg2: memref<1x1xi32, #tpu.memory_space<smem>>, %arg3: memref<128x128xbf16, #tpu.memory_space<vmem>>, %arg4: memref<1x128xf32, #tpu.memory_space<vmem>>, %arg5: memref<128x1xf32, #tpu.memory_space<vmem>>, %arg6: memref<128x128xi8, #tpu.memory_space<vmem>>, %arg7: memref<1x128xf32, #tpu.memory_space<vmem>>, %arg8: memref<1x128xf32, #tpu.memory_space<vmem>>, %arg9: memref<128x128xf32, #tpu.memory_space<vmem>>, %arg10: memref<1x128x128xf32, #tpu.memory_space<vmem>>, %arg11: memref<1x128x1xf32, #tpu.memory_space<vmem>>) attributes {dimension_semantics = [#tpu.dimension_semantics<parallel>, #tpu.dimension_semantics<arbitrary>], iteration_bounds = array<i64: 1, 1>, scalar_prefetch = 1 : i64, scratch_operands = 2 : i64, tpu.core_type = #tpu.core_type<tc>, window_params = [{transform_indices = @transform_0, window_bounds = array<i64: 128, 128>}, {transform_indices = @transform_1, window_bounds = array<i64: 1, 128>}, {transform_indices = @transform_2, window_bounds = array<i64: 128, 1>}, {transform_indices = @transform_3, window_bounds = array<i64: 128, 128>}, {pipeline_mode = #tpu.pipeline_mode<synchronous>, transform_indices = @transform_4, window_bounds = array<i64: 1, 128>}, {pipeline_mode = #tpu.pipeline_mode<synchronous>, transform_indices = @transform_5, window_bounds = array<i64: 1, 128>}, {transform_indices = @transform_6, window_bounds = array<i64: 128, 128>}]} {
    %c0_i32 = arith.constant 0 : i32
    %0 = arith.cmpi eq, %arg1, %c0_i32 : i32
    %1 = arith.extui %0 : i1 to i32
    %c0_i32_0 = arith.constant 0 : i32
    %2 = arith.cmpi ne, %1, %c0_i32_0 : i32
    scf.if %2 {
      %cst = arith.constant 0.000000e+00 : f32
      %12 = vector.broadcast %cst : f32 to vector<1x128x128xf32>
      %c0 = arith.constant 0 : index
      %c0_5 = arith.constant 0 : index
      %c0_6 = arith.constant 0 : index
      %13 = vector.load %arg10[%c0, %c0_5, %c0_6] : memref<1x128x128xf32, #tpu.memory_space<vmem>>, vector<1x128x128xf32>
      tpu.vector_store %arg10[%c0, %c0_5, %c0_6], %12 {strides = array<i32>} : memref<1x128x128xf32, #tpu.memory_space<vmem>>, vector<1x128x128xf32>,
      %cst_7 = arith.constant 0.000000e+00 : f32
      %14 = vector.broadcast %cst_7 : f32 to vector<1x128x1xf32>
      %c0_8 = arith.constant 0 : index
      %c0_9 = arith.constant 0 : index
      %c0_10 = arith.constant 0 : index
      %15 = vector.load %arg11[%c0_8, %c0_9, %c0_10] : memref<1x128x1xf32, #tpu.memory_space<vmem>>, vector<1x128x1xf32>
      tpu.vector_store %arg11[%c0_8, %c0_9, %c0_10], %14 {strides = array<i32>} : memref<1x128x1xf32, #tpu.memory_space<vmem>>, vector<1x128x1xf32>,
    } else {
    }
    %3 = arith.index_cast %arg0 : i32 to index
    %4 = arith.index_cast %arg1 : i32 to index
    %5 = memref.load %arg2[%3, %4] : memref<1x1xi32, #tpu.memory_space<smem>>
    %c0_i32_1 = arith.constant 0 : i32
    %6 = arith.cmpi sgt, %5, %c0_i32_1 : i32
    %7 = arith.extui %6 : i1 to i32
    %c0_i32_2 = arith.constant 0 : i32
    %8 = arith.cmpi ne, %7, %c0_i32_2 : i32
    scf.if %8 {
      %c0 = arith.constant 0 : index
      %c0_5 = arith.constant 0 : index
      %12 = vector.load %arg6[%c0, %c0_5] : memref<128x128xi8, #tpu.memory_space<vmem>>, vector<128x128xi8>
      %c0_i8 = arith.constant 0 : i8
      %13 = vector.broadcast %c0_i8 : i8 to vector<128x128xi8>
      %14 = arith.cmpi ne, %12, %13 : vector<128x128xi8>
      %c0_6 = arith.constant 0 : index
      %c0_7 = arith.constant 0 : index
      %15 = vector.load %arg3[%c0_6, %c0_7] : memref<128x128xbf16, #tpu.memory_space<vmem>>, vector<128x128xbf16>
      %c0_8 = arith.constant 0 : index
      %c0_9 = arith.constant 0 : index
      %16 = vector.load %arg5[%c0_8, %c0_9] : memref<128x1xf32, #tpu.memory_space<vmem>>, vector<128x1xf32>
      %c0_10 = arith.constant 0 : index
      %c0_11 = arith.constant 0 : index
      %17 = vector.load %arg4[%c0_10, %c0_11] : memref<1x128xf32, #tpu.memory_space<vmem>>, vector<1x128xf32>
      %18 = vector.broadcast %16 : vector<128x1xf32> to vector<128x128xf32>
      %19 = vector.broadcast %17 : vector<1x128xf32> to vector<128x128xf32>
      %20 = arith.addf %18, %19 : vector<128x128xf32>
      %cst = arith.constant 2.000000e-01 : f32
      %21 = vector.broadcast %cst : f32 to vector<128x128xf32>
      %22 = arith.mulf %21, %20 : vector<128x128xf32>
      %23 = arith.maximumf %20, %22 : vector<128x128xf32>
      %cst_12 = arith.constant -1.000000e+09 : f32
      %24 = vector.broadcast %cst_12 : f32 to vector<128x128xf32>
      %25 = arith.select %14, %23, %24 : vector<128x128xi1>, vector<128x128xf32>
      %c0_13 = arith.constant 0 : index
      %c0_14 = arith.constant 0 : index
      %c0_15 = arith.constant 0 : index
      %26 = vector.load %arg11[%c0_13, %c0_14, %c0_15] : memref<1x128x1xf32, #tpu.memory_space<vmem>>, vector<1x128x1xf32>
      %27 = vector.shape_cast %26 : vector<1x128x1xf32> to vector<128x1xf32>
      %cst_16 = arith.constant dense<0xFF800000> : vector<128xf32>
      %28 = vector.multi_reduction <maximumf>, %25, %cst_16 [1] : vector<128x128xf32> to vector<128xf32>
      %29 = vector.shape_cast %28 : vector<128xf32> to vector<128x1xf32>
      %30 = arith.maximumf %27, %29 : vector<128x1xf32>
      %31 = arith.subf %27, %30 : vector<128x1xf32>
      %32 = math.exp %31 : vector<128x1xf32>
      %33 = vector.broadcast %30 : vector<128x1xf32> to vector<128x128xf32>
      %34 = arith.subf %25, %33 : vector<128x128xf32>
      %35 = math.exp %34 : vector<128x128xf32>
      %c0_17 = arith.constant 0 : index
      %c0_18 = arith.constant 0 : index
      %c0_19 = arith.constant 0 : index
      %36 = vector.load %arg10[%c0_17, %c0_18, %c0_19] : memref<1x128x128xf32, #tpu.memory_space<vmem>>, vector<1x128x128xf32>
      %37 = vector.shape_cast %36 : vector<1x128x128xf32> to vector<128x128xf32>
      %38 = vector.broadcast %32 : vector<128x1xf32> to vector<128x128xf32>
      %39 = arith.mulf %38, %37 : vector<128x128xf32>
      %40 = arith.truncf %35 : vector<128x128xf32> to vector<128x128xbf16>
      %cst_20 = arith.constant dense<0.000000e+00> : vector<128x128xf32>
      %41 = tpu.matmul %40, %15, %cst_20 {dimension_numbers = #tpu.dot_dimension_numbers<[1], [0], [0], [1], [0, 0, 1, 1], [], []>} : vector<128x128xbf16>, vector<128x128xbf16>, vector<128x128xf32> -> vector<128x128xf32>
      %42 = arith.addf %39, %41 : vector<128x128xf32>
      %c0_21 = arith.constant 0 : index
      %c0_22 = arith.constant 0 : index
      %c0_23 = arith.constant 0 : index
      %43 = vector.load %arg10[%c0_21, %c0_22, %c0_23] : memref<1x128x128xf32, #tpu.memory_space<vmem>>, vector<1x128x128xf32>
      %44 = vector.shape_cast %43 : vector<1x128x128xf32> to vector<128x128xf32>
      %45 = vector.shape_cast %42 : vector<128x128xf32> to vector<1x128x128xf32>
      tpu.vector_store %arg10[%c0_21, %c0_22, %c0_23], %45 {strides = array<i32>} : memref<1x128x128xf32, #tpu.memory_space<vmem>>, vector<1x128x128xf32>,
      %c0_24 = arith.constant 0 : index
      %c0_25 = arith.constant 0 : index
      %c0_26 = arith.constant 0 : index
      %46 = vector.load %arg11[%c0_24, %c0_25, %c0_26] : memref<1x128x1xf32, #tpu.memory_space<vmem>>, vector<1x128x1xf32>
      %47 = vector.shape_cast %46 : vector<1x128x1xf32> to vector<128x1xf32>
      %48 = vector.shape_cast %30 : vector<128x1xf32> to vector<1x128x1xf32>
      tpu.vector_store %arg11[%c0_24, %c0_25, %c0_26], %48 {strides = array<i32>} : memref<1x128x1xf32, #tpu.memory_space<vmem>>, vector<1x128x1xf32>,
    } else {
    }
    %c0_i32_3 = arith.constant 0 : i32
    %9 = arith.cmpi eq, %arg1, %c0_i32_3 : i32
    %10 = arith.extui %9 : i1 to i32
    %c0_i32_4 = arith.constant 0 : i32
    %11 = arith.cmpi ne, %10, %c0_i32_4 : i32
    scf.if %11 {
      %cst = arith.constant 0.000000e+00 : f32
      %12 = vector.broadcast %cst : f32 to vector<128x128xf32>
      %c0 = arith.constant 0 : index
      %c0_5 = arith.constant 0 : index
      %c0_6 = arith.constant 0 : index
      %13 = vector.load %arg10[%c0, %c0_5, %c0_6] : memref<1x128x128xf32, #tpu.memory_space<vmem>>, vector<1x128x128xf32>
      %14 = vector.shape_cast %13 : vector<1x128x128xf32> to vector<128x128xf32>
      %15 = vector.extract_strided_slice %14 {offsets = [0, 8], sizes = [128, 1], strides = [1, 1]} : vector<128x128xf32> to vector<128x1xf32>
      %cst_7 = arith.constant 9.99999968E-21 : f32
      %16 = vector.broadcast %cst_7 : f32 to vector<128x1xf32>
      %17 = arith.maximumf %15, %16 : vector<128x1xf32>
      %18 = tpu.reciprocal %17 : vector<128x1xf32> -> vector<128x1xf32>
      %c0_8 = arith.constant 0 : index
      %c0_9 = arith.constant 0 : index
      %19 = vector.load %arg8[%c0_8, %c0_9] : memref<1x128xf32, #tpu.memory_space<vmem>>, vector<1x128xf32>
      %20 = vector.broadcast %18 : vector<128x1xf32> to vector<128x128xf32>
      %21 = arith.mulf %14, %20 : vector<128x128xf32>
      %22 = vector.broadcast %19 : vector<1x128xf32> to vector<128x128xf32>
      %23 = arith.mulf %22, %21 : vector<128x128xf32>
      %24 = arith.addf %12, %23 : vector<128x128xf32>
      %c0_10 = arith.constant 0 : index
      %c0_11 = arith.constant 0 : index
      %25 = vector.load %arg7[%c0_10, %c0_11] : memref<1x128xf32, #tpu.memory_space<vmem>>, vector<1x128xf32>
      %26 = vector.broadcast %25 : vector<1x128xf32> to vector<128x128xf32>
      %27 = arith.addf %24, %26 : vector<128x128xf32>
      %c0_12 = arith.constant 0 : index
      %c0_13 = arith.constant 0 : index
      %28 = vector.load %arg9[%c0_12, %c0_13] : memref<128x128xf32, #tpu.memory_space<vmem>>, vector<128x128xf32>
      tpu.vector_store %arg9[%c0_12, %c0_13], %27 {strides = array<i32>} : memref<128x128xf32, #tpu.memory_space<vmem>>, vector<128x128xf32>,
    } else {
    }
    return
  }
  func.func @transform_0(%arg0: i32, %arg1: i32, %arg2: memref<1x1xi32, #tpu.memory_space<smem>>) -> (i32, i32) {
    %c0_i32 = arith.constant 0 : i32
    %c0_i32_0 = arith.constant 0 : i32
    return %arg1, %c0_i32 : i32, i32
  }
  func.func @transform_1(%arg0: i32, %arg1: i32, %arg2: memref<1x1xi32, #tpu.memory_space<smem>>) -> (i32, i32) {
    %c0_i32 = arith.constant 0 : i32
    %c0_i32_0 = arith.constant 0 : i32
    return %c0_i32, %arg1 : i32, i32
  }
  func.func @transform_2(%arg0: i32, %arg1: i32, %arg2: memref<1x1xi32, #tpu.memory_space<smem>>) -> (i32, i32) {
    %c0_i32 = arith.constant 0 : i32
    %c0_i32_0 = arith.constant 0 : i32
    return %arg0, %c0_i32 : i32, i32
  }
  func.func @transform_3(%arg0: i32, %arg1: i32, %arg2: memref<1x1xi32, #tpu.memory_space<smem>>) -> (i32, i32) {
    %c0_i32 = arith.constant 0 : i32
    return %arg0, %arg1 : i32, i32
  }
  func.func @transform_4(%arg0: i32, %arg1: i32, %arg2: memref<1x1xi32, #tpu.memory_space<smem>>) -> (i32, i32) {
    %c0_i32 = arith.constant 0 : i32
    %c0_i32_0 = arith.constant 0 : i32
    %c0_i32_1 = arith.constant 0 : i32
    return %c0_i32, %c0_i32_0 : i32, i32
  }
  func.func @transform_5(%arg0: i32, %arg1: i32, %arg2: memref<1x1xi32, #tpu.memory_space<smem>>) -> (i32, i32) {
    %c0_i32 = arith.constant 0 : i32
    %c0_i32_0 = arith.constant 0 : i32
    %c0_i32_1 = arith.constant 0 : i32
    return %c0_i32, %c0_i32_0 : i32, i32
  }
  func.func @transform_6(%arg0: i32, %arg1: i32, %arg2: memref<1x1xi32, #tpu.memory_space<smem>>) -> (i32, i32) {
    %c0_i32 = arith.constant 0 : i32
    %c0_i32_0 = arith.constant 0 : i32
    return %arg0, %c0_i32 : i32, i32
  }
}

</mosaic_0001>

<bundles_post_ra>
// kernel: gat_encoder_forward.4
= control target key start
LH: loop header
LB: loop body
LE: loop exit
PB: predicated region body
PF: predicated region fallthrough
CT: control target
= control target key end

     0   :  { %vm49_vm0 = vcmask 130048   ;;  %v340_v33 = vlaneseq  ;;  %s855_s1 = inlined_call_operand.vmem [shape: bf16[16,128], index: 1, kind: input, shape index: {}]   ;;  %s856_s0 = inlined_call_operand.vmem [shape: f32[128,16], index: 0, kind: input, shape index: {}]   ;;  %s857_s2 = inlined_call_operand.vmem [shape: bf16[128,128], index: 2, kind: input, shape index: {}]   ;;  %s858_s3 = inlined_call_operand.vmem [shape: bf16[128,128], index: 3, kind: output, shape index: {0}]   ;;  %s859_s4 = inlined_call_operand.vmem [shape: f32[128,128], index: 4, kind: output, shape index: {1}]  }
   0x1   :  { %v650_v0 = vld [vmem:[%s855_s1] sm:$0xff]   ;;  %v18_v2 = vld [vmem:[%s856_s0 + $0x8] sm:$0xff]  ;;  %v19_v3 = vld [vmem:[%s856_s0 + $0x10] sm:$0xff] }
   0x2   :  { %v17_v1 = vld [vmem:[%s856_s0] sm:$0xff]  ;;  %584 = vmatprep.subr.bf16.mxu0 %v650_v0  ;;  %v20_v5 = vld [vmem:[%s856_s0 + $0x18] sm:$0xff]  ;;  %v22_v7 = vld [vmem:[%s856_s0 + $0x28] sm:$0xff]  ;;  %v341_v34 = vand.u32 127, %v340_v33 }
   0x3   :  { %v33_v4 = vpack.c.bf16 %v18_v2, %v17_v1  ;;  %v21_v6 = vld [vmem:[%s856_s0 + $0x20] sm:$0xff]  ;;  %585 = vmatpush3.bf16.msra.mxu0 %v650_v0  ;;  %v34_v8 = vpack.c.bf16 %v20_v5, %v19_v3  ;;  %v23_v10 = vld [vmem:[%s856_s0 + $0x30] sm:$0xff]  ;;  %v24_v11 = vld [vmem:[%s856_s0 + $0x38] sm:$0xff] }
   0x4   :  { %v35_v9 = vpack.c.bf16 %v22_v7, %v21_v6  ;;  %v25_v12 = vld [vmem:[%s856_s0 + $0x40] sm:$0xff]  ;;  %v26_v13 = vld [vmem:[%s856_s0 + $0x48] sm:$0xff]  ;;  %v36_v16 = vpack.c.bf16 %v24_v11, %v23_v10  ;;  %v653_v18 = vld [vmem:[%s857_s2 + $0x10] sm:$0xff]   ;;  %vm342_vm1 = vcmp.eq.s32.totalorder %v341_v34, 64 }
   0x5   :  { %586 = vmatprep.mubr.msk.bf16.mxu0 %vm49_vm0, %v33_v4  ;;  %v651_v14 = vld [vmem:[%s857_s2] sm:$0xff]   ;;  %v652_v15 = vld [vmem:[%s857_s2 + $0x8] sm:$0xff]   ;;  %v37_v17 = vpack.c.bf16 %v26_v13, %v25_v12  ;;  %v27_v19 = vld [vmem:[%s856_s0 + $0x50] sm:$0xff] }
   0x6   :  { %587 = vmatmul.mubr.msk.bf16.vlgmr.msra.gmra.mrb[0].mxu0 %vm49_vm0, %v34_v8  ;;  %602 = vmatprep.subr.bf16.mxu0 %v651_v14  ;;  %v28_v20 = vld [vmem:[%s856_s0 + $0x58] sm:$0xff]  ;;  %v29_v21 = vld [vmem:[%s856_s0 + $0x60] sm:$0xff]  ;;  %v30_v22 = vld [vmem:[%s856_s0 + $0x68] sm:$0xff] }
   0x7   :  { %590 = vmatprep.mubr.msk.bf16.mxu0 %vm49_vm0, %v35_v9  ;;  %634 = vmatprep.subr.bf16.mxu1 %v651_v14  ;;  %v654_v23 = vld [vmem:[%s857_s2 + $0x18] sm:$0xff]   ;;  %v38_v24 = vpack.c.bf16 %v28_v20, %v27_v19  ;;  %v39_v25 = vpack.c.bf16 %v30_v22, %v29_v21  ;;  %v655_v26 = vld [vmem:[%s857_s2 + $0x20] sm:$0xff]   ;;  %v31_v27 = vld [vmem:[%s856_s0 + $0x70] sm:$0xff] }
   0x8   :  { %603 = vmatpush3.bf16.msra.mxu0 %v651_v14  ;;  %642 = vmatpush3.bf16.msra.mxu1 %v651_v14  ;;  %v32_v28 = vld [vmem:[%s856_s0 + $0x78] sm:$0xff]  ;;  %v656_v29 = vld [vmem:[%s857_s2 + $0x28] sm:$0xff]   ;;  %v657_v31 = vld [vmem:[%s857_s2 + $0x30] sm:$0xff]  }
   0x9   :  { %604 = vmatprep.subr.bf16.mxu0 %v652_v15  ;;  %635 = vmatprep.subr.bf16.mxu1 %v652_v15  ;;  %v40_v30 = vpack.c.bf16 %v32_v28, %v31_v27  ;;  %v658_v32 = vld [vmem:[%s857_s2 + $0x38] sm:$0xff]  }
   0xc   :  { %643 = vmatpush3.bf16.msra.mxu1 %v652_v15  ;;  %605 = vmatpush3.bf16.msra.mxu0 %v652_v15 }
   0xd   :  { %606 = vmatprep.subr.bf16.mxu0 %v653_v18  ;;  %636 = vmatprep.subr.bf16.mxu1 %v653_v18 }
   0xe   :  { %591 = vmatmul.mubr.msk.bf16.gmra.mrb[4].mxu0 %vm49_vm0, %v36_v16 }
   0xf   :  { %594 = vmatprep.mubr.msk.bf16.mxu0 %vm49_vm0, %v37_v17 }
  0x10   :  { %644 = vmatpush3.bf16.msra.mxu1 %v653_v18  ;;  %607 = vmatpush3.bf16.msra.mxu0 %v653_v18 }
  0x11   :  { %637 = vmatprep.subr.bf16.mxu1 %v654_v23  ;;  %608 = vmatprep.subr.bf16.mxu0 %v654_v23 }
  0x14   :  { %645 = vmatpush3.bf16.msra.mxu1 %v654_v23  ;;  %609 = vmatpush3.bf16.msra.mxu0 %v654_v23 }
  0x15   :  { %610 = vmatprep.subr.bf16.mxu0 %v655_v26  ;;  %638 = vmatprep.subr.bf16.mxu1 %v655_v26 }
  0x16   :  { %595 = vmatmul.mubr.msk.bf16.gmra.mrb[8].mxu0 %vm49_vm0, %v38_v24 }
  0x17   :  { %598 = vmatprep.mubr.msk.bf16.mxu0 %vm49_vm0, %v39_v25 }
  0x18   :  { %646 = vmatpush3.bf16.msra.mxu1 %v655_v26  ;;  %611 = vmatpush3.bf16.msra.mxu0 %v655_v26 }
  0x19   :  { %639 = vmatprep.subr.bf16.mxu1 %v656_v29  ;;  %612 = vmatprep.subr.bf16.mxu0 %v656_v29 }
  0x1c   :  { %647 = vmatpush3.bf16.msra.mxu1 %v656_v29  ;;  %613 = vmatpush3.bf16.msra.mxu0 %v656_v29 }
  0x1d   :  { %640 = vmatprep.subr.bf16.mxu1 %v657_v31  ;;  %614 = vmatprep.subr.bf16.mxu0 %v657_v31 }
  0x1e   :  { %599 = vmatmul.mubr.msk.bf16.gmra.mrb[12].mxu0 %vm49_vm0, %v40_v30 }
  0x20   :  { %648 = vmatpush3.bf16.msra.mxu1 %v657_v31  ;;  %615 = vmatpush3.bf16.msra.mxu0 %v657_v31 }
  0x21   :  { %616 = vmatprep.subr.bf16.mxu0 %v658_v32  ;;  %641 = vmatprep.subr.bf16.mxu1 %v658_v32 }
  0x24   :  { %617 = vmatpush3.bf16.msra.mxu0 %v658_v32  ;;  %649 = vmatpush3.bf16.msra.mxu1 %v658_v32 }
  0xd9   :  { %v588_v35 = vpop.f32.mrb[0].mxu0 }
  0xda   :  { %v108_v36 = vpop.f32.mrb[1].mxu0  ;;  %v345_v38 = vsel %vm342_vm1, 1.0, %v588_v35 }
  0xdb   :  { %v589_v37 = vpop.f32.mrb[2].mxu0  ;;  %v343_v42 = vsel %vm342_vm1, 1.0, %v108_v36 }
  0xdc   :  { %v172_v39 = vpack.c.bf16 %v589_v37, %v588_v35  ;;  %v346_v40 = vsel %vm342_vm1, 1.0, %v589_v37  ;;  %v111_v41 = vpop.f32.mrb[3].mxu0 }
  0xdd   :  { %v520_v43 = vpack.c.bf16 %v346_v40, %v345_v38  ;;  %v171_v44 = vpack.c.bf16 %v111_v41, %v108_v36  ;;  %v344_v45 = vsel %vm342_vm1, 1.0, %v111_v41 }
  0xde   :  { %v515_v46 = vpack.c.bf16 %v344_v45, %v343_v42 }
  0xdf   :  { %552 = vst [vmem:[%s858_s3 + $0x8] sm:$0xff] %v520_v43   ;;  %618 = vmatprep.mubr.bf16.mxu0 %v171_v44 }
  0xe0   :  { %516 = vst [vmem:[%s858_s3] sm:$0xff] %v515_v46   ;;  %619 = vmatmul.mubr.bf16.vlgmr.msra.gmra.mrb[16].mxu0 %v172_v39 }
  0xe1   :  { %v592_v47 = vpop.f32.mrb[4].mxu0 }
  0xe2   :  { %v124_v48 = vpop.f32.mrb[5].mxu0  ;;  %v349_v50 = vsel %vm342_vm1, 1.0, %v592_v47 }
  0xe3   :  { %v593_v49 = vpop.f32.mrb[6].mxu0  ;;  %v347_v54 = vsel %vm342_vm1, 1.0, %v124_v48 }
  0xe4   :  { %v174_v51 = vpack.c.bf16 %v593_v49, %v592_v47  ;;  %v350_v52 = vsel %vm342_vm1, 1.0, %v593_v49  ;;  %v127_v53 = vpop.f32.mrb[7].mxu0 }
  0xe5   :  { %v530_v55 = vpack.c.bf16 %v350_v52, %v349_v50  ;;  %v348_v56 = vsel %vm342_vm1, 1.0, %v127_v53  ;;  %v173_v57 = vpack.c.bf16 %v127_v53, %v124_v48 }
  0xe6   :  { %v525_v58 = vpack.c.bf16 %v348_v56, %v347_v54 }
  0xe7   :  { %554 = vst [vmem:[%s858_s3 + $0x18] sm:$0xff] %v530_v55   ;;  %622 = vmatprep.mubr.bf16.mxu1 %v173_v57 }
  0xe8   :  { %553 = vst [vmem:[%s858_s3 + $0x10] sm:$0xff] %v525_v58   ;;  %623 = vmatmul.mubr.bf16.vlgmr.msra.gmra.mrb[0].mxu1 %v174_v51 }
  0xe9   :  { %v596_v59 = vpop.f32.mrb[8].mxu0 }
  0xea   :  { %v140_v60 = vpop.f32.mrb[9].mxu0  ;;  %v353_v62 = vsel %vm342_vm1, 1.0, %v596_v59 }
  0xeb   :  { %v597_v61 = vpop.f32.mrb[10].mxu0  ;;  %v351_v2 = vsel %vm342_vm1, 1.0, %v140_v60 }
  0xec   :  { %v176_v63 = vpack.c.bf16 %v597_v61, %v596_v59  ;;  %v354_v0 = vsel %vm342_vm1, 1.0, %v597_v61  ;;  %v143_v1 = vpop.f32.mrb[11].mxu0 }
  0xed   :  { %v540_v3 = vpack.c.bf16 %v354_v0, %v353_v62  ;;  %v175_v4 = vpack.c.bf16 %v143_v1, %v140_v60  ;;  %v352_v5 = vsel %vm342_vm1, 1.0, %v143_v1 }
  0xee   :  { %v535_v6 = vpack.c.bf16 %v352_v5, %v351_v2 }
  0xef   :  { %556 = vst [vmem:[%s858_s3 + $0x28] sm:$0xff] %v540_v3   ;;  %626 = vmatprep.mubr.bf16.mxu1 %v175_v4 }
  0xf0   :  { %555 = vst [vmem:[%s858_s3 + $0x20] sm:$0xff] %v535_v6   ;;  %627 = vmatmul.mubr.bf16.gmra.mrb[4].mxu1 %v176_v63 }
  0xf1   :  { %v600_v7 = vpop.f32.mrb[12].mxu0 }
  0xf2   :  { %v156_v8 = vpop.f32.mrb[13].mxu0  ;;  %v357_v10 = vsel %vm342_vm1, 1.0, %v600_v7 }
  0xf3   :  { %v601_v9 = vpop.f32.mrb[14].mxu0  ;;  %v355_v14 = vsel %vm342_vm1, 1.0, %v156_v8 }
  0xf4   :  { %v178_v11 = vpack.c.bf16 %v601_v9, %v600_v7  ;;  %v358_v12 = vsel %vm342_vm1, 1.0, %v601_v9  ;;  %v159_v13 = vpop.f32.mrb[15].mxu0 }
  0xf5   :  { %v550_v15 = vpack.c.bf16 %v358_v12, %v357_v10  ;;  %v177_v16 = vpack.c.bf16 %v159_v13, %v156_v8  ;;  %v356_v17 = vsel %vm342_vm1, 1.0, %v159_v13 }
  0xf6   :  { %v545_v18 = vpack.c.bf16 %v356_v17, %v355_v14 }
  0xf7   :  { %558 = vst [vmem:[%s858_s3 + $0x38] sm:$0xff] %v550_v15   ;;  %630 = vmatprep.mubr.bf16.mxu1 %v177_v16 }
  0xf8   :  { %557 = vst [vmem:[%s858_s3 + $0x30] sm:$0xff] %v545_v18   ;;  %631 = vmatmul.mubr.bf16.gmra.mrb[8].mxu1 %v178_v11 }
 0x1b3   :  { %v620_v19 = vpop.f32.mrb[16].mxu0 }
 0x1b4   :  { %441 = vst [vmem:[%s859_s4 + $0x10] sm:$0xff] %v620_v19  ;;  %v277_v20 = vpop.f32.mrb[17].mxu0 }
 0x1b5   :  { %439 = vst [vmem:[%s859_s4] sm:$0xff] %v277_v20  ;;  %v621_v21 = vpop.f32.mrb[18].mxu0 }
 0x1b6   :  { %442 = vst [vmem:[%s859_s4 + $0x18] sm:$0xff] %v621_v21  ;;  %v280_v22 = vpop.f32.mrb[19].mxu0 }
 0x1b7   :  { %440 = vst [vmem:[%s859_s4 + $0x8] sm:$0xff] %v280_v22 }
 0x1bb   :  { %v624_v23 = vpop.f32.mrb[0].mxu1 }
 0x1bc   :  { %445 = vst [vmem:[%s859_s4 + $0x30] sm:$0xff] %v624_v23  ;;  %v293_v24 = vpop.f32.mrb[1].mxu1 }
 0x1bd   :  { %443 = vst [vmem:[%s859_s4 + $0x20] sm:$0xff] %v293_v24  ;;  %v625_v25 = vpop.f32.mrb[2].mxu1 }
 0x1be   :  { %446 = vst [vmem:[%s859_s4 + $0x38] sm:$0xff] %v625_v25  ;;  %v296_v26 = vpop.f32.mrb[3].mxu1 }
 0x1bf   :  { %444 = vst [vmem:[%s859_s4 + $0x28] sm:$0xff] %v296_v26 }
 0x1c3   :  { %v628_v27 = vpop.f32.mrb[4].mxu1 }
 0x1c4   :  { %449 = vst [vmem:[%s859_s4 + $0x50] sm:$0xff] %v628_v27  ;;  %v309_v28 = vpop.f32.mrb[5].mxu1 }
 0x1c5   :  { %447 = vst [vmem:[%s859_s4 + $0x40] sm:$0xff] %v309_v28  ;;  %v629_v29 = vpop.f32.mrb[6].mxu1 }
 0x1c6   :  { %450 = vst [vmem:[%s859_s4 + $0x58] sm:$0xff] %v629_v29  ;;  %v312_v30 = vpop.f32.mrb[7].mxu1 }
 0x1c7   :  { %448 = vst [vmem:[%s859_s4 + $0x48] sm:$0xff] %v312_v30 }
 0x1cb   :  { %v632_v31 = vpop.f32.mrb[8].mxu1 }
 0x1cc   :  { %453 = vst [vmem:[%s859_s4 + $0x70] sm:$0xff] %v632_v31  ;;  %v325_v32 = vpop.f32.mrb[9].mxu1 }
 0x1cd   :  { %451 = vst [vmem:[%s859_s4 + $0x60] sm:$0xff] %v325_v32  ;;  %v633_v33 = vpop.f32.mrb[10].mxu1 }
 0x1ce   :  { %454 = vst [vmem:[%s859_s4 + $0x78] sm:$0xff] %v633_v33  ;;  %v328_v34 = vpop.f32.mrb[11].mxu1 }
 0x1cf   :  { %452 = vst [vmem:[%s859_s4 + $0x68] sm:$0xff] %v328_v34 }

// kernel: gat_encoder_forward.6
= control target key start
LH: loop header
LB: loop body
LE: loop exit
PB: predicated region body
PF: predicated region fallthrough
CT: control target
= control target key end

     0   :  { %v411_v24 = vlaneseq  ;;  %s942_s1 = inlined_call_operand.vmem [shape: bf16[128,128], index: 1, kind: input, shape index: {}]   ;;  %s943_s0 = inlined_call_operand.vmem [shape: bf16[128,128], index: 0, kind: input, shape index: {}]   ;;  %s944_s2 = inlined_call_operand.vmem [shape: bf16[128,128], index: 2, kind: input, shape index: {}]   ;;  %s945_s3 = inlined_call_operand.vmem [shape: bf16[128,128], index: 3, kind: output, shape index: {0}]   ;;  %s946_s4 = inlined_call_operand.vmem [shape: f32[128,128], index: 4, kind: output, shape index: {1}]  }
   0x1   :  { %v733_v0 = vld [vmem:[%s942_s1] sm:$0xff]   ;;  %v734_v1 = vld [vmem:[%s942_s1 + $0x8] sm:$0xff]   ;;  %v735_v2 = vld [vmem:[%s942_s1 + $0x10] sm:$0xff]  }
   0x2   :  { %669 = vmatprep.subr.bf16.mxu0 %v733_v0  ;;  %v736_v3 = vld [vmem:[%s942_s1 + $0x18] sm:$0xff]   ;;  %v741_v4 = vld [vmem:[%s943_s0] sm:$0xff]   ;;  %v738_v6 = vld [vmem:[%s942_s1 + $0x28] sm:$0xff]   ;;  %v412_v25 = vand.u32 127, %v411_v24 }
   0x3   :  { %670 = vmatpush3.bf16.msra.mxu0 %v733_v0  ;;  %685 = vmatprep.mubr.bf16.mxu0 %v741_v4  ;;  %v737_v5 = vld [vmem:[%s942_s1 + $0x20] sm:$0xff]   ;;  %v750_v8 = vld [vmem:[%s944_s2 + $0x8] sm:$0xff]   ;;  %v739_v9 = vld [vmem:[%s942_s1 + $0x30] sm:$0xff]  }
   0x4   :  { %671 = vmatprep.subr.bf16.mxu0 %v734_v1  ;;  %v749_v7 = vld [vmem:[%s944_s2] sm:$0xff]   ;;  %v751_v10 = vld [vmem:[%s944_s2 + $0x10] sm:$0xff]   ;;  %v740_v11 = vld [vmem:[%s942_s1 + $0x38] sm:$0xff]   ;;  %vm413_vm0 = vcmp.eq.s32.totalorder %v412_v25, 8 }
   0x5   :  { %701 = vmatprep.subr.bf16.mxu1 %v749_v7  ;;  %v752_v12 = vld [vmem:[%s944_s2 + $0x18] sm:$0xff]   ;;  %v753_v13 = vld [vmem:[%s944_s2 + $0x20] sm:$0xff]   ;;  %v742_v14 = vld [vmem:[%s943_s0 + $0x8] sm:$0xff]  }
   0x6   :  { %702 = vmatpush3.bf16.msra.mxu1 %v749_v7  ;;  %v743_v15 = vld [vmem:[%s943_s0 + $0x10] sm:$0xff]   ;;  %v754_v16 = vld [vmem:[%s944_s2 + $0x28] sm:$0xff]   ;;  %v744_v18 = vld [vmem:[%s943_s0 + $0x18] sm:$0xff]  }
   0x7   :  { %672 = vmatpush3.bf16.msra.mxu0 %v734_v1  ;;  %703 = vmatprep.subr.bf16.mxu1 %v750_v8  ;;  %v755_v17 = vld [vmem:[%s944_s2 + $0x30] sm:$0xff]   ;;  %v745_v19 = vld [vmem:[%s943_s0 + $0x20] sm:$0xff]   ;;  %v746_v20 = vld [vmem:[%s943_s0 + $0x28] sm:$0xff]  }
   0x8   :  { %673 = vmatprep.subr.bf16.mxu0 %v735_v2  ;;  %v747_v21 = vld [vmem:[%s943_s0 + $0x30] sm:$0xff]   ;;  %v748_v22 = vld [vmem:[%s943_s0 + $0x38] sm:$0xff]  }
   0x9   :  { %v756_v23 = vld [vmem:[%s944_s2 + $0x38] sm:$0xff]  }
   0xa   :  { %704 = vmatpush3.bf16.msra.mxu1 %v750_v8 }
   0xb   :  { %674 = vmatpush3.bf16.msra.mxu0 %v735_v2  ;;  %705 = vmatprep.subr.bf16.mxu1 %v751_v10 }
   0xc   :  { %675 = vmatprep.subr.bf16.mxu0 %v736_v3 }
   0xe   :  { %706 = vmatpush3.bf16.msra.mxu1 %v751_v10 }
   0xf   :  { %676 = vmatpush3.bf16.msra.mxu0 %v736_v3  ;;  %707 = vmatprep.subr.bf16.mxu1 %v752_v12 }
  0x10   :  { %677 = vmatprep.subr.bf16.mxu0 %v737_v5 }
  0x12   :  { %708 = vmatpush3.bf16.msra.mxu1 %v752_v12 }
  0x13   :  { %678 = vmatpush3.bf16.msra.mxu0 %v737_v5  ;;  %709 = vmatprep.subr.bf16.mxu1 %v753_v13 }
  0x14   :  { %679 = vmatprep.subr.bf16.mxu0 %v738_v6 }
  0x16   :  { %710 = vmatpush3.bf16.msra.mxu1 %v753_v13 }
  0x17   :  { %680 = vmatpush3.bf16.msra.mxu0 %v738_v6  ;;  %711 = vmatprep.subr.bf16.mxu1 %v754_v16 }
  0x18   :  { %681 = vmatprep.subr.bf16.mxu0 %v739_v9 }
  0x1a   :  { %712 = vmatpush3.bf16.msra.mxu1 %v754_v16 }
  0x1b   :  { %682 = vmatpush3.bf16.msra.mxu0 %v739_v9  ;;  %713 = vmatprep.subr.bf16.mxu1 %v755_v17 }
  0x1c   :  { %683 = vmatprep.subr.bf16.mxu0 %v740_v11 }
  0x1e   :  { %714 = vmatpush3.bf16.msra.mxu1 %v755_v17 }
  0x1f   :  { %684 = vmatpush3.bf16.msra.mxu0 %v740_v11  ;;  %715 = vmatprep.subr.bf16.mxu1 %v756_v23 }
  0x22   :  { %686 = vmatmul.mubr.bf16.vlgmr.msra.gmra.mrb[0].mxu0 %v742_v14  ;;  %716 = vmatpush3.bf16.msra.mxu1 %v756_v23 }
  0x23   :  { %689 = vmatprep.mubr.bf16.mxu0 %v743_v15 }
  0x2a   :  { %690 = vmatmul.mubr.bf16.gmra.mrb[4].mxu0 %v744_v18 }
  0x2b   :  { %693 = vmatprep.mubr.bf16.mxu0 %v745_v19 }
  0x32   :  { %694 = vmatmul.mubr.bf16.gmra.mrb[8].mxu0 %v746_v20 }
  0x33   :  { %697 = vmatprep.mubr.bf16.mxu0 %v747_v21 }
  0x3a   :  { %698 = vmatmul.mubr.bf16.gmra.mrb[12].mxu0 %v748_v22 }
  0xf5   :  { %v687_v26 = vpop.f32.mrb[0].mxu0 }
  0xf6   :  { %v179_v27 = vpop.f32.mrb[1].mxu0  ;;  %v416_v29 = vsel %vm413_vm0, 1.0, %v687_v26 }
  0xf7   :  { %v688_v28 = vpop.f32.mrb[2].mxu0  ;;  %v414_v33 = vsel %vm413_vm0, 1.0, %v179_v27 }
  0xf8   :  { %v243_v30 = vpack.c.bf16 %v688_v28, %v687_v26  ;;  %v417_v31 = vsel %vm413_vm0, 1.0, %v688_v28  ;;  %v182_v32 = vpop.f32.mrb[3].mxu0 }
  0xf9   :  { %v598_v34 = vpack.c.bf16 %v417_v31, %v416_v29  ;;  %v415_v35 = vsel %vm413_vm0, 1.0, %v182_v32  ;;  %v242_v36 = vpack.c.bf16 %v182_v32, %v179_v27 }
  0xfa   :  { %v593_v37 = vpack.c.bf16 %v415_v35, %v414_v33 }
  0xfb   :  { %630 = vst [vmem:[%s945_s3 + $0x8] sm:$0xff] %v598_v34   ;;  %717 = vmatprep.mubr.bf16.mxu1 %v242_v36 }
  0xfc   :  { %594 = vst [vmem:[%s945_s3] sm:$0xff] %v593_v37   ;;  %718 = vmatmul.mubr.bf16.vlgmr.msra.gmra.mrb[0].mxu1 %v243_v30 }
  0xfd   :  { %v691_v38 = vpop.f32.mrb[4].mxu0 }
  0xfe   :  { %v195_v39 = vpop.f32.mrb[5].mxu0  ;;  %v420_v41 = vsel %vm413_vm0, 1.0, %v691_v38 }
  0xff   :  { %v692_v40 = vpop.f32.mrb[6].mxu0  ;;  %v418_v45 = vsel %vm413_vm0, 1.0, %v195_v39 }
 0x100   :  { %v245_v42 = vpack.c.bf16 %v692_v40, %v691_v38  ;;  %v421_v43 = vsel %vm413_vm0, 1.0, %v692_v40  ;;  %v198_v44 = vpop.f32.mrb[7].mxu0 }
 0x101   :  { %v608_v46 = vpack.c.bf16 %v421_v43, %v420_v41  ;;  %v244_v47 = vpack.c.bf16 %v198_v44, %v195_v39  ;;  %v419_v48 = vsel %vm413_vm0, 1.0, %v198_v44 }
 0x102   :  { %v603_v49 = vpack.c.bf16 %v419_v48, %v418_v45 }
 0x103   :  { %632 = vst [vmem:[%s945_s3 + $0x18] sm:$0xff] %v608_v46   ;;  %721 = vmatprep.mubr.bf16.mxu1 %v244_v47 }
 0x104   :  { %631 = vst [vmem:[%s945_s3 + $0x10] sm:$0xff] %v603_v49   ;;  %722 = vmatmul.mubr.bf16.gmra.mrb[4].mxu1 %v245_v42 }
 0x105   :  { %v695_v50 = vpop.f32.mrb[8].mxu0 }
 0x106   :  { %v211_v51 = vpop.f32.mrb[9].mxu0  ;;  %v424_v53 = vsel %vm413_vm0, 1.0, %v695_v50 }
 0x107   :  { %v696_v52 = vpop.f32.mrb[10].mxu0  ;;  %v422_v57 = vsel %vm413_vm0, 1.0, %v211_v51 }
 0x108   :  { %v247_v54 = vpack.c.bf16 %v696_v52, %v695_v50  ;;  %v425_v55 = vsel %vm413_vm0, 1.0, %v696_v52  ;;  %v214_v56 = vpop.f32.mrb[11].mxu0 }
 0x109   :  { %v618_v58 = vpack.c.bf16 %v425_v55, %v424_v53  ;;  %v246_v59 = vpack.c.bf16 %v214_v56, %v211_v51  ;;  %v423_v60 = vsel %vm413_vm0, 1.0, %v214_v56 }
 0x10a   :  { %v613_v61 = vpack.c.bf16 %v423_v60, %v422_v57 }
 0x10b   :  { %634 = vst [vmem:[%s945_s3 + $0x28] sm:$0xff] %v618_v58   ;;  %725 = vmatprep.mubr.bf16.mxu1 %v246_v59 }
 0x10c   :  { %633 = vst [vmem:[%s945_s3 + $0x20] sm:$0xff] %v613_v61   ;;  %726 = vmatmul.mubr.bf16.gmra.mrb[8].mxu1 %v247_v54 }
 0x10d   :  { %v699_v62 = vpop.f32.mrb[12].mxu0 }
 0x10e   :  { %v227_v63 = vpop.f32.mrb[13].mxu0  ;;  %v428_v1 = vsel %vm413_vm0, 1.0, %v699_v62 }
 0x10f   :  { %v700_v0 = vpop.f32.mrb[14].mxu0  ;;  %v426_v5 = vsel %vm413_vm0, 1.0, %v227_v63 }
 0x110   :  { %v249_v2 = vpack.c.bf16 %v700_v0, %v699_v62  ;;  %v429_v3 = vsel %vm413_vm0, 1.0, %v700_v0  ;;  %v230_v4 = vpop.f32.mrb[15].mxu0 }
 0x111   :  { %v628_v6 = vpack.c.bf16 %v429_v3, %v428_v1  ;;  %v248_v7 = vpack.c.bf16 %v230_v4, %v227_v63  ;;  %v427_v8 = vsel %vm413_vm0, 1.0, %v230_v4 }
 0x112   :  { %v623_v9 = vpack.c.bf16 %v427_v8, %v426_v5 }
 0x113   :  { %636 = vst [vmem:[%s945_s3 + $0x38] sm:$0xff] %v628_v6   ;;  %729 = vmatprep.mubr.bf16.mxu1 %v248_v7 }
 0x114   :  { %635 = vst [vmem:[%s945_s3 + $0x30] sm:$0xff] %v623_v9   ;;  %730 = vmatmul.mubr.bf16.gmra.mrb[12].mxu1 %v249_v2 }
 0x1cf   :  { %v719_v10 = vpop.f32.mrb[0].mxu1 }
 0x1d0   :  { %512 = vst [vmem:[%s946_s4 + $0x10] sm:$0xff] %v719_v10  ;;  %v348_v11 = vpop.f32.mrb[1].mxu1 }
 0x1d1   :  { %510 = vst [vmem:[%s946_s4] sm:$0xff] %v348_v11  ;;  %v720_v12 = vpop.f32.mrb[2].mxu1 }
 0x1d2   :  { %513 = vst [vmem:[%s946_s4 + $0x18] sm:$0xff] %v720_v12  ;;  %v351_v13 = vpop.f32.mrb[3].mxu1 }
 0x1d3   :  { %511 = vst [vmem:[%s946_s4 + $0x8] sm:$0xff] %v351_v13 }
 0x1d7   :  { %v723_v14 = vpop.f32.mrb[4].mxu1 }
 0x1d8   :  { %516 = vst [vmem:[%s946_s4 + $0x30] sm:$0xff] %v723_v14  ;;  %v364_v15 = vpop.f32.mrb[5].mxu1 }
 0x1d9   :  { %514 = vst [vmem:[%s946_s4 + $0x20] sm:$0xff] %v364_v15  ;;  %v724_v16 = vpop.f32.mrb[6].mxu1 }
 0x1da   :  { %517 = vst [vmem:[%s946_s4 + $0x38] sm:$0xff] %v724_v16  ;;  %v367_v17 = vpop.f32.mrb[7].mxu1 }
 0x1db   :  { %515 = vst [vmem:[%s946_s4 + $0x28] sm:$0xff] %v367_v17 }
 0x1df   :  { %v727_v18 = vpop.f32.mrb[8].mxu1 }
 0x1e0   :  { %520 = vst [vmem:[%s946_s4 + $0x50] sm:$0xff] %v727_v18  ;;  %v380_v19 = vpop.f32.mrb[9].mxu1 }
 0x1e1   :  { %518 = vst [vmem:[%s946_s4 + $0x40] sm:$0xff] %v380_v19  ;;  %v728_v20 = vpop.f32.mrb[10].mxu1 }
 0x1e2   :  { %521 = vst [vmem:[%s946_s4 + $0x58] sm:$0xff] %v728_v20  ;;  %v383_v21 = vpop.f32.mrb[11].mxu1 }
 0x1e3   :  { %519 = vst [vmem:[%s946_s4 + $0x48] sm:$0xff] %v383_v21 }
 0x1e7   :  { %v731_v22 = vpop.f32.mrb[12].mxu1 }
 0x1e8   :  { %524 = vst [vmem:[%s946_s4 + $0x70] sm:$0xff] %v731_v22  ;;  %v396_v23 = vpop.f32.mrb[13].mxu1 }
 0x1e9   :  { %522 = vst [vmem:[%s946_s4 + $0x60] sm:$0xff] %v396_v23  ;;  %v732_v24 = vpop.f32.mrb[14].mxu1 }
 0x1ea   :  { %525 = vst [vmem:[%s946_s4 + $0x78] sm:$0xff] %v732_v24  ;;  %v399_v25 = vpop.f32.mrb[15].mxu1 }
 0x1eb   :  { %523 = vst [vmem:[%s946_s4 + $0x68] sm:$0xff] %v399_v25 }

// kernel: gat_encoder_forward.5
= control target key start
LH: loop header
LB: loop body
LE: loop exit
PB: predicated region body
PF: predicated region fallthrough
CT: control target
= control target key end

     0   :  { %vm64_vm0 = vcmask 7168   ;;  %v2657_v0 = vmov 0.0   ;;  %s4000_s0 = inlined_call_operand.<no memory space> [shape: s32[1,1], index: 0, kind: input, shape index: {}]   ;;  %s4001_s1 = inlined_call_operand.vmem [shape: bf16[128,128], index: 1, kind: input, shape index: {}]   ;;  %s4002_s2 = inlined_call_operand.vmem [shape: f32[2,128], index: 2, kind: input, shape index: {}]   ;;  %s4003_s3 = inlined_call_operand.vmem [shape: f32[128,2], index: 3, kind: input, shape index: {}]   ;;  %s4004_s4 = inlined_call_operand.vmem [shape: s8[128,128], index: 4, kind: input, shape index: {}]   ;;  %s4005_s5 = inlined_call_operand.vmem [shape: f32[1,128], index: 5, kind: input, shape index: {}]   ;;  %s4006_s6 = inlined_call_operand.vmem [shape: f32[2,128], index: 6, kind: input, shape index: {}]   ;;  %s4007_s7 = inlined_call_operand.vmem [shape: bf16[128,128], index: 7, kind: output, shape index: {}]  }
   0x1   :  { %32 = vst [vmem:[#allocation2] sm:$0xff] %v2657_v0  ;;  %33 = vst [vmem:[#allocation2 + $0x8] sm:$0xff] %v2657_v0  ;;  %p2205_p0 = scmp.le.s32.totalorder %s4000_s0, 0 }
   0x2   :  { %34 = vst [vmem:[#allocation2 + $0x10] sm:$0xff] %v2657_v0  ;;  %35 = vst [vmem:[#allocation2 + $0x18] sm:$0xff] %v2657_v0 }
   0x3   :  { %36 = vst [vmem:[#allocation2 + $0x20] sm:$0xff] %v2657_v0  ;;  %37 = vst [vmem:[#allocation2 + $0x28] sm:$0xff] %v2657_v0 }
   0x4   :  { %38 = vst [vmem:[#allocation2 + $0x30] sm:$0xff] %v2657_v0  ;;  %39 = vst [vmem:[#allocation2 + $0x38] sm:$0xff] %v2657_v0 }
   0x5   :  { %40 = vst [vmem:[#allocation2 + $0x40] sm:$0xff] %v2657_v0  ;;  %41 = vst [vmem:[#allocation2 + $0x48] sm:$0xff] %v2657_v0 }
   0x6   :  { %42 = vst [vmem:[#allocation2 + $0x50] sm:$0xff] %v2657_v0  ;;  %43 = vst [vmem:[#allocation2 + $0x58] sm:$0xff] %v2657_v0 }
   0x7   :  { %44 = vst [vmem:[#allocation2 + $0x60] sm:$0xff] %v2657_v0  ;;  %45 = vst [vmem:[#allocation2 + $0x68] sm:$0xff] %v2657_v0 }
   0x8   :  { %46 = vst [vmem:[#allocation2 + $0x70] sm:$0xff] %v2657_v0  ;;  %47 = vst [vmem:[#allocation2 + $0x78] sm:$0xff] %v2657_v0 }
   0x9   :  { %48 = vst [vmem:[#allocation2 + $0x80] sm:$0xff] %v2657_v0  ;;  %49 = vst [vmem:[#allocation2 + $0x88] sm:$0xff] %v2657_v0 }
   0xa   :  { %50 = vst [vmem:[#allocation2 + $0x90] sm:$0xff] %v2657_v0  ;;  %51 = vst [vmem:[#allocation2 + $0x98] sm:$0xff] %v2657_v0 }
   0xb   :  { %52 = vst [vmem:[#allocation2 + $0xa0] sm:$0xff] %v2657_v0  ;;  %53 = vst [vmem:[#allocation2 + $0xa8] sm:$0xff] %v2657_v0 }
   0xc   :  { %54 = vst [vmem:[#allocation2 + $0xb0] sm:$0xff] %v2657_v0  ;;  %55 = vst [vmem:[#allocation2 + $0xb8] sm:$0xff] %v2657_v0 }
   0xd   :  { %56 = vst [vmem:[#allocation2 + $0xc0] sm:$0xff] %v2657_v0  ;;  %57 = vst [vmem:[#allocation2 + $0xc8] sm:$0xff] %v2657_v0 }
   0xe   :  { %58 = vst [vmem:[#allocation2 + $0xd0] sm:$0xff] %v2657_v0  ;;  %59 = vst [vmem:[#allocation2 + $0xd8] sm:$0xff] %v2657_v0 }
   0xf   :  { %60 = vst [vmem:[#allocation2 + $0xe0] sm:$0xff] %v2657_v0  ;;  %61 = vst [vmem:[#allocation2 + $0xe8] sm:$0xff] %v2657_v0 }
  0x10   :  { %62 = vst [vmem:[#allocation2 + $0xf0] sm:$0xff] %v2657_v0  ;;  %63 = vst [vmem:[#allocation2 + $0xf8] sm:$0xff] %v2657_v0 }
  0x11   :  { %65 = vst.msk [vmem:[#allocation3] sm:$0xff] %vm64_vm0, %v2657_v0  ;;  %66 = vst.msk [vmem:[#allocation3 + $0x8] sm:$0xff] %vm64_vm0, %v2657_v0 }
  0x12   :  { %67 = vst.msk [vmem:[#allocation3 + $0x10] sm:$0xff] %vm64_vm0, %v2657_v0  ;;  %68 = vst.msk [vmem:[#allocation3 + $0x18] sm:$0xff] %vm64_vm0, %v2657_v0 }
  0x13   :  { %69 = vst.msk [vmem:[#allocation3 + $0x20] sm:$0xff] %vm64_vm0, %v2657_v0  ;;  %70 = vst.msk [vmem:[#allocation3 + $0x28] sm:$0xff] %vm64_vm0, %v2657_v0 }
  0x14   :  { %71 = vst.msk [vmem:[#allocation3 + $0x30] sm:$0xff] %vm64_vm0, %v2657_v0  ;;  %72 = vst.msk [vmem:[#allocation3 + $0x38] sm:$0xff] %vm64_vm0, %v2657_v0 }
  0x15   :  { %73 = vst.msk [vmem:[#allocation3 + $0x40] sm:$0xff] %vm64_vm0, %v2657_v0  ;;  %74 = vst.msk [vmem:[#allocation3 + $0x48] sm:$0xff] %vm64_vm0, %v2657_v0 }
  0x16   :  { %75 = vst.msk [vmem:[#allocation3 + $0x50] sm:$0xff] %vm64_vm0, %v2657_v0  ;;  %76 = vst.msk [vmem:[#allocation3 + $0x58] sm:$0xff] %vm64_vm0, %v2657_v0 }
  0x17   :  { %77 = vst.msk [vmem:[#allocation3 + $0x60] sm:$0xff] %vm64_vm0, %v2657_v0  ;;  %78 = vst.msk [vmem:[#allocation3 + $0x68] sm:$0xff] %vm64_vm0, %v2657_v0 }
  0x18   :  { %79 = vst.msk [vmem:[#allocation3 + $0x70] sm:$0xff] %vm64_vm0, %v2657_v0  ;;  %80 = vst.msk [vmem:[#allocation3 + $0x78] sm:$0xff] %vm64_vm0, %v2657_v0 }
  0x19   :  { %81 = vst.msk [vmem:[#allocation3 + $0x80] sm:$0xff] %vm64_vm0, %v2657_v0  ;;  %82 = vst.msk [vmem:[#allocation3 + $0x88] sm:$0xff] %vm64_vm0, %v2657_v0 }
  0x1a   :  { %83 = vst.msk [vmem:[#allocation3 + $0x90] sm:$0xff] %vm64_vm0, %v2657_v0  ;;  %84 = vst.msk [vmem:[#allocation3 + $0x98] sm:$0xff] %vm64_vm0, %v2657_v0  ;;  %104 = sbr.rel (%p2205_p0) target bundleno = 762 (0x2fa), region = 33 }
  0x1b   :  { %85 = vst.msk [vmem:[#allocation3 + $0xa0] sm:$0xff] %vm64_vm0, %v2657_v0  ;;  %86 = vst.msk [vmem:[#allocation3 + $0xa8] sm:$0xff] %vm64_vm0, %v2657_v0 }
  0x1c   :  { %87 = vst.msk [vmem:[#allocation3 + $0xb0] sm:$0xff] %vm64_vm0, %v2657_v0  ;;  %88 = vst.msk [vmem:[#allocation3 + $0xb8] sm:$0xff] %vm64_vm0, %v2657_v0 }
  0x1d   :  { %89 = vst.msk [vmem:[#allocation3 + $0xc0] sm:$0xff] %vm64_vm0, %v2657_v0  ;;  %90 = vst.msk [vmem:[#allocation3 + $0xc8] sm:$0xff] %vm64_vm0, %v2657_v0 }
  0x1e   :  { %91 = vst.msk [vmem:[#allocation3 + $0xd0] sm:$0xff] %vm64_vm0, %v2657_v0  ;;  %92 = vst.msk [vmem:[#allocation3 + $0xd8] sm:$0xff] %vm64_vm0, %v2657_v0 }
  0x1f   :  { %93 = vst.msk [vmem:[#allocation3 + $0xe0] sm:$0xff] %vm64_vm0, %v2657_v0  ;;  %94 = vst.msk [vmem:[#allocation3 + $0xe8] sm:$0xff] %vm64_vm0, %v2657_v0 }
  0x20   :  { %95 = vst.msk [vmem:[#allocation3 + $0xf0] sm:$0xff] %vm64_vm0, %v2657_v0  ;;  %96 = vst.msk [vmem:[#allocation3 + $0xf8] sm:$0xff] %vm64_vm0, %v2657_v0 }
  0x21   :  { %v965_v1 = vld [vmem:[%s4003_s3 + $0x8] sm:$0xff]  ;;  %v131_v2 = vld [vmem:[%s4003_s3 + $0x10] sm:$0xff]  ;;  %v2658_v3 = vmov 1   ;;  %v2659_v4 = vmov 0   ;;  %v968_v5 = vld [vmem:[%s4003_s3 + $0x20] sm:$0xff] }
  0x22   :  { %2416 = vset.pattern.permute.xlu0 %v2658_v3  ;;  %2414 = vset.pattern.permute.xlu1 %v2659_v4  ;;  %v132_v6 = vld [vmem:[%s4003_s3 + $0x18] sm:$0xff]  ;;  %v970_v7 = vld [vmem:[%s4003_s3 + $0x30] sm:$0xff]  ;;  %v134_v8 = vld [vmem:[%s4003_s3 + $0x28] sm:$0xff] }
  0x23   :  { %988 = vperm.xlu0 %2416, %v965_v1   ;;  %158 = vperm.xlu1 %2414, %v131_v2   ;;  %v972_v9 = vld [vmem:[%s4003_s3 + $0x40] sm:$0xff]  ;;  %v136_v10 = vld [vmem:[%s4003_s3 + $0x38] sm:$0xff]  ;;  %v138_v12 = vld [vmem:[%s4003_s3 + $0x48] sm:$0xff] }
  0x24   :  { %v976_v11 = vld [vmem:[%s4003_s3 + $0x60] sm:$0xff]  ;;  %v139_v14 = vld [vmem:[%s4003_s3 + $0x50] sm:$0xff]  ;;  %v140_v15 = vld [vmem:[%s4003_s3 + $0x58] sm:$0xff] }
  0x25   :  { %v964_v13 = vld [vmem:[%s4003_s3] sm:$0xff]  ;;  %v144_v16 = vld [vmem:[%s4003_s3 + $0x78] sm:$0xff]  ;;  %v142_v17 = vld [vmem:[%s4003_s3 + $0x68] sm:$0xff] }
  0x26   :  { %v143_v18 = vld [vmem:[%s4003_s3 + $0x70] sm:$0xff]  ;;  %v105_v19 = vld [vmem:[%s4004_s4] sm:$0xff]  ;;  %v106_v31 = vld [vmem:[%s4004_s4 + $0x8] sm:$0xff] }
  0x27   :  { %1003 = vperm.xlu0 %2416, %v968_v5   ;;  %163 = vperm.xlu1 %2414, %v132_v6   ;;  %vm109_vm1 = vnez %v105_v19  ;;  %vm110_vm2 = vnez %v106_v31  ;;  %v2882_v47 = vld [vmem:[%s4002_s2 + $0x1] ss:$0 sm:$0xff]  ;;  %v2887_v48 = vld [vmem:[%s4002_s2] ss:$0 sm:$0xff]  ;;  %v107_v54 = vld [vmem:[%s4004_s4 + $0x10] sm:$0xff] }
  0x28   :  { %v278_v22 = vsel %vm109_vm1, 16843009, %v2659_v4  ;;  %v2871_v39 = vsel %vm110_vm2, 16843009, %v2659_v4  ;;  %vm111_vm7 = vnez %v107_v54 }
  0x29   :  { %v282_v23 = vunpack.c.0.s8 %v278_v22  ;;  %v283_v29 = vunpack.c.1.s8 %v278_v22  ;;  %v284_v30 = vunpack.c.2.s8 %v278_v22  ;;  %v285_v32 = vunpack.c.3.s8 %v278_v22 }
  0x2a   :  { %v286_v44 = vunpack.c.0.s8 %v2871_v39  ;;  %v287_v53 = vunpack.c.1.s8 %v2871_v39  ;;  %v288_v63 = vunpack.c.2.s8 %v2871_v39 }
  0x2b   :  { %1013 = vperm.xlu0 %2416, %v970_v7   ;;  %173 = vperm.xlu1 %2414, %v134_v8   ;;  %v298_v26 = vpack.c.b16 %v282_v23, %v282_v23  ;;  %v300_v36 = vpack.c.b16 %v283_v29, %v283_v29  ;;  %v302_v37 = vpack.c.b16 %v284_v30, %v284_v30 }
  0x2c   :  { %v304_v38 = vpack.c.b16 %v285_v32, %v285_v32  ;;  %v306_v52 = vpack.c.b16 %v286_v44, %v286_v44  ;;  %v310_v23 = vpack.c.b16 %v288_v63, %v288_v63 }
  0x2d   :  { %v299_v33 = vpack.c.b8 %v298_v26, %v298_v26  ;;  %v301_v42 = vpack.c.b8 %v300_v36, %v300_v36  ;;  %v303_v43 = vpack.c.b8 %v302_v37, %v302_v37 }
  0x2e   :  { %v305_v46 = vpack.c.b8 %v304_v38, %v304_v38 }
  0x2f   :  { %1023 = vperm.xlu0 %2416, %v972_v9   ;;  %183 = vperm.xlu1 %2414, %v136_v10   ;;  %vm330_vm3 = vnez %v299_v33  ;;  %vm331_vm4 = vnez %v301_v42  ;;  %vm332_vm5 = vnez %v303_v43 }
  0x30   :  { %v346_v45 = vsel %vm330_vm3, 16843009, %v2659_v4  ;;  %vm333_vm6 = vnez %v305_v46  ;;  %v347_v59 = vsel %vm331_vm4, 16843009, %v2659_v4  ;;  %v348_v60 = vsel %vm332_vm5, 16843009, %v2659_v4 }
  0x31   :  { %v362_v51 = vunpack.c.0.s8 %v346_v45  ;;  %v311_v45 = vpack.c.b8 %v310_v23, %v310_v23 }
  0x33   :  { %1043 = vperm.xlu0 %2416, %v976_v11   ;;  %193 = vperm.xlu1 %2414, %v138_v12   ;;  %vm2902_vm8 = vcmp.ne.s32.totalorder %v362_v51, 0  ;;  %vm2978_vm14 = vnez %v311_v45 }
  0x37   :  { %2418 = vset.pattern.permute.xlu0 %v2659_v4  ;;  %2415 = vset.pattern.permute.xlu1 %v2658_v3 }
  0x38   :  { %983 = vperm.xlu1 %2415, %v964_v13   ;;  %148 = vperm.xlu0 %2418, %v964_v13  }
  0x3c   :  { %993 = vperm.xlu1 %2415, %v131_v2   ;;  %153 = vperm.xlu0 %2418, %v965_v1  }
  0x40   :  { %998 = vperm.xlu1 %2415, %v132_v6   ;;  %168 = vperm.xlu0 %2418, %v968_v5   ;;  %v307_v5 = vpack.c.b8 %v306_v52, %v306_v52  ;;  %v308_v6 = vpack.c.b16 %v287_v53, %v287_v53 }
  0x42   :  { %vm2917_vm9 = vnez %v307_v5  ;;  %v309_v22 = vpack.c.b8 %v308_v6, %v308_v6  ;;  %v108_v5 = vld [vmem:[%s4004_s4 + $0x18] sm:$0xff] }
  0x43   :  { %v350_v51 = vsel %vm2917_vm9, 16843009, %v2659_v4  ;;  %vm112_vm2 = vnez %v108_v5 }
  0x44   :  { %1008 = vperm.xlu1 %2415, %v134_v8   ;;  %178 = vperm.xlu0 %2418, %v970_v7   ;;  %vm2954_vm13 = vnez %v309_v22 }
  0x48   :  { %1018 = vperm.xlu1 %2415, %v136_v10   ;;  %188 = vperm.xlu0 %2418, %v972_v9   ;;  %v363_v9 = vunpack.c.0.s8 %v347_v59  ;;  %v364_v10 = vunpack.c.0.s8 %v348_v60 }
  0x4a   :  { %vm2925_vm10 = vcmp.ne.s32.totalorder %v363_v9, 0  ;;  %vm2929_vm11 = vcmp.ne.s32.totalorder %v364_v10, 0 }
  0x4c   :  { %1028 = vperm.xlu1 %2415, %v138_v12   ;;  %198 = vperm.xlu0 %2418, %v139_v14  }
  0x50   :  { %1033 = vperm.xlu1 %2415, %v139_v14   ;;  %203 = vperm.xlu0 %2418, %v140_v15  }
  0x54   :  { %1038 = vperm.xlu1 %2415, %v140_v15   ;;  %208 = vperm.xlu0 %2418, %v976_v11  }
  0x58   :  { %223 = vperm.xlu0 %2418, %v144_v16   ;;  %2417 = vset.pattern.permute.xlu1 %v2659_v4 }
  0x59   :  { %213 = vperm.xlu1 %2417, %v142_v17  }
  0x5d   :  { %2419 = vset.pattern.permute.xlu1 %v2658_v3 }
  0x5e   :  { %1048 = vperm.xlu1 %2419, %v142_v17  }
  0x62   :  { %2420 = vset.pattern.permute.xlu1 %v2659_v4 }
  0x63   :  { %218 = vperm.xlu1 %2420, %v143_v18  }
  0x67   :  { %2421 = vset.pattern.permute.xlu1 %v2658_v3  ;;  %v349_v3 = vsel %vm333_vm6, 16843009, %v2659_v4 }
  0x68   :  { %1053 = vperm.xlu1 %2421, %v143_v18   ;;  %v289_v18 = vunpack.c.3.s8 %v2871_v39  ;;  %v365_v31 = vunpack.c.0.s8 %v349_v3 }
  0x6a   :  { %v312_v46 = vpack.c.b16 %v289_v18, %v289_v18  ;;  %vm2947_vm12 = vcmp.ne.s32.totalorder %v365_v31, 0  ;;  %v352_v18 = vsel %vm2978_vm14, 16843009, %v2659_v4 }
  0x6c   :  { %1058 = vperm.xlu1 %2421, %v144_v16  }
  0x70   :  { %2422 = vset.pattern.permute.xlu1 %v2659_v4 }
  0xa2   :  { %v989_v20 = vpop.permute.xlu0 %988  ;;  %v159_v21 = vpop.permute.xlu1 %158 }
  0xa3   :  { %v2896_v57 = vadd.f32 %v2882_v47, %v989_v20  ;;  %v232_v58 = vadd.f32 %v2887_v48, %v159_v21 }
  0xa5   :  { %v1082_v11 = vmul.f32 0.2, %v2896_v57  ;;  %v248_v12 = vmul.f32 0.2, %v232_v58 }
  0xa6   :  { %v2857_v24 = vpop.permute.xlu0 %1003  ;;  %v164_v25 = vpop.permute.xlu1 %163 }
  0xa7   :  { %v233_v13 = vadd.f32 %v2887_v48, %v164_v25  ;;  %v2923_v25 = vsel %vm111_vm7, 16843009, %v2659_v4  ;;  %v264_v36 = vmax.f32 %v232_v58, %v248_v12  ;;  %v1098_v37 = vmax.f32 %v2896_v57, %v1082_v11 }
  0xa8   :  { %v291_v53 = vunpack.c.1.s8 %v2923_v25  ;;  %v1069_v54 = vadd.f32 %v2882_v47, %v2857_v24  ;;  %v366_v24 = vunpack.c.0.s8 %v350_v51  ;;  %v292_v23 = vunpack.c.2.s8 %v2923_v25 }
  0xa9   :  { %v249_v32 = vmul.f32 0.2, %v233_v13 }
  0xaa   :  { %v2859_v27 = vpop.permute.xlu0 %1013  ;;  %v2861_v28 = vpop.permute.xlu1 %173  ;;  %v316_v3 = vpack.c.b16 %v291_v53, %v291_v53  ;;  %v1085_v6 = vmul.f32 0.2, %v1069_v54  ;;  %vm3002_vm15 = vcmp.ne.s32.totalorder %v366_v24, 0 }
  0xab   :  { %v265_v57 = vmax.f32 %v233_v13, %v249_v32 }
  0xac   :  { %v317_v22 = vpack.c.b8 %v316_v3, %v316_v3  ;;  %v1101_v31 = vmax.f32 %v1069_v54, %v1085_v6 }
  0xad   :  { %v2991_v9 = vsel %vm2947_vm12, %v265_v57, -1e+09 }
  0xae   :  { %v2866_v34 = vpop.permute.xlu0 %1023  ;;  %v2868_v35 = vpop.permute.xlu1 %183  ;;  %4053 = vst [vmem:[#allocation8_spill] sm:$0xff] %v2991_v9  ;;  %vm3048_vm5 = vnez %v317_v22  ;;  %v3059_v54 = vsel %vm3002_vm15, %v1101_v31, -1e+09 }
  0xaf   :  { %v3018_v29 = vadd.f32 %v2887_v48, %v2868_v35  ;;  %v368_v35 = vunpack.c.0.s8 %v352_v18  ;;  %4067 = vst [vmem:[#allocation12_spill] sm:$0xff] %v3059_v54  ;;  %v1073_v5 = vadd.f32 %v2882_v47, %v2866_v34 }
  0xb1   :  { %v253_v52 = vmul.f32 0.2, %v3018_v29  ;;  %vm3069_vm6 = vcmp.ne.s32.totalorder %v368_v35, 0 }
  0xb2   :  { %v2873_v40 = vpop.permute.xlu0 %1043  ;;  %v2875_v41 = vpop.permute.xlu1 %193 }
  0xb3   :  { %v239_v6 = vadd.f32 %v2887_v48, %v2875_v41 }
  0xb7   :  { %v984_v49 = vpop.permute.xlu1 %983  ;;  %v149_v50 = vpop.permute.xlu0 %148 }
  0xb8   :  { %v1065_v55 = vadd.f32 %v2882_v47, %v984_v49  ;;  %v230_v56 = vadd.f32 %v2887_v48, %v149_v50  ;;  %v290_v49 = vunpack.c.0.s8 %v2923_v25  ;;  %v293_v50 = vunpack.c.3.s8 %v2923_v25 }
  0xba   :  { %v1081_v61 = vmul.f32 0.2, %v1065_v55  ;;  %v246_v62 = vmul.f32 0.2, %v230_v56  ;;  %v314_v2 = vpack.c.b16 %v290_v49, %v290_v49  ;;  %v318_v49 = vpack.c.b16 %v292_v23, %v292_v23 }
  0xbb   :  { %v994_v0 = vpop.permute.xlu1 %993  ;;  %v154_v1 = vpop.permute.xlu0 %153 }
  0xbc   :  { %v231_v7 = vadd.f32 %v2887_v48, %v154_v1  ;;  %v262_v8 = vmax.f32 %v230_v56, %v246_v62  ;;  %v1067_v14 = vadd.f32 %v2882_v47, %v994_v0  ;;  %v1097_v17 = vmax.f32 %v1065_v55, %v1081_v61 }
  0xbd   :  { %v2963_v55 = vadd.f32 %v2887_v48, %v2861_v28  ;;  %v2967_v56 = vsel %vm2929_vm11, %v264_v36, -1e+09  ;;  %v2971_v61 = vsel %vm2925_vm10, %v1098_v37, -1e+09  ;;  %v313_v28 = vpack.c.b8 %v312_v46, %v312_v46 }
  0xbe   :  { %v247_v15 = vmul.f32 0.2, %v231_v7  ;;  %v2913_v16 = vsel %vm2902_vm8, %v262_v8, -1e+09  ;;  %v1083_v33 = vmul.f32 0.2, %v1067_v14  ;;  %v315_v21 = vpack.c.b8 %v314_v2, %v314_v2 }
  0xbf   :  { %v999_v19 = vpop.permute.xlu1 %998  ;;  %v169_v20 = vpop.permute.xlu0 %168  ;;  %426 = vmax.xlane.f32.xlu0 %v2913_v16  ;;  %v2942_v43 = vsel %vm2902_vm8, %v1097_v17, -1e+09  ;;  %4049 = vst [vmem:[#allocation6_spill] sm:$0xff] %v2967_v56  ;;  %4050 = vst [vmem:[#allocation7_spill] sm:$0xff] %v2971_v61  ;;  %v351_v0 = vsel %vm2954_vm13, 16843009, %v2659_v4  ;;  %vm3009_vm1 = vnez %v313_v28  ;;  %v319_v1 = vpack.c.b8 %v318_v49, %v318_v49 }
  0xc0   :  { %v263_v26 = vmax.f32 %v231_v7, %v247_v15  ;;  %v1068_v38 = vadd.f32 %v2882_v47, %v999_v19  ;;  %v234_v39 = vadd.f32 %v2887_v48, %v169_v20  ;;  %v1099_v62 = vmax.f32 %v1067_v14, %v1083_v33  ;;  %v3270_v49 = vld [vmem:[#allocation3] sm:$0xff] }
  0xc1   :  { %v251_v7 = vmul.f32 0.2, %v2963_v55  ;;  %v367_v17 = vunpack.c.0.s8 %v351_v0  ;;  %vm3044_vm4 = vnez %v315_v21  ;;  %v355_v0 = vsel %vm3048_vm5, 16843009, %v2659_v4 }
  0xc2   :  { %v2938_v42 = vsel %vm2925_vm10, %v263_v26, -1e+09  ;;  %v1084_v58 = vmul.f32 0.2, %v1068_v38  ;;  %v250_v59 = vmul.f32 0.2, %v234_v39  ;;  %v1071_v26 = vadd.f32 %v2882_v47, %v2859_v27 }
  0xc3   :  { %v1009_v44 = vpop.permute.xlu1 %1008  ;;  %428 = vmax.xlane.f32.xlu1 %v2938_v42  ;;  %1146 = vmax.xlane.f32.xlu0 %v2942_v43  ;;  %v179_v60 = vpop.permute.xlu0 %178  ;;  %v2996_v11 = vsel %vm2929_vm11, %v1099_v62, -1e+09  ;;  %v267_v37 = vmax.f32 %v2963_v55, %v251_v7  ;;  %vm3034_vm3 = vcmp.ne.s32.totalorder %v367_v17, 0  ;;  %v320_v2 = vpack.c.b16 %v293_v50, %v293_v50 }
  0xc4   :  { %v2987_v8 = vadd.f32 %v2882_v47, %v1009_v44  ;;  %v236_v10 = vadd.f32 %v2887_v48, %v179_v60  ;;  %4054 = vst [vmem:[#allocation9_spill] sm:$0xff] %v2996_v11  ;;  %v266_v12 = vmax.f32 %v234_v39, %v250_v59  ;;  %v1100_v13 = vmax.f32 %v1068_v38, %v1084_v58 }
  0xc5   :  { %v353_v39 = vsel %vm3009_vm1, 16843009, %v2659_v4  ;;  %v3042_v44 = vsel %vm112_vm2, 16843009, %v2659_v4  ;;  %v1087_v51 = vmul.f32 0.2, %v1071_v26  ;;  %v269_v15 = vmax.f32 %v3018_v29, %v253_v52 }
  0xc6   :  { %v1086_v30 = vmul.f32 0.2, %v2987_v8  ;;  %v252_v32 = vmul.f32 0.2, %v236_v10  ;;  %v3023_v33 = vsel %vm3002_vm15, %v266_v12, -1e+09  ;;  %v369_v62 = vunpack.c.0.s8 %v353_v39 }
  0xc7   :  { %v1019_v63 = vpop.permute.xlu1 %1018  ;;  %430 = vmax.xlane.f32.xlu1 %v2967_v56  ;;  %1148 = vmax.xlane.f32.xlu0 %v2971_v61  ;;  %v189_v20 = vpop.permute.xlu0 %188  ;;  %4059 = vst [vmem:[#allocation10_spill] sm:$0xff] %v3023_v33  ;;  %v3027_v36 = vsel %vm2947_vm12, %v1100_v13, -1e+09  ;;  %v3064_v58 = vsel %vm3034_vm3, %v267_v37, -1e+09  ;;  %v294_v24 = vunpack.c.0.s8 %v3042_v44  ;;  %v295_v3 = vunpack.c.1.s8 %v3042_v44 }
  0xc8   :  { %4060 = vst [vmem:[#allocation11_spill] sm:$0xff] %v3027_v36  ;;  %v3055_v53 = vadd.f32 %v2882_v47, %v1019_v63  ;;  %v238_v55 = vadd.f32 %v2887_v48, %v189_v20  ;;  %4068 = vst [vmem:[#allocation13_spill] sm:$0xff] %v3064_v58  ;;  %v268_v59 = vmax.f32 %v236_v10, %v252_v32  ;;  %v354_v63 = vsel %vm3044_vm4, 16843009, %v2659_v4 }
  0xc9   :  { %v1102_v25 = vmax.f32 %v2987_v8, %v1086_v30  ;;  %v1103_v8 = vmax.f32 %v1071_v26, %v1087_v51  ;;  %vm3099_vm7 = vcmp.ne.s32.totalorder %v369_v62, 0  ;;  %v370_v41 = vunpack.c.0.s8 %v354_v63 }
  0xca   :  { %v1088_v7 = vmul.f32 0.2, %v3055_v53  ;;  %v254_v10 = vmul.f32 0.2, %v238_v55  ;;  %v3090_v12 = vsel %vm3069_vm6, %v268_v59, -1e+09  ;;  %v371_v17 = vunpack.c.0.s8 %v355_v0 }
  0xcb   :  { %v2998_v14 = vpop.permute.xlu1 %1028  ;;  %1150 = vmax.xlane.f32.xlu1 %v2996_v11  ;;  %432 = vmax.xlane.f32.xlu0 %v2991_v9  ;;  %v199_v57 = vpop.permute.xlu0 %198  ;;  %4071 = vst [vmem:[#allocation14_spill] sm:$0xff] %v3090_v12  ;;  %v3094_v13 = vsel %vm3034_vm3, %v1102_v25, -1e+09  ;;  %v322_v18 = vpack.c.b16 %v294_v24, %v294_v24  ;;  %vm3103_vm8 = vnez %v319_v1  ;;  %v321_v22 = vpack.c.b8 %v320_v2, %v320_v2  ;;  %v3528_v11 = vld [vmem:[#allocation3 + $0xe8] sm:$0xff] }
  0xcc   :  { %4072 = vst [vmem:[#allocation15_spill] sm:$0xff] %v3094_v13  ;;  %v324_v23 = vpack.c.b16 %v295_v3, %v295_v3  ;;  %v1089_v26 = vmul.f32 0.2, %v1073_v5  ;;  %v255_v29 = vmul.f32 0.2, %v239_v6  ;;  %v1074_v30 = vadd.f32 %v2882_v47, %v2998_v14 }
  0xcd   :  { %v3111_v31 = vsel %vm3069_vm6, %v1103_v8, -1e+09  ;;  %v240_v32 = vadd.f32 %v2887_v48, %v199_v57  ;;  %v3116_v37 = vsel %vm3099_vm7, %v269_v15, -1e+09  ;;  %v270_v27 = vmax.f32 %v238_v55, %v254_v10 }
  0xce   :  { %4077 = vst [vmem:[#allocation16_spill] sm:$0xff] %v3111_v31  ;;  %4078 = vst [vmem:[#allocation17_spill] sm:$0xff] %v3116_v37  ;;  %v1104_v35 = vmax.f32 %v3055_v53, %v1088_v7  ;;  %vm3121_vm9 = vcmp.ne.s32.totalorder %v370_v41, 0  ;;  %vm3125_vm10 = vcmp.ne.s32.totalorder %v371_v17, 0  ;;  %v323_v45 = vpack.c.b8 %v322_v18, %v322_v18 }
  0xcf   :  { %v3030_v38 = vpop.permute.xlu1 %1033  ;;  %434 = vmax.xlane.f32.xlu1 %v3023_v33  ;;  %1152 = vmax.xlane.f32.xlu0 %v3027_v36  ;;  %v204_v19 = vpop.permute.xlu0 %203  ;;  %v356_v46 = vsel %vm3103_vm8, 16843009, %v2659_v4  ;;  %vm3132_vm11 = vnez %v321_v22  ;;  %v325_v50 = vpack.c.b8 %v324_v23, %v324_v23  ;;  %v296_v51 = vunpack.c.2.s8 %v3042_v44 }
  0xd0   :  { %v1090_v52 = vmul.f32 0.2, %v1074_v30  ;;  %v1075_v53 = vadd.f32 %v2882_v47, %v3030_v38  ;;  %v1105_v55 = vmax.f32 %v1073_v5, %v1089_v26  ;;  %v271_v57 = vmax.f32 %v239_v6, %v255_v29 }
  0xd1   :  { %v256_v25 = vmul.f32 0.2, %v240_v32  ;;  %v241_v60 = vadd.f32 %v2887_v48, %v204_v19  ;;  %v3142_v63 = vsel %vm3121_vm9, %v270_v27, -1e+09  ;;  %v3146_v24 = vsel %vm3099_vm7, %v1104_v35, -1e+09 }
  0xd2   :  { %4085 = vst [vmem:[#allocation18_spill] sm:$0xff] %v3142_v63  ;;  %4086 = vst [vmem:[#allocation19_spill] sm:$0xff] %v3146_v24  ;;  %v372_v38 = vunpack.c.0.s8 %v356_v46  ;;  %vm3150_vm12 = vnez %v323_v45  ;;  %v357_v1 = vsel %vm3132_vm11, 16843009, %v2659_v4  ;;  %vm3157_vm13 = vnez %v325_v50 }
  0xd3   :  { %1154 = vmax.xlane.f32.xlu1 %v3059_v54  ;;  %436 = vmax.xlane.f32.xlu0 %v3064_v58  ;;  %v3077_v28 = vpop.permute.xlu1 %1038  ;;  %v209_v62 = vpop.permute.xlu0 %208  ;;  %v326_v3 = vpack.c.b16 %v296_v51, %v296_v51  ;;  %v297_v5 = vunpack.c.3.s8 %v3042_v44  ;;  %v1091_v6 = vmul.f32 0.2, %v1075_v53  ;;  %v3165_v8 = vsel %vm3121_vm9, %v1105_v55, -1e+09  ;;  %v3506_v54 = vld [vmem:[#allocation3 + $0xe0] sm:$0xff]  ;;  %v3508_v58 = vld [vmem:[#allocation3 + $0x68] sm:$0xff] }
  0xd4   :  { %v242_v7 = vadd.f32 %v2887_v48, %v209_v62  ;;  %4091 = vst [vmem:[#allocation20_spill] sm:$0xff] %v3165_v8  ;;  %v3169_v10 = vsel %vm3125_vm10, %v271_v57, -1e+09  ;;  %v257_v15 = vmul.f32 0.2, %v241_v60  ;;  %v1076_v34 = vadd.f32 %v2882_v47, %v3077_v28 }
  0xd5   :  { %4092 = vst [vmem:[#allocation21_spill] sm:$0xff] %v3169_v10  ;;  %v272_v41 = vmax.f32 %v240_v32, %v256_v25  ;;  %v1106_v17 = vmax.f32 %v1074_v30, %v1090_v52  ;;  %vm3175_vm14 = vcmp.ne.s32.totalorder %v372_v38, 0  ;;  %v373_v19 = vunpack.c.0.s8 %v357_v1  ;;  %v3294_v1 = vld [vmem:[#allocation3 + $0x10] sm:$0xff] }
  0xd6   :  { %v358_v21 = vsel %vm3150_vm12, 16843009, %v2659_v4  ;;  %v359_v28 = vsel %vm3157_vm13, 16843009, %v2659_v4  ;;  %v327_v22 = vpack.c.b8 %v326_v3, %v326_v3  ;;  %v328_v23 = vpack.c.b16 %v297_v5, %v297_v5 }
  0xd7   :  { %438 = vmax.xlane.f32.xlu1 %v3090_v12  ;;  %1156 = vmax.xlane.f32.xlu0 %v3094_v13  ;;  %v1077_v26 = vadd.f32 %v2882_v47, %v2873_v40  ;;  %v258_v29 = vmul.f32 0.2, %v242_v7  ;;  %v1107_v32 = vmax.f32 %v1075_v53, %v1091_v6  ;;  %v1092_v27 = vmul.f32 0.2, %v1076_v34  ;;  %v224_v57 = vpop.permute.xlu0 %223 }
  0xd8   :  { %v214_v20 = vpop.permute.xlu1 %213  ;;  %v3190_v35 = vsel %vm3175_vm14, %v272_v41, -1e+09  ;;  %v3194_v39 = vsel %vm3125_vm10, %v1106_v17, -1e+09  ;;  %v273_v45 = vmax.f32 %v241_v60, %v257_v15  ;;  %vm3198_vm15 = vcmp.ne.s32.totalorder %v373_v19, 0 }
  0xd9   :  { %v243_v30 = vadd.f32 %v2887_v48, %v214_v20  ;;  %4095 = vst [vmem:[#allocation22_spill] sm:$0xff] %v3190_v35  ;;  %4096 = vst [vmem:[#allocation23_spill] sm:$0xff] %v3194_v39  ;;  %v374_v20 = vunpack.c.0.s8 %v358_v21  ;;  %v375_v46 = vunpack.c.0.s8 %v359_v28  ;;  %vm3202_vm1 = vnez %v327_v22 }
  0xda   :  { %v329_v50 = vpack.c.b8 %v328_v23, %v328_v23  ;;  %v1093_v51 = vmul.f32 0.2, %v1077_v26  ;;  %v3208_v52 = vsel %vm3175_vm14, %v1107_v32, -1e+09  ;;  %v274_v55 = vmax.f32 %v242_v7, %v258_v29 }
  0xdb   :  { %1158 = vmax.xlane.f32.xlu1 %v3111_v31  ;;  %440 = vmax.xlane.f32.xlu0 %v3116_v37  ;;  %v259_v14 = vmul.f32 0.2, %v243_v30  ;;  %4101 = vst [vmem:[#allocation24_spill] sm:$0xff] %v3208_v52  ;;  %v3214_v62 = vsel %vm3198_vm15, %v273_v45, -1e+09  ;;  %v1108_v38 = vmax.f32 %v1076_v34, %v1092_v27  ;;  %vm3218_vm2 = vcmp.ne.s32.totalorder %v374_v20, 0 }
  0xdc   :  { %4102 = vst [vmem:[#allocation25_spill] sm:$0xff] %v3214_v62  ;;  %vm3222_vm3 = vcmp.ne.s32.totalorder %v375_v46, 0  ;;  %vm345_vm4 = vnez %v329_v50  ;;  %v245_v2 = vadd.f32 %v2887_v48, %v224_v57  ;;  %v3232_v3 = vsel %vm3218_vm2, %v274_v55, -1e+09  ;;  %v2423_v50 = vld [vmem:[%s4001_s1] sm:$0xff]   ;;  %v2424_v57 = vld [vmem:[%s4001_s1 + $0x8] sm:$0xff]  }
  0xdd   :  { %v1049_v59 = vpop.permute.xlu1 %1048  ;;  %4107 = vst [vmem:[#allocation26_spill] sm:$0xff] %v3232_v3  ;;  %v1109_v5 = vmax.f32 %v1077_v26, %v1093_v51  ;;  %v275_v6 = vmax.f32 %v243_v30, %v259_v14  ;;  %v3237_v41 = vsel %vm3198_vm15, %v1108_v38, -1e+09  ;;  %v361_v44 = vsel %vm345_vm4, 16843009, %v2659_v4  ;;  %2346 = vmatprep.subr.bf16.mxu0 %v2423_v50  ;;  %2378 = vmatprep.subr.bf16.mxu1 %v2423_v50  ;;  %v3280_v55 = vld [vmem:[#allocation3 + $0x80] sm:$0xff] }
  0xde   :  { %v1078_v25 = vadd.f32 %v2882_v47, %v1049_v59  ;;  %v360_v59 = vsel %vm3202_vm1, 16843009, %v2659_v4  ;;  %4108 = vst [vmem:[#allocation27_spill] sm:$0xff] %v3237_v41  ;;  %v377_v4 = vunpack.c.0.s8 %v361_v44  ;;  %2347 = vmatpush3.bf16.msra.mxu0 %v2423_v50  ;;  %2379 = vmatpush3.bf16.msra.mxu1 %v2423_v50  ;;  %v3401_v44 = vld [vmem:[#allocation3 + $0x38] sm:$0xff] }
  0xdf   :  { %442 = vmax.xlane.f32.xlu1 %v3142_v63  ;;  %1160 = vmax.xlane.f32.xlu0 %v3146_v24  ;;  %v3244_v19 = vsel %vm3218_vm2, %v1109_v5, -1e+09  ;;  %v3248_v21 = vsel %vm3222_vm3, %v275_v6, -1e+09  ;;  %v2425_v5 = vld [vmem:[%s4001_s1 + $0x10] sm:$0xff]   ;;  %v3488_v24 = vld [vmem:[#allocation3 + $0x60] sm:$0xff] }
  0xe0   :  { %v1094_v7 = vmul.f32 0.2, %v1078_v25  ;;  %4109 = vst [vmem:[#allocation28_spill] sm:$0xff] %v3244_v19  ;;  %4110 = vst [vmem:[#allocation29_spill] sm:$0xff] %v3248_v21  ;;  %vm393_vm6 = vcmp.ne.s32.totalorder %v377_v4, 0  ;;  %2348 = vmatprep.subr.bf16.mxu0 %v2424_v57  ;;  %2380 = vmatprep.subr.bf16.mxu1 %v2424_v57  ;;  %v3336_v4 = vld [vmem:[#allocation3 + $0x20] sm:$0xff] }
  0xe1   :  { %v3490_v31 = vld [vmem:[#allocation3 + $0xd8] sm:$0xff] }
  0xe2   :  { %v219_v18 = vpop.permute.xlu1 %218  ;;  %v1110_v26 = vmax.f32 %v1078_v25, %v1094_v7  ;;  %2349 = vmatpush3.bf16.msra.mxu0 %v2424_v57  ;;  %2381 = vmatpush3.bf16.msra.mxu1 %v2424_v57 }
  0xe3   :  { %1162 = vmax.xlane.f32.xlu1 %v3165_v8  ;;  %444 = vmax.xlane.f32.xlu0 %v3169_v10  ;;  %v244_v60 = vadd.f32 %v2887_v48, %v219_v18  ;;  %v376_v48 = vunpack.c.0.s8 %v360_v59  ;;  %v261_v18 = vmul.f32 0.2, %v245_v2  ;;  %v3296_v59 = vld [vmem:[#allocation3 + $0x88] sm:$0xff]  ;;  %v3474_v8 = vld [vmem:[#allocation3 + $0x58] sm:$0xff] }
  0xe4   :  { %v3257_v27 = vsel %vm3222_vm3, %v1110_v26, -1e+09  ;;  %2350 = vmatprep.subr.bf16.mxu0 %v2425_v5  ;;  %2382 = vmatprep.subr.bf16.mxu1 %v2425_v5 }
  0xe5   :  { %v260_v15 = vmul.f32 0.2, %v244_v60  ;;  %vm392_vm5 = vcmp.ne.s32.totalorder %v376_v48, 0  ;;  %v277_v29 = vmax.f32 %v245_v2, %v261_v18  ;;  %4112 = vst [vmem:[#allocation31_spill] sm:$0xff] %v3257_v27  ;;  %v3317_v48 = vld [vmem:[#allocation3 + $0x18] sm:$0xff]  ;;  %v3420_v2 = vld [vmem:[#allocation3 + $0x40] sm:$0xff] }
  0xe6   :  { %2351 = vmatpush3.bf16.msra.mxu0 %v2425_v5  ;;  %2383 = vmatpush3.bf16.msra.mxu1 %v2425_v5  ;;  %v2426_v18 = vld [vmem:[%s4001_s1 + $0x18] sm:$0xff]  }
  0xe7   :  { %446 = vmax.xlane.f32.xlu1 %v3190_v35  ;;  %1164 = vmax.xlane.f32.xlu0 %v3194_v39  ;;  %v1054_v53 = vpop.permute.xlu1 %1053  ;;  %v276_v23 = vmax.f32 %v244_v60, %v260_v15  ;;  %v3263_v40 = vsel %vm393_vm6, %v277_v29, -1e+09  ;;  %v3338_v29 = vld [vmem:[#allocation3 + $0x98] sm:$0xff]  ;;  %v3472_v39 = vld [vmem:[#allocation3 + $0xd0] sm:$0xff] }
  0xe8   :  { %v1079_v34 = vadd.f32 %v2882_v47, %v1054_v53  ;;  %4114 = vst [vmem:[#allocation33_spill] sm:$0xff] %v3263_v40  ;;  %v3278_v53 = vld [vmem:[#allocation3 + $0x8] sm:$0xff]  ;;  %2352 = vmatprep.subr.bf16.mxu0 %v2426_v18  ;;  %2384 = vmatprep.subr.bf16.mxu1 %v2426_v18 }
  0xe9   :  { %v3253_v32 = vsel %vm392_vm5, %v276_v23, -1e+09 }
  0xea   :  { %v1095_v28 = vmul.f32 0.2, %v1079_v34  ;;  %4111 = vst [vmem:[#allocation30_spill] sm:$0xff] %v3253_v32  ;;  %2353 = vmatpush3.bf16.msra.mxu0 %v2426_v18  ;;  %2385 = vmatpush3.bf16.msra.mxu1 %v2426_v18 }
  0xeb   :  { %1166 = vmax.xlane.f32.xlu1 %v3208_v52  ;;  %448 = vmax.xlane.f32.xlu0 %v3214_v62  ;;  %v1059_v17 = vpop.permute.xlu1 %1058  ;;  %v3456_v52 = vld [vmem:[#allocation3 + $0x50] sm:$0xff]  ;;  %v3458_v62 = vld [vmem:[#allocation3 + $0xc8] sm:$0xff] }
  0xec   :  { %v1080_v22 = vadd.f32 %v2882_v47, %v1059_v17  ;;  %v1111_v45 = vmax.f32 %v1079_v34, %v1095_v28  ;;  %v3315_v17 = vld [vmem:[#allocation3 + $0x90] sm:$0xff] }
  0xee   :  { %v1096_v30 = vmul.f32 0.2, %v1080_v22  ;;  %v3261_v47 = vsel %vm392_vm5, %v1111_v45, -1e+09  ;;  %v2427_v45 = vld [vmem:[%s4001_s1 + $0x20] sm:$0xff]  }
  0xef   :  { %450 = vmax.xlane.f32.xlu1 %v3232_v3  ;;  %1168 = vmax.xlane.f32.xlu0 %v3237_v41  ;;  %4113 = vst [vmem:[#allocation32_spill] sm:$0xff] %v3261_v47 }
  0xf0   :  { %v1112_v20 = vmax.f32 %v1080_v22, %v1096_v30  ;;  %2354 = vmatprep.subr.bf16.mxu0 %v2427_v45  ;;  %2386 = vmatprep.subr.bf16.mxu1 %v2427_v45  ;;  %v3399_v30 = vld [vmem:[#allocation3 + $0xb0] sm:$0xff] }
  0xf1   :  { %2355 = vmatpush3.bf16.msra.mxu0 %v2427_v45  ;;  %2387 = vmatpush3.bf16.msra.mxu1 %v2427_v45  ;;  %v3378_v45 = vld [vmem:[#allocation3 + $0x30] sm:$0xff] }
  0xf2   :  { %v3267_v46 = vsel %vm393_vm6, %v1112_v20, -1e+09 }
  0xf3   :  { %1170 = vmax.xlane.f32.xlu1 %v3244_v19  ;;  %452 = vmax.xlane.f32.xlu0 %v3248_v21  ;;  %4115 = vst [vmem:[#allocation34_spill] sm:$0xff] %v3267_v46  ;;  %v3438_v19 = vld [vmem:[#allocation3 + $0xc0] sm:$0xff] }
  0xf7   :  { %454 = vmax.xlane.f32.xlu1 %v3253_v32  ;;  %1172 = vmax.xlane.f32.xlu0 %v3257_v27  ;;  %v3440_v32 = vld [vmem:[#allocation3 + $0x48] sm:$0xff] }
  0xfb   :  { %1174 = vmax.xlane.f32.xlu1 %v3261_v47  ;;  %456 = vmax.xlane.f32.xlu0 %v3263_v40  ;;  %v3422_v40 = vld [vmem:[#allocation3 + $0xb8] sm:$0xff] }
  0xff   :  { %1176 = vmax.xlane.f32.xlu0 %v3267_v46 }
 0x14c   :  { %v427_v51 = vpop.xlane.xlu0 %426 }
 0x14d   :  { %v3276_v14 = vmax.f32 %v3270_v49, %v427_v51 }
 0x14f   :  { %948 = vst.msk [vmem:[#allocation3] sm:$0xff] %vm64_vm0, %v3276_v14  ;;  %524 = vperm.xlu1 %2422, %v3276_v14  }
 0x150   :  { %v429_v25 = vpop.xlane.xlu1 %428  ;;  %v1147_v60 = vpop.xlane.xlu0 %1146 }
 0x151   :  { %v3289_v38 = vmax.f32 %v3278_v53, %v429_v25  ;;  %v3292_v0 = vmax.f32 %v3280_v55, %v1147_v60  ;;  %v3357_v25 = vld [vmem:[#allocation3 + $0xa0] sm:$0xff]  ;;  %v3359_v60 = vld [vmem:[#allocation3 + $0x28] sm:$0xff] }
 0x153   :  { %949 = vst.msk [vmem:[#allocation3 + $0x8] sm:$0xff] %vm64_vm0, %v3289_v38  ;;  %1620 = vst.msk [vmem:[#allocation3 + $0x80] sm:$0xff] %vm64_vm0, %v3292_v0  ;;  %529 = vperm.xlu0 %2418, %v3289_v38   ;;  %1244 = vperm.xlu1 %2422, %v3292_v0   ;;  %v475_v33 = vsub.f32 %v3278_v53, %v3289_v38  ;;  %v3526_v38 = vld [vmem:[#allocation3 + $0x70] sm:$0xff] }
 0x154   :  { %v431_v6 = vpop.xlane.xlu1 %430  ;;  %v1149_v7 = vpop.xlane.xlu0 %1148 }
 0x155   :  { %v3310_v15 = vmax.f32 %v3294_v1, %v431_v6  ;;  %v3313_v34 = vmax.f32 %v3296_v59, %v1149_v7  ;;  %v2428_v6 = vld [vmem:[%s4001_s1 + $0x28] sm:$0xff]   ;;  %v492_v9 = vmul.f32 1.442695, %v475_v33 }
 0x156   :  { %2356 = vmatprep.subr.bf16.mxu0 %v2428_v6  ;;  %2388 = vmatprep.subr.bf16.mxu1 %v2428_v6 }
 0x157   :  { %950 = vst.msk [vmem:[#allocation3 + $0x10] sm:$0xff] %vm64_vm0, %v3310_v15  ;;  %1621 = vst.msk [vmem:[#allocation3 + $0x88] sm:$0xff] %vm64_vm0, %v3313_v34  ;;  %534 = vperm.xlu0 %2418, %v3310_v15   ;;  %1249 = vperm.xlu1 %2422, %v3313_v34  }
 0x158   :  { %v1151_v28 = vpop.xlane.xlu1 %1150  ;;  %v433_v22 = vpop.xlane.xlu0 %432  ;;  %2357 = vmatpush3.bf16.msra.mxu0 %v2428_v6  ;;  %2389 = vmatpush3.bf16.msra.mxu1 %v2428_v6 }
 0x159   :  { %v3331_v23 = vmax.f32 %v3315_v17, %v1151_v28  ;;  %v3334_v26 = vmax.f32 %v3317_v48, %v433_v22 }
 0x15b   :  { %1622 = vst.msk [vmem:[#allocation3 + $0x90] sm:$0xff] %vm64_vm0, %v3331_v23  ;;  %951 = vst.msk [vmem:[#allocation3 + $0x18] sm:$0xff] %vm64_vm0, %v3334_v26  ;;  %1254 = vperm.xlu0 %2418, %v3331_v23   ;;  %539 = vperm.xlu1 %2422, %v3334_v26   ;;  %v477_v56 = vsub.f32 %v3317_v48, %v3334_v26  ;;  %v3546_v26 = vld [vmem:[#allocation3 + $0xf0] sm:$0xff] }
 0x15c   :  { %v435_v20 = vpop.xlane.xlu1 %434  ;;  %v1153_v50 = vpop.xlane.xlu0 %1152 }
 0x15d   :  { %v3352_v51 = vmax.f32 %v3336_v4, %v435_v20  ;;  %v3355_v57 = vmax.f32 %v3338_v29, %v1153_v50  ;;  %v3380_v20 = vld [vmem:[#allocation3 + $0xa8] sm:$0xff]  ;;  %v496_v61 = vmul.f32 1.442695, %v477_v56 }
 0x15f   :  { %952 = vst.msk [vmem:[#allocation3 + $0x20] sm:$0xff] %vm64_vm0, %v3352_v51  ;;  %1623 = vst.msk [vmem:[#allocation3 + $0x98] sm:$0xff] %vm64_vm0, %v3355_v57  ;;  %544 = vperm.xlu0 %2418, %v3352_v51   ;;  %1259 = vperm.xlu1 %2422, %v3355_v57  }
 0x160   :  { %v1155_v7 = vpop.xlane.xlu1 %1154  ;;  %v437_v18 = vpop.xlane.xlu0 %436 }
 0x161   :  { %v3373_v28 = vmax.f32 %v3357_v25, %v1155_v7  ;;  %v3376_v22 = vmax.f32 %v3359_v60, %v437_v18  ;;  %v2429_v7 = vld [vmem:[%s4001_s1 + $0x30] sm:$0xff]  }
 0x162   :  { %2358 = vmatprep.subr.bf16.mxu0 %v2429_v7  ;;  %2390 = vmatprep.subr.bf16.mxu1 %v2429_v7 }
 0x163   :  { %1624 = vst.msk [vmem:[#allocation3 + $0xa0] sm:$0xff] %vm64_vm0, %v3373_v28  ;;  %953 = vst.msk [vmem:[#allocation3 + $0x28] sm:$0xff] %vm64_vm0, %v3376_v22  ;;  %1264 = vperm.xlu0 %2418, %v3373_v28   ;;  %549 = vperm.xlu1 %2422, %v3376_v22  }
 0x164   :  { %v439_v18 = vpop.xlane.xlu1 %438  ;;  %v1157_v5 = vpop.xlane.xlu0 %1156  ;;  %2359 = vmatpush3.bf16.msra.mxu0 %v2429_v7  ;;  %2391 = vmatpush3.bf16.msra.mxu1 %v2429_v7 }
 0x165   :  { %v3394_v6 = vmax.f32 %v3378_v45, %v439_v18  ;;  %v3397_v50 = vmax.f32 %v3380_v20, %v1157_v5  ;;  %v2430_v5 = vld [vmem:[%s4001_s1 + $0x38] sm:$0xff]  }
 0x166   :  { %2360 = vmatprep.subr.bf16.mxu0 %v2430_v5  ;;  %2392 = vmatprep.subr.bf16.mxu1 %v2430_v5 }
 0x167   :  { %954 = vst.msk [vmem:[#allocation3 + $0x30] sm:$0xff] %vm64_vm0, %v3394_v6  ;;  %1625 = vst.msk [vmem:[#allocation3 + $0xa8] sm:$0xff] %vm64_vm0, %v3397_v50  ;;  %554 = vperm.xlu0 %2418, %v3394_v6   ;;  %1269 = vperm.xlu1 %2422, %v3397_v50  }
 0x168   :  { %v1159_v18 = vpop.xlane.xlu1 %1158  ;;  %v441_v46 = vpop.xlane.xlu0 %440  ;;  %2361 = vmatpush3.bf16.msra.mxu0 %v2430_v5  ;;  %2393 = vmatpush3.bf16.msra.mxu1 %v2430_v5 }
 0x169   :  { %v3415_v7 = vmax.f32 %v3399_v30, %v1159_v18  ;;  %v3418_v47 = vmax.f32 %v3401_v44, %v441_v46 }
 0x16b   :  { %1626 = vst.msk [vmem:[#allocation3 + $0xb0] sm:$0xff] %vm64_vm0, %v3415_v7  ;;  %955 = vst.msk [vmem:[#allocation3 + $0x38] sm:$0xff] %vm64_vm0, %v3418_v47  ;;  %1274 = vperm.xlu0 %2418, %v3415_v7   ;;  %559 = vperm.xlu1 %2422, %v3418_v47  }
 0x16c   :  { %v443_v46 = vpop.xlane.xlu1 %442  ;;  %v1161_v18 = vpop.xlane.xlu0 %1160 }
 0x16d   :  { %v3433_v27 = vmax.f32 %v3420_v2, %v443_v46  ;;  %v3436_v5 = vmax.f32 %v3422_v40, %v1161_v18 }
 0x16f   :  { %956 = vst.msk [vmem:[#allocation3 + $0x40] sm:$0xff] %vm64_vm0, %v3433_v27  ;;  %1627 = vst.msk [vmem:[#allocation3 + $0xb8] sm:$0xff] %vm64_vm0, %v3436_v5  ;;  %564 = vperm.xlu0 %2418, %v3433_v27   ;;  %1279 = vperm.xlu1 %2422, %v3436_v5  }
 0x170   :  { %v1163_v46 = vpop.xlane.xlu1 %1162  ;;  %v445_v18 = vpop.xlane.xlu0 %444 }
 0x171   :  { %v3451_v3 = vmax.f32 %v3438_v19, %v1163_v46  ;;  %v3454_v41 = vmax.f32 %v3440_v32, %v445_v18 }
 0x173   :  { %1628 = vst.msk [vmem:[#allocation3 + $0xc0] sm:$0xff] %vm64_vm0, %v3451_v3  ;;  %957 = vst.msk [vmem:[#allocation3 + $0x48] sm:$0xff] %vm64_vm0, %v3454_v41  ;;  %1284 = vperm.xlu0 %2418, %v3451_v3   ;;  %569 = vperm.xlu1 %2422, %v3454_v41  }
 0x174   :  { %v447_v21 = vpop.xlane.xlu1 %446  ;;  %v1165_v46 = vpop.xlane.xlu0 %1164 }
 0x175   :  { %v3467_v35 = vmax.f32 %v3456_v52, %v447_v21  ;;  %v3470_v18 = vmax.f32 %v3458_v62, %v1165_v46 }
 0x177   :  { %958 = vst.msk [vmem:[#allocation3 + $0x50] sm:$0xff] %vm64_vm0, %v3467_v35  ;;  %1629 = vst.msk [vmem:[#allocation3 + $0xc8] sm:$0xff] %vm64_vm0, %v3470_v18  ;;  %574 = vperm.xlu0 %2418, %v3467_v35   ;;  %1289 = vperm.xlu1 %2422, %v3470_v18  }
 0x178   :  { %v1167_v10 = vpop.xlane.xlu1 %1166  ;;  %v449_v21 = vpop.xlane.xlu0 %448 }
 0x179   :  { %v3483_v63 = vmax.f32 %v3472_v39, %v1167_v10  ;;  %v3486_v46 = vmax.f32 %v3474_v8, %v449_v21  ;;  %v474_v10 = vsub.f32 %v3270_v49, %v3276_v14  ;;  %v476_v49 = vsub.f32 %v3294_v1, %v3310_v15 }
 0x17a   :  { %v478_v15 = vsub.f32 %v3336_v4, %v3352_v51  ;;  %v480_v51 = vsub.f32 %v3378_v45, %v3394_v6  ;;  %v482_v6 = vsub.f32 %v3420_v2, %v3433_v27  ;;  %v484_v27 = vsub.f32 %v3456_v52, %v3467_v35 }
 0x17b   :  { %1630 = vst.msk [vmem:[#allocation3 + $0xd0] sm:$0xff] %vm64_vm0, %v3483_v63  ;;  %959 = vst.msk [vmem:[#allocation3 + $0x58] sm:$0xff] %vm64_vm0, %v3486_v46  ;;  %1294 = vperm.xlu0 %2418, %v3483_v63   ;;  %579 = vperm.xlu1 %2422, %v3486_v46   ;;  %v494_v1 = vmul.f32 1.442695, %v476_v49 }
 0x17c   :  { %v451_v37 = vpop.xlane.xlu1 %450  ;;  %v1169_v21 = vpop.xlane.xlu0 %1168  ;;  %v498_v4 = vmul.f32 1.442695, %v478_v15  ;;  %v502_v45 = vmul.f32 1.442695, %v480_v51 }
 0x17d   :  { %v3501_v12 = vmax.f32 %v3488_v24, %v451_v37  ;;  %v3504_v13 = vmax.f32 %v3490_v31, %v1169_v21  ;;  %v490_v37 = vmul.f32 1.442695, %v474_v10 }
 0x17f   :  { %960 = vst.msk [vmem:[#allocation3 + $0x60] sm:$0xff] %vm64_vm0, %v3501_v12  ;;  %1631 = vst.msk [vmem:[#allocation3 + $0xd8] sm:$0xff] %vm64_vm0, %v3504_v13  ;;  %584 = vperm.xlu0 %2418, %v3501_v12   ;;  %1299 = vperm.xlu1 %2422, %v3504_v13   ;;  %2431 = vpow2.f32 %v490_v37  ;;  %v479_v37 = vsub.f32 %v3359_v60, %v3376_v22  ;;  %v3564_v22 = vld [vmem:[#allocation3 + $0xf8] sm:$0xff] }
 0x180   :  { %v1171_v14 = vpop.xlane.xlu1 %1170  ;;  %v453_v21 = vpop.xlane.xlu0 %452  ;;  %2433 = vpow2.f32 %v492_v9 }
 0x181   :  { %v3521_v36 = vmax.f32 %v3506_v54, %v1171_v14  ;;  %v3524_v53 = vmax.f32 %v3508_v58, %v453_v21  ;;  %v3548_v21 = vld [vmem:[#allocation3 + $0x78] sm:$0xff]  ;;  %2435 = vpow2.f32 %v494_v1 }
 0x182   :  { %2437 = vpow2.f32 %v496_v61 }
 0x183   :  { %1632 = vst.msk [vmem:[#allocation3 + $0xe0] sm:$0xff] %vm64_vm0, %v3521_v36  ;;  %961 = vst.msk [vmem:[#allocation3 + $0x68] sm:$0xff] %vm64_vm0, %v3524_v53  ;;  %1304 = vperm.xlu0 %2418, %v3521_v36   ;;  %589 = vperm.xlu1 %2422, %v3524_v53   ;;  %2439 = vpow2.f32 %v498_v4  ;;  %v487_v35 = vsub.f32 %v3508_v58, %v3524_v53  ;;  %v4116_v58 = vsub.f32 %v3280_v55, %v3292_v0 }
 0x184   :  { %v455_v10 = vpop.xlane.xlu1 %454  ;;  %v1173_v33 = vpop.xlane.xlu0 %1172 }
 0x185   :  { %v3541_v14 = vmax.f32 %v3526_v38, %v455_v10  ;;  %v3544_v48 = vmax.f32 %v3528_v11, %v1173_v33  ;;  %v500_v10 = vmul.f32 1.442695, %v479_v37  ;;  %v481_v33 = vsub.f32 %v3401_v44, %v3418_v47 }
 0x186   :  { %v483_v44 = vsub.f32 %v3440_v32, %v3454_v41  ;;  %v506_v37 = vmul.f32 1.442695, %v482_v6  ;;  %v510_v41 = vmul.f32 1.442695, %v484_v27  ;;  %v486_v32 = vsub.f32 %v3488_v24, %v3501_v12 }
 0x187   :  { %962 = vst.msk [vmem:[#allocation3 + $0x70] sm:$0xff] %vm64_vm0, %v3541_v14  ;;  %1633 = vst.msk [vmem:[#allocation3 + $0xe8] sm:$0xff] %vm64_vm0, %v3544_v48  ;;  %594 = vperm.xlu0 %2418, %v3541_v14   ;;  %1309 = vperm.xlu1 %2422, %v3544_v48   ;;  %2441 = vpow2.f32 %v500_v10  ;;  %v504_v47 = vmul.f32 1.442695, %v481_v33  ;;  %v516_v6 = vmul.f32 1.442695, %v487_v35  ;;  %v4119_v27 = vsub.f32 %v3338_v29, %v3355_v57 }
 0x188   :  { %v1175_v9 = vpop.xlane.xlu1 %1174  ;;  %v457_v56 = vpop.xlane.xlu0 %456  ;;  %2443 = vpow2.f32 %v502_v45  ;;  %v508_v51 = vmul.f32 1.442695, %v483_v44  ;;  %v514_v52 = vmul.f32 1.442695, %v486_v32  ;;  %v1210_v53 = vmul.f32 1.442695, %v4116_v58 }
 0x189   :  { %v3561_v49 = vmax.f32 %v3546_v26, %v1175_v9  ;;  %v473_v60 = vmax.f32 %v3548_v21, %v457_v56  ;;  %v2432_v15 = vpop.eup %2431  ;;  %2445 = vpow2.f32 %v504_v47  ;;  %v485_v9 = vsub.f32 %v3474_v8, %v3486_v46 }
 0x18a   :  { %v2434_v2 = vpop.eup %2433  ;;  %2447 = vpow2.f32 %v506_v37  ;;  %v488_v8 = vsub.f32 %v3526_v38, %v3541_v14  ;;  %v4117_v44 = vsub.f32 %v3296_v59, %v3313_v34  ;;  %v4120_v59 = vsub.f32 %v3357_v25, %v3373_v28 }
 0x18b   :  { %1634 = vst.msk [vmem:[#allocation3 + $0xf0] sm:$0xff] %vm64_vm0, %v3561_v49  ;;  %963 = vst.msk [vmem:[#allocation3 + $0x78] sm:$0xff] %vm64_vm0, %v473_v60  ;;  %1314 = vperm.xlu0 %2418, %v3561_v49   ;;  %599 = vperm.xlu1 %2422, %v473_v60   ;;  %v2436_v4 = vpop.eup %2435  ;;  %2449 = vpow2.f32 %v508_v51  ;;  %v512_v33 = vmul.f32 1.442695, %v485_v9  ;;  %v489_v24 = vsub.f32 %v3548_v21, %v473_v60 }
 0x18c   :  { %v1177_v1 = vpop.xlane.xlu0 %1176  ;;  %v2438_v56 = vpop.eup %2437  ;;  %2451 = vpow2.f32 %v510_v41  ;;  %v518_v12 = vmul.f32 1.442695, %v488_v8  ;;  %v1212_v37 = vmul.f32 1.442695, %v4117_v44  ;;  %v4118_v21 = vsub.f32 %v3315_v17, %v3331_v23 }
 0x18d   :  { %v3575_v61 = vmax.f32 %v3564_v22, %v1177_v1  ;;  %v2440_v10 = vpop.eup %2439  ;;  %2453 = vpow2.f32 %v512_v33  ;;  %v520_v38 = vmul.f32 1.442695, %v489_v24  ;;  %v1218_v34 = vmul.f32 1.442695, %v4120_v59  ;;  %v4126_v59 = vld [vmem:[#allocation8_spill] sm:$0xff] }
 0x18e   :  { %2455 = vpow2.f32 %v514_v52  ;;  %v1214_v60 = vmul.f32 1.442695, %v4118_v21  ;;  %v4121_v17 = vsub.f32 %v3380_v20, %v3397_v50  ;;  %v4122_v29 = vsub.f32 %v3399_v30, %v3415_v7 }
 0x18f   :  { %1635 = vst.msk [vmem:[#allocation3 + $0xf8] sm:$0xff] %vm64_vm0, %v3575_v61  ;;  %668 = vperm.xlu0 %2418, %v2432_v15   ;;  %1319 = vperm.xlu1 %2422, %v3575_v61   ;;  %2457 = vpow2.f32 %v516_v6  ;;  %v1202_v9 = vsub.f32 %v3438_v19, %v3451_v3  ;;  %v4123_v28 = vsub.f32 %v3422_v40, %v3436_v5 }
 0x190   :  { %2459 = vpow2.f32 %v518_v12  ;;  %v1220_v23 = vmul.f32 1.442695, %v4121_v17  ;;  %v1222_v57 = vmul.f32 1.442695, %v4122_v29  ;;  %v1203_v20 = vsub.f32 %v3458_v62, %v3470_v18  ;;  %v4128_v29 = vld [vmem:[#allocation11_spill] sm:$0xff] }
 0x191   :  { %v2442_v46 = vpop.eup %2441  ;;  %2461 = vpow2.f32 %v1210_v53  ;;  %v1224_v32 = vmul.f32 1.442695, %v4123_v28  ;;  %v1226_v50 = vmul.f32 1.442695, %v1202_v9  ;;  %v1204_v30 = vsub.f32 %v3472_v39, %v3483_v63  ;;  %v4129_v9 = vld [vmem:[#allocation10_spill] sm:$0xff] }
 0x192   :  { %v2444_v45 = vpop.eup %2443  ;;  %2463 = vpow2.f32 %v520_v38  ;;  %v1228_v3 = vmul.f32 1.442695, %v1203_v20  ;;  %v1205_v19 = vsub.f32 %v3490_v31, %v3504_v13  ;;  %v1206_v62 = vsub.f32 %v3506_v54, %v3521_v36 }
 0x193   :  { %678 = vperm.xlu0 %2418, %v2436_v4   ;;  %673 = vperm.xlu1 %2422, %v2434_v2   ;;  %v2446_v1 = vpop.eup %2445  ;;  %2465 = vpow2.f32 %v1212_v37  ;;  %v1216_v2 = vmul.f32 1.442695, %v4119_v27  ;;  %v1230_v40 = vmul.f32 1.442695, %v1204_v30  ;;  %v1207_v63 = vsub.f32 %v3528_v11, %v3544_v48  ;;  %v4124_v37 = vld [vmem:[#allocation7_spill] sm:$0xff] }
 0x194   :  { %v2448_v15 = vpop.eup %2447  ;;  %2467 = vpow2.f32 %v1214_v60  ;;  %v1234_v39 = vmul.f32 1.442695, %v1206_v62  ;;  %v1208_v13 = vsub.f32 %v3546_v26, %v3561_v49  ;;  %v1209_v54 = vsub.f32 %v3564_v22, %v3575_v61  ;;  %v4125_v60 = vld [vmem:[#allocation6_spill] sm:$0xff] }
 0x195   :  { %v2450_v14 = vpop.eup %2449  ;;  %2469 = vpow2.f32 %v1216_v2  ;;  %v1236_v35 = vmul.f32 1.442695, %v1207_v63 }
 0x196   :  { %v2452_v47 = vpop.eup %2451  ;;  %2471 = vpow2.f32 %v1218_v34  ;;  %v1238_v36 = vmul.f32 1.442695, %v1208_v13  ;;  %v1240_v48 = vmul.f32 1.442695, %v1209_v54  ;;  %v4127_v34 = vld [vmem:[#allocation9_spill] sm:$0xff] }
 0x197   :  { %688 = vperm.xlu0 %2418, %v2440_v10   ;;  %683 = vperm.xlu1 %2422, %v2438_v56   ;;  %v2454_v55 = vpop.eup %2453  ;;  %2473 = vpow2.f32 %v1220_v23  ;;  %v1232_v10 = vmul.f32 1.442695, %v1205_v19 }
 0x198   :  { %v2456_v0 = vpop.eup %2455  ;;  %2475 = vpow2.f32 %v1222_v57 }
 0x199   :  { %v2458_v4 = vpop.eup %2457  ;;  %2477 = vpow2.f32 %v1224_v32 }
 0x19a   :  { %v2460_v51 = vpop.eup %2459  ;;  %2479 = vpow2.f32 %v1226_v50 }
 0x19b   :  { %698 = vperm.xlu0 %2418, %v2444_v45   ;;  %693 = vperm.xlu1 %2422, %v2442_v46   ;;  %v2462_v41 = vpop.eup %2461  ;;  %2481 = vpow2.f32 %v1228_v3  ;;  %v4131_v3 = vld [vmem:[#allocation12_spill] sm:$0xff] }
 0x19c   :  { %v2464_v25 = vpop.eup %2463  ;;  %2483 = vpow2.f32 %v1230_v40 }
 0x19d   :  { %v2466_v7 = vpop.eup %2465  ;;  %2485 = vpow2.f32 %v1232_v10 }
 0x19e   :  { %v2468_v56 = vpop.eup %2467  ;;  %2487 = vpow2.f32 %v1234_v39 }
 0x19f   :  { %708 = vperm.xlu0 %2418, %v2448_v15   ;;  %703 = vperm.xlu1 %2422, %v2446_v1   ;;  %v2470_v5 = vpop.eup %2469  ;;  %2489 = vpow2.f32 %v1236_v35  ;;  %v4133_v35 = vld [vmem:[#allocation14_spill] sm:$0xff] }
 0x1a0   :  { %v2472_v18 = vpop.eup %2471  ;;  %2491 = vpow2.f32 %v1238_v36 }
 0x1a1   :  { %v2474_v31 = vpop.eup %2473  ;;  %2493 = vpow2.f32 %v1240_v48 }
 0x1a2   :  { %v2476_v33 = vpop.eup %2475 }
 0x1a3   :  { %718 = vperm.xlu0 %2418, %v2452_v47   ;;  %713 = vperm.xlu1 %2422, %v2450_v14   ;;  %v2478_v52 = vpop.eup %2477 }
 0x1a4   :  { %v2480_v11 = vpop.eup %2479 }
 0x1a5   :  { %v2482_v8 = vpop.eup %2481 }
 0x1a6   :  { %v2484_v26 = vpop.eup %2483 }
 0x1a7   :  { %728 = vperm.xlu0 %2418, %v2456_v0   ;;  %723 = vperm.xlu1 %2422, %v2454_v55   ;;  %v2486_v49 = vpop.eup %2485 }
 0x1a8   :  { %v2488_v46 = vpop.eup %2487 }
 0x1a9   :  { %v2490_v45 = vpop.eup %2489 }
 0x1aa   :  { %v2492_v6 = vpop.eup %2491 }
 0x1ab   :  { %738 = vperm.xlu0 %2418, %v2460_v51   ;;  %733 = vperm.xlu1 %2422, %v2458_v4   ;;  %v2494_v22 = vpop.eup %2493 }
 0x1af   :  { %1389 = vperm.xlu0 %2418, %v2462_v41   ;;  %743 = vperm.xlu1 %2422, %v2464_v25  }
 0x1b3   :  { %1399 = vperm.xlu0 %2418, %v2468_v56   ;;  %1394 = vperm.xlu1 %2422, %v2466_v7   ;;  %v4130_v7 = vld [vmem:[#allocation13_spill] sm:$0xff] }
 0x1b7   :  { %1409 = vperm.xlu0 %2418, %v2472_v18   ;;  %1404 = vperm.xlu1 %2422, %v2470_v5  }
 0x1bb   :  { %1419 = vperm.xlu0 %2418, %v2476_v33   ;;  %1414 = vperm.xlu1 %2422, %v2474_v31   ;;  %v4132_v31 = vld [vmem:[#allocation15_spill] sm:$0xff] }
 0x1bf   :  { %1429 = vperm.xlu0 %2418, %v2480_v11   ;;  %1424 = vperm.xlu1 %2422, %v2478_v52  }
 0x1c3   :  { %1439 = vperm.xlu0 %2418, %v2484_v26   ;;  %1434 = vperm.xlu1 %2422, %v2482_v8  }
 0x1c7   :  { %1449 = vperm.xlu0 %2418, %v2488_v46   ;;  %1444 = vperm.xlu1 %2422, %v2486_v49   ;;  %v4134_v46 = vld [vmem:[#allocation17_spill] sm:$0xff] }
 0x1cb   :  { %1459 = vperm.xlu0 %2418, %v2492_v6   ;;  %1454 = vperm.xlu1 %2422, %v2490_v45   ;;  %v4135_v6 = vld [vmem:[#allocation16_spill] sm:$0xff] }
 0x1ce   :  { %v525_v61 = vpop.permute.xlu1 %524 }
 0x1cf   :  { %v602_v12 = vsub.f32 %v2913_v16, %v525_v61  ;;  %1464 = vperm.xlu1 %2422, %v2494_v22  }
 0x1d1   :  { %v618_v15 = vmul.f32 1.442695, %v602_v12 }
 0x1d2   :  { %v1245_v24 = vpop.permute.xlu1 %1244  ;;  %v530_v1 = vpop.permute.xlu0 %529 }
 0x1d3   :  { %v1322_v58 = vsub.f32 %v2942_v43, %v1245_v24  ;;  %v603_v53 = vsub.f32 %v2938_v42, %v530_v1  ;;  %2495 = vpow2.f32 %v618_v15 }
 0x1d5   :  { %v620_v38 = vmul.f32 1.442695, %v603_v53  ;;  %v1338_v14 = vmul.f32 1.442695, %v1322_v58 }
 0x1d6   :  { %v1250_v47 = vpop.permute.xlu1 %1249  ;;  %v535_v44 = vpop.permute.xlu0 %534 }
 0x1d7   :  { %v1323_v21 = vsub.f32 %v4124_v37, %v1250_v47  ;;  %v604_v55 = vsub.f32 %v4125_v60, %v535_v44  ;;  %2497 = vpow2.f32 %v620_v38  ;;  %v4136_v38 = vld [vmem:[#allocation19_spill] sm:$0xff]  ;;  %v4137_v47 = vld [vmem:[#allocation18_spill] sm:$0xff] }
 0x1d8   :  { %2499 = vpow2.f32 %v1338_v14 }
 0x1d9   :  { %v1340_v0 = vmul.f32 1.442695, %v1323_v21  ;;  %v622_v16 = vmul.f32 1.442695, %v604_v55 }
 0x1da   :  { %v540_v27 = vpop.permute.xlu1 %539  ;;  %v1255_v2 = vpop.permute.xlu0 %1254 }
 0x1db   :  { %2501 = vpow2.f32 %v1340_v0  ;;  %v605_v43 = vsub.f32 %v4126_v59, %v540_v27  ;;  %v1324_v42 = vsub.f32 %v4127_v34, %v1255_v2  ;;  %v4138_v2 = vld [vmem:[#allocation21_spill] sm:$0xff] }
 0x1dc   :  { %2503 = vpow2.f32 %v622_v16 }
 0x1dd   :  { %v624_v4 = vmul.f32 1.442695, %v605_v43  ;;  %v1342_v51 = vmul.f32 1.442695, %v1324_v42  ;;  %v2496_v25 = vpop.eup %2495  ;;  %v4139_v43 = vld [vmem:[#allocation20_spill] sm:$0xff] }
 0x1de   :  { %v1260_v17 = vpop.permute.xlu1 %1259  ;;  %v545_v23 = vpop.permute.xlu0 %544 }
 0x1df   :  { %2505 = vpow2.f32 %v624_v4  ;;  %v1325_v57 = vsub.f32 %v4128_v29, %v1260_v17  ;;  %v606_v41 = vsub.f32 %v4129_v9, %v545_v23  ;;  %v4140_v9 = vld [vmem:[#allocation23_spill] sm:$0xff] }
 0x1e0   :  { %2507 = vpow2.f32 %v1342_v51 }
 0x1e1   :  { %v1344_v28 = vmul.f32 1.442695, %v1325_v57  ;;  %v2498_v32 = vpop.eup %2497  ;;  %v626_v20 = vmul.f32 1.442695, %v606_v41 }
 0x1e2   :  { %v550_v50 = vpop.permute.xlu1 %549  ;;  %v1265_v30 = vpop.permute.xlu0 %1264  ;;  %v762_v40 = vpack.c.bf16 %v2498_v32, %v2496_v25  ;;  %v4141_v25 = vld [vmem:[#allocation22_spill] sm:$0xff] }
 0x1e3   :  { %2509 = vpow2.f32 %v1344_v28  ;;  %v607_v56 = vsub.f32 %v4130_v7, %v550_v50  ;;  %v1326_v19 = vsub.f32 %v4131_v3, %v1265_v30  ;;  %v2500_v62 = vpop.eup %2499 }
 0x1e4   :  { %2362 = vmatprep.mubr.bf16.mxu0 %v762_v40  ;;  %2511 = vpow2.f32 %v626_v20 }
 0x1e5   :  { %v2502_v5 = vpop.eup %2501  ;;  %v628_v18 = vmul.f32 1.442695, %v607_v56  ;;  %v1346_v10 = vmul.f32 1.442695, %v1326_v19  ;;  %v4142_v19 = vld [vmem:[#allocation25_spill] sm:$0xff] }
 0x1e6   :  { %v1270_v63 = vpop.permute.xlu1 %1269  ;;  %v555_v39 = vpop.permute.xlu0 %554  ;;  %v1483_v13 = vpack.c.bf16 %v2502_v5, %v2500_v62  ;;  %v4143_v62 = vld [vmem:[#allocation24_spill] sm:$0xff] }
 0x1e7   :  { %2513 = vpow2.f32 %v628_v18  ;;  %v1327_v33 = vsub.f32 %v4132_v31, %v1270_v63  ;;  %v608_v36 = vsub.f32 %v4133_v35, %v555_v39  ;;  %v2504_v54 = vpop.eup %2503  ;;  %v4144_v35 = vld [vmem:[#allocation27_spill] sm:$0xff] }
 0x1e8   :  { %2394 = vmatprep.mubr.bf16.mxu1 %v1483_v13  ;;  %2515 = vpow2.f32 %v1346_v10 }
 0x1e9   :  { %v2506_v52 = vpop.eup %2505  ;;  %v1348_v11 = vmul.f32 1.442695, %v1327_v33  ;;  %v630_v48 = vmul.f32 1.442695, %v608_v36 }
 0x1ea   :  { %v560_v8 = vpop.permute.xlu1 %559  ;;  %v1275_v26 = vpop.permute.xlu0 %1274  ;;  %v763_v49 = vpack.c.bf16 %v2506_v52, %v2504_v54  ;;  %v4145_v54 = vld [vmem:[#allocation26_spill] sm:$0xff] }
 0x1eb   :  { %2517 = vpow2.f32 %v1348_v11  ;;  %v609_v45 = vsub.f32 %v4134_v46, %v560_v8  ;;  %v1328_v22 = vsub.f32 %v4135_v6, %v1275_v26  ;;  %v2508_v61 = vpop.eup %2507  ;;  %v4146_v6 = vld [vmem:[#allocation29_spill] sm:$0xff] }
 0x1ec   :  { %2363 = vmatmul.mubr.bf16.vlgmr.msra.gmra.mrb[0].mxu0 %v763_v49  ;;  %2519 = vpow2.f32 %v630_v48 }
 0x1ed   :  { %v2510_v12 = vpop.eup %2509  ;;  %v632_v24 = vmul.f32 1.442695, %v609_v45  ;;  %v1350_v1 = vmul.f32 1.442695, %v1328_v22 }
 0x1ee   :  { %v1280_v15 = vpop.permute.xlu1 %1279  ;;  %v565_v58 = vpop.permute.xlu0 %564  ;;  %v1484_v53 = vpack.c.bf16 %v2510_v12, %v2508_v61  ;;  %v4147_v61 = vld [vmem:[#allocation28_spill] sm:$0xff] }
 0x1ef   :  { %2521 = vpow2.f32 %v632_v24  ;;  %v1329_v14 = vsub.f32 %v4136_v38, %v1280_v15  ;;  %v610_v44 = vsub.f32 %v4137_v47, %v565_v58  ;;  %v2512_v37 = vpop.eup %2511  ;;  %v4148_v47 = vld [vmem:[#allocation31_spill] sm:$0xff] }
 0x1f0   :  { %2395 = vmatmul.mubr.bf16.vlgmr.msra.gmra.mrb[0].mxu1 %v1484_v53  ;;  %2523 = vpow2.f32 %v1350_v1 }
 0x1f1   :  { %v2514_v21 = vpop.eup %2513  ;;  %v1352_v60 = vmul.f32 1.442695, %v1329_v14  ;;  %v634_v55 = vmul.f32 1.442695, %v610_v44 }
 0x1f2   :  { %v570_v0 = vpop.permute.xlu1 %569  ;;  %v1285_v16 = vpop.permute.xlu0 %1284  ;;  %v764_v27 = vpack.c.bf16 %v2514_v21, %v2512_v37  ;;  %v4149_v37 = vld [vmem:[#allocation30_spill] sm:$0xff] }
 0x1f3   :  { %2525 = vpow2.f32 %v1352_v60  ;;  %v611_v59 = vsub.f32 %v4138_v2, %v570_v0  ;;  %v1330_v34 = vsub.f32 %v4139_v43, %v1285_v16  ;;  %v2516_v42 = vpop.eup %2515  ;;  %v4150_v43 = vld [vmem:[#allocation33_spill] sm:$0xff] }
 0x1f4   :  { %2366 = vmatprep.mubr.bf16.mxu0 %v764_v27  ;;  %2527 = vpow2.f32 %v634_v55 }
 0x1f5   :  { %v2518_v4 = vpop.eup %2517  ;;  %v636_v51 = vmul.f32 1.442695, %v611_v59  ;;  %v1354_v17 = vmul.f32 1.442695, %v1330_v34 }
 0x1f6   :  { %v1290_v23 = vpop.permute.xlu1 %1289  ;;  %v575_v29 = vpop.permute.xlu0 %574  ;;  %v1485_v57 = vpack.c.bf16 %v2518_v4, %v2516_v42  ;;  %v4151_v42 = vld [vmem:[#allocation32_spill] sm:$0xff] }
 0x1f7   :  { %2529 = vpow2.f32 %v636_v51  ;;  %v1331_v41 = vsub.f32 %v4140_v9, %v1290_v23  ;;  %v612_v28 = vsub.f32 %v4141_v25, %v575_v29  ;;  %v2520_v32 = vpop.eup %2519 }
 0x1f8   :  { %2398 = vmatprep.mubr.bf16.mxu1 %v1485_v57  ;;  %2531 = vpow2.f32 %v1354_v17 }
 0x1f9   :  { %v2522_v20 = vpop.eup %2521  ;;  %v1356_v50 = vmul.f32 1.442695, %v1331_v41  ;;  %v638_v30 = vmul.f32 1.442695, %v612_v28  ;;  %v4152_v41 = vld [vmem:[#allocation34_spill] sm:$0xff] }
 0x1fa   :  { %v580_v7 = vpop.permute.xlu1 %579  ;;  %v1295_v56 = vpop.permute.xlu0 %1294  ;;  %v765_v3 = vpack.c.bf16 %v2522_v20, %v2520_v32 }
 0x1fb   :  { %2533 = vpow2.f32 %v1356_v50  ;;  %v613_v40 = vsub.f32 %v4142_v19, %v580_v7  ;;  %v1332_v5 = vsub.f32 %v4143_v62, %v1295_v56  ;;  %v2524_v18 = vpop.eup %2523 }
 0x1fc   :  { %2367 = vmatmul.mubr.bf16.gmra.mrb[4].mxu0 %v765_v3  ;;  %2535 = vpow2.f32 %v638_v30 }
 0x1fd   :  { %v2526_v10 = vpop.eup %2525  ;;  %v640_v63 = vmul.f32 1.442695, %v613_v40  ;;  %v1358_v39 = vmul.f32 1.442695, %v1332_v5 }
 0x1fe   :  { %v1300_v13 = vpop.permute.xlu1 %1299  ;;  %v585_v31 = vpop.permute.xlu0 %584  ;;  %v1486_v33 = vpack.c.bf16 %v2526_v10, %v2524_v18 }
 0x1ff   :  { %2537 = vpow2.f32 %v640_v63  ;;  %v1333_v36 = vsub.f32 %v4144_v35, %v1300_v13  ;;  %v614_v52 = vsub.f32 %v4145_v54, %v585_v31  ;;  %v2528_v11 = vpop.eup %2527 }
 0x200   :  { %2399 = vmatmul.mubr.bf16.gmra.mrb[4].mxu1 %v1486_v33  ;;  %2539 = vpow2.f32 %v1358_v39 }
 0x201   :  { %v2530_v48 = vpop.eup %2529  ;;  %v1360_v8 = vmul.f32 1.442695, %v1333_v36  ;;  %v642_v26 = vmul.f32 1.442695, %v614_v52 }
 0x202   :  { %v590_v49 = vpop.permute.xlu1 %589  ;;  %v1305_v46 = vpop.permute.xlu0 %1304  ;;  %v766_v45 = vpack.c.bf16 %v2530_v48, %v2528_v11 }
 0x203   :  { %2541 = vpow2.f32 %v1360_v8  ;;  %v615_v22 = vsub.f32 %v4146_v6, %v590_v49  ;;  %v1334_v12 = vsub.f32 %v4147_v61, %v1305_v46  ;;  %v2532_v24 = vpop.eup %2531  ;;  %v652_v6 = vld [vmem:[#allocation2 + $0x10] sm:$0xff]  ;;  %v650_v61 = vld [vmem:[#allocation2] sm:$0xff] }
 0x204   :  { %2370 = vmatprep.mubr.bf16.mxu0 %v766_v45  ;;  %2543 = vpow2.f32 %v642_v26 }
 0x205   :  { %v2534_v1 = vpop.eup %2533  ;;  %v644_v15 = vmul.f32 1.442695, %v615_v22  ;;  %v1362_v58 = vmul.f32 1.442695, %v1334_v12  ;;  %v653_v12 = vld [vmem:[#allocation2 + $0x18] sm:$0xff] }
 0x206   :  { %v1310_v53 = vpop.permute.xlu1 %1309  ;;  %v595_v38 = vpop.permute.xlu0 %594  ;;  %v1487_v14 = vpack.c.bf16 %v2534_v1, %v2532_v24  ;;  %v651_v24 = vld [vmem:[#allocation2 + $0x8] sm:$0xff] }
 0x207   :  { %2545 = vpow2.f32 %v644_v15  ;;  %v1335_v44 = vsub.f32 %v4148_v47, %v1310_v53  ;;  %v616_v21 = vsub.f32 %v4149_v37, %v595_v38  ;;  %v2536_v60 = vpop.eup %2535  ;;  %v1371_v47 = vld [vmem:[#allocation2 + $0x80] sm:$0xff] }
 0x208   :  { %2402 = vmatprep.mubr.bf16.mxu1 %v1487_v14  ;;  %2547 = vpow2.f32 %v1362_v58  ;;  %v1373_v58 = vld [vmem:[#allocation2 + $0x90] sm:$0xff] }
 0x209   :  { %v2538_v55 = vpop.eup %2537  ;;  %v1364_v0 = vmul.f32 1.442695, %v1335_v44  ;;  %v646_v16 = vmul.f32 1.442695, %v616_v21 }
 0x20a   :  { %v600_v27 = vpop.permute.xlu1 %599  ;;  %v1315_v2 = vpop.permute.xlu0 %1314  ;;  %v767_v59 = vpack.c.bf16 %v2538_v55, %v2536_v60  ;;  %v1374_v60 = vld [vmem:[#allocation2 + $0x98] sm:$0xff] }
 0x20b   :  { %2549 = vpow2.f32 %v1364_v0  ;;  %v617_v34 = vsub.f32 %v4150_v43, %v600_v27  ;;  %v1336_v4 = vsub.f32 %v4151_v42, %v1315_v2  ;;  %v2540_v51 = vpop.eup %2539  ;;  %v1372_v27 = vld [vmem:[#allocation2 + $0x88] sm:$0xff] }
 0x20c   :  { %2371 = vmatmul.mubr.bf16.gmra.mrb[8].mxu0 %v767_v59  ;;  %2551 = vpow2.f32 %v646_v16 }
 0x20d   :  { %v2542_v17 = vpop.eup %2541  ;;  %v648_v23 = vmul.f32 1.442695, %v617_v34  ;;  %v1366_v29 = vmul.f32 1.442695, %v1336_v4 }
 0x20e   :  { %v1320_v57 = vpop.permute.xlu1 %1319  ;;  %v1488_v9 = vpack.c.bf16 %v2542_v17, %v2540_v51  ;;  %v2544_v28 = vpop.eup %2543 }
 0x20f   :  { %2553 = vpow2.f32 %v648_v23  ;;  %v1337_v25 = vsub.f32 %v4152_v41, %v1320_v57  ;;  %v669_v10 = vpop.permute.xlu0 %668 }
 0x210   :  { %2403 = vmatmul.mubr.bf16.gmra.mrb[8].mxu1 %v1488_v9  ;;  %2555 = vpow2.f32 %v1366_v29  ;;  %v746_v15 = vmul.f32 %v669_v10, %v650_v61  ;;  %v1375_v10 = vld [vmem:[#allocation2 + $0xa0] sm:$0xff] }
 0x211   :  { %v2546_v32 = vpop.eup %2545  ;;  %v1368_v20 = vmul.f32 1.442695, %v1337_v25 }
 0x212   :  { %v768_v50 = vpack.c.bf16 %v2546_v32, %v2544_v28  ;;  %v2548_v30 = vpop.eup %2547  ;;  %v674_v63 = vpop.permute.xlu1 %673 }
 0x213   :  { %2557 = vpow2.f32 %v1368_v20  ;;  %v679_v39 = vpop.permute.xlu0 %678  ;;  %v747_v21 = vmul.f32 %v674_v63, %v651_v24  ;;  %v656_v20 = vld [vmem:[#allocation2 + $0x30] sm:$0xff] }
 0x214   :  { %2374 = vmatprep.mubr.bf16.mxu0 %v768_v50  ;;  %v748_v1 = vmul.f32 %v679_v39, %v652_v6 }
 0x215   :  { %v2550_v7 = vpop.eup %2549 }
 0x216   :  { %v1489_v56 = vpack.c.bf16 %v2550_v7, %v2548_v30  ;;  %v2552_v3 = vpop.eup %2551  ;;  %v684_v13 = vpop.permute.xlu1 %683  ;;  %v654_v30 = vld [vmem:[#allocation2 + $0x20] sm:$0xff]  ;;  %v657_v7 = vld [vmem:[#allocation2 + $0x38] sm:$0xff] }
 0x217   :  { %v3665_v31 = vpop.permute.xlu0 %688  ;;  %v749_v14 = vmul.f32 %v684_v13, %v653_v12  ;;  %v1376_v12 = vld [vmem:[#allocation2 + $0xa8] sm:$0xff] }
 0x218   :  { %2406 = vmatprep.mubr.bf16.mxu1 %v1489_v56  ;;  %v655_v56 = vld [vmem:[#allocation2 + $0x28] sm:$0xff] }
 0x219   :  { %v2554_v19 = vpop.eup %2553 }
 0x21a   :  { %v769_v40 = vpack.c.bf16 %v2554_v19, %v2552_v3  ;;  %v2556_v62 = vpop.eup %2555  ;;  %v3667_v33 = vpop.permute.xlu1 %693  ;;  %v750_v19 = vmul.f32 %v3665_v31, %v654_v30 }
 0x21b   :  { %v699_v35 = vpop.permute.xlu0 %698  ;;  %v751_v13 = vmul.f32 %v3667_v33, %v655_v56 }
 0x21c   :  { %2375 = vmatmul.mubr.bf16.gmra.mrb[12].mxu0 %v769_v40  ;;  %v752_v3 = vmul.f32 %v699_v35, %v656_v20  ;;  %v1377_v40 = vld [vmem:[#allocation2 + $0xb0] sm:$0xff] }
 0x21d   :  { %v2558_v5 = vpop.eup %2557 }
 0x21e   :  { %v1490_v18 = vpack.c.bf16 %v2558_v5, %v2556_v62  ;;  %v3669_v36 = vpop.permute.xlu1 %703 }
 0x21f   :  { %v3671_v54 = vpop.permute.xlu0 %708 }
 0x220   :  { %2407 = vmatmul.mubr.bf16.gmra.mrb[12].mxu1 %v1490_v18  ;;  %v753_v18 = vmul.f32 %v3669_v36, %v657_v7 }
 0x222   :  { %v3673_v52 = vpop.permute.xlu1 %713 }
 0x223   :  { %v3675_v11 = vpop.permute.xlu0 %718 }
 0x226   :  { %v3677_v48 = vpop.permute.xlu1 %723 }
 0x227   :  { %v3679_v8 = vpop.permute.xlu0 %728 }
 0x22a   :  { %v3681_v26 = vpop.permute.xlu1 %733 }
 0x22b   :  { %v3683_v49 = vpop.permute.xlu0 %738 }
 0x22e   :  { %v3685_v46 = vpop.permute.xlu1 %743 }
 0x22f   :  { %v1390_v45 = vpop.permute.xlu0 %1389 }
 0x230   :  { %v1467_v34 = vmul.f32 %v1390_v45, %v1371_v47  ;;  %v1378_v45 = vld [vmem:[#allocation2 + $0xb8] sm:$0xff] }
 0x232   :  { %v1395_v22 = vpop.permute.xlu1 %1394 }
 0x233   :  { %v1400_v53 = vpop.permute.xlu0 %1399  ;;  %v1468_v29 = vmul.f32 %v1395_v22, %v1372_v27  ;;  %v661_v27 = vld [vmem:[#allocation2 + $0x58] sm:$0xff] }
 0x234   :  { %v1469_v2 = vmul.f32 %v1400_v53, %v1373_v58 }
 0x236   :  { %v1405_v55 = vpop.permute.xlu1 %1404 }
 0x237   :  { %v1470_v51 = vmul.f32 %v1405_v55, %v1374_v60  ;;  %v1410_v32 = vpop.permute.xlu0 %1409  ;;  %v660_v55 = vld [vmem:[#allocation2 + $0x50] sm:$0xff] }
 0x238   :  { %v1471_v31 = vmul.f32 %v1410_v32, %v1375_v10  ;;  %v1380_v32 = vld [vmem:[#allocation2 + $0xc8] sm:$0xff] }
 0x23a   :  { %v1415_v50 = vpop.permute.xlu1 %1414 }
 0x23b   :  { %v1420_v62 = vpop.permute.xlu0 %1419 }
 0x23c   :  { %v1473_v24 = vmul.f32 %v1420_v62, %v1377_v40 }
 0x23e   :  { %v1425_v6 = vpop.permute.xlu1 %1424 }
 0x23f   :  { %v1474_v53 = vmul.f32 %v1425_v6, %v1378_v45  ;;  %v1430_v60 = vpop.permute.xlu0 %1429  ;;  %v665_v45 = vld [vmem:[#allocation2 + $0x78] sm:$0xff]  ;;  %v663_v6 = vld [vmem:[#allocation2 + $0x68] sm:$0xff] }
 0x2bf   :  { %v2364_v38 = vpop.f32.mrb[0].mxu0 }
 0x2c0   :  { %v917_v44 = vadd.f32 %v2364_v38, %v748_v1  ;;  %v852_v37 = vpop.f32.mrb[1].mxu0 }
 0x2c1   :  { %v915_v0 = vadd.f32 %v852_v37, %v746_v15  ;;  %v2365_v16 = vpop.f32.mrb[2].mxu0 }
 0x2c2   :  { %933 = vst [vmem:[#allocation2 + $0x10] sm:$0xff] %v917_v44  ;;  %v918_v59 = vadd.f32 %v2365_v16, %v749_v14  ;;  %v855_v43 = vpop.f32.mrb[3].mxu0  ;;  %v1472_v14 = vmul.f32 %v1415_v50, %v1376_v12  ;;  %v658_v16 = vld [vmem:[#allocation2 + $0x40] sm:$0xff]  ;;  %v1385_v12 = vld [vmem:[#allocation2 + $0xf0] sm:$0xff] }
 0x2c3   :  { %931 = vst [vmem:[#allocation2] sm:$0xff] %v915_v0  ;;  %v916_v42 = vadd.f32 %v855_v43, %v747_v21  ;;  %v2396_v4 = vpop.f32.mrb[0].mxu1  ;;  %v1435_v0 = vpop.permute.xlu1 %1434  ;;  %v754_v43 = vmul.f32 %v3671_v54, %v658_v16 }
 0x2c4   :  { %934 = vst [vmem:[#allocation2 + $0x18] sm:$0xff] %v918_v59  ;;  %v1590_v17 = vadd.f32 %v2396_v4, %v1469_v2  ;;  %v1525_v23 = vpop.f32.mrb[1].mxu1  ;;  %v659_v2 = vld [vmem:[#allocation2 + $0x48] sm:$0xff]  ;;  %v756_v59 = vmul.f32 %v3675_v11, %v660_v55 }
 0x2c5   :  { %932 = vst [vmem:[#allocation2 + $0x8] sm:$0xff] %v916_v42  ;;  %v1588_v57 = vadd.f32 %v1525_v23, %v1467_v34  ;;  %v2397_v9 = vpop.f32.mrb[2].mxu1  ;;  %v1381_v34 = vld [vmem:[#allocation2 + $0xd0] sm:$0xff]  ;;  %v1440_v42 = vpop.permute.xlu0 %1439 }
 0x2c6   :  { %1606 = vst [vmem:[#allocation2 + $0x90] sm:$0xff] %v1590_v17  ;;  %v1591_v41 = vadd.f32 %v2397_v9, %v1470_v51  ;;  %v1528_v25 = vpop.f32.mrb[3].mxu1  ;;  %v757_v51 = vmul.f32 %v3677_v48, %v661_v27  ;;  %v1379_v17 = vld [vmem:[#allocation2 + $0xc0] sm:$0xff]  ;;  %v1382_v9 = vld [vmem:[#allocation2 + $0xd8] sm:$0xff]  ;;  %v1477_v20 = vmul.f32 %v1440_v42, %v1381_v34 }
 0x2c7   :  { %1604 = vst [vmem:[#allocation2 + $0x80] sm:$0xff] %v1588_v57  ;;  %v1589_v28 = vadd.f32 %v1528_v25, %v1468_v29  ;;  %v755_v57 = vmul.f32 %v3673_v52, %v659_v2  ;;  %v1475_v54 = vmul.f32 %v1430_v60, %v1379_v17 }
 0x2c8   :  { %1607 = vst [vmem:[#allocation2 + $0x98] sm:$0xff] %v1591_v41  ;;  %v1445_v41 = vpop.permute.xlu1 %1444 }
 0x2c9   :  { %1605 = vst [vmem:[#allocation2 + $0x88] sm:$0xff] %v1589_v28  ;;  %v1478_v56 = vmul.f32 %v1445_v41, %v1382_v9  ;;  %v1450_v10 = vpop.permute.xlu0 %1449 }
 0x2cf   :  { %v2368_v5 = vpop.f32.mrb[4].mxu0 }
 0x2d0   :  { %v921_v63 = vadd.f32 %v2368_v5, %v752_v3  ;;  %v868_v39 = vpop.f32.mrb[5].mxu0 }
 0x2d1   :  { %v919_v22 = vadd.f32 %v868_v39, %v750_v19  ;;  %v2369_v61 = vpop.f32.mrb[6].mxu0  ;;  %v1476_v19 = vmul.f32 %v1435_v0, %v1380_v32  ;;  %v1455_v39 = vpop.permute.xlu1 %1454 }
 0x2d2   :  { %937 = vst [vmem:[#allocation2 + $0x30] sm:$0xff] %v921_v63  ;;  %v922_v35 = vadd.f32 %v2369_v61, %v753_v18  ;;  %v871_v1 = vpop.f32.mrb[7].mxu0  ;;  %v664_v63 = vld [vmem:[#allocation2 + $0x70] sm:$0xff] }
 0x2d3   :  { %935 = vst [vmem:[#allocation2 + $0x20] sm:$0xff] %v919_v22  ;;  %v920_v15 = vadd.f32 %v871_v1, %v751_v13  ;;  %v2400_v58 = vpop.f32.mrb[4].mxu1  ;;  %v662_v13 = vld [vmem:[#allocation2 + $0x60] sm:$0xff]  ;;  %v760_v22 = vmul.f32 %v3683_v49, %v664_v63  ;;  %v761_v1 = vmul.f32 %v3685_v46, %v665_v45 }
 0x2d4   :  { %938 = vst [vmem:[#allocation2 + $0x38] sm:$0xff] %v922_v35  ;;  %v1594_v36 = vadd.f32 %v2400_v58, %v1473_v24  ;;  %v1541_v38 = vpop.f32.mrb[5].mxu1  ;;  %v758_v61 = vmul.f32 %v3679_v8, %v662_v13  ;;  %v1460_v24 = vpop.permute.xlu0 %1459 }
 0x2d5   :  { %936 = vst [vmem:[#allocation2 + $0x28] sm:$0xff] %v920_v15  ;;  %v1592_v33 = vadd.f32 %v1541_v38, %v1471_v31  ;;  %v2401_v47 = vpop.f32.mrb[6].mxu1  ;;  %v1383_v31 = vld [vmem:[#allocation2 + $0xe0] sm:$0xff]  ;;  %v1465_v38 = vpop.permute.xlu1 %1464 }
 0x2d6   :  { %1610 = vst [vmem:[#allocation2 + $0xb0] sm:$0xff] %v1594_v36  ;;  %v1595_v44 = vadd.f32 %v2401_v47, %v1474_v53  ;;  %v1544_v37 = vpop.f32.mrb[7].mxu1  ;;  %v759_v53 = vmul.f32 %v3681_v26, %v663_v6  ;;  %v1386_v36 = vld [vmem:[#allocation2 + $0xf8] sm:$0xff]  ;;  %v1384_v47 = vld [vmem:[#allocation2 + $0xe8] sm:$0xff]  ;;  %v1479_v8 = vmul.f32 %v1450_v10, %v1383_v31 }
 0x2d7   :  { %1608 = vst [vmem:[#allocation2 + $0xa0] sm:$0xff] %v1592_v33  ;;  %v1593_v21 = vadd.f32 %v1544_v37, %v1472_v14  ;;  %v1482_v55 = vmul.f32 %v1465_v38, %v1386_v36  ;;  %v1480_v16 = vmul.f32 %v1455_v39, %v1384_v47 }
 0x2d8   :  { %1611 = vst [vmem:[#allocation2 + $0xb8] sm:$0xff] %v1595_v44  ;;  %v1481_v44 = vmul.f32 %v1460_v24, %v1385_v12 }
 0x2d9   :  { %1609 = vst [vmem:[#allocation2 + $0xa8] sm:$0xff] %v1593_v21 }
 0x2df   :  { %v2372_v4 = vpop.f32.mrb[8].mxu0 }
 0x2e0   :  { %v925_v23 = vadd.f32 %v2372_v4, %v756_v59  ;;  %v884_v29 = vpop.f32.mrb[9].mxu0 }
 0x2e1   :  { %v923_v25 = vadd.f32 %v884_v29, %v754_v43  ;;  %v2373_v28 = vpop.f32.mrb[10].mxu0 }
 0x2e2   :  { %941 = vst [vmem:[#allocation2 + $0x50] sm:$0xff] %v925_v23  ;;  %v926_v11 = vadd.f32 %v2373_v28, %v757_v51  ;;  %v887_v50 = vpop.f32.mrb[11].mxu0 }
 0x2e3   :  { %939 = vst [vmem:[#allocation2 + $0x40] sm:$0xff] %v923_v25  ;;  %v924_v30 = vadd.f32 %v887_v50, %v755_v57  ;;  %v2404_v7 = vpop.f32.mrb[8].mxu1 }
 0x2e4   :  { %942 = vst [vmem:[#allocation2 + $0x58] sm:$0xff] %v926_v11  ;;  %v1598_v48 = vadd.f32 %v2404_v7, %v1477_v20  ;;  %v1557_v3 = vpop.f32.mrb[9].mxu1 }
 0x2e5   :  { %940 = vst [vmem:[#allocation2 + $0x48] sm:$0xff] %v924_v30  ;;  %v1596_v52 = vadd.f32 %v1557_v3, %v1475_v54  ;;  %v2405_v40 = vpop.f32.mrb[10].mxu1 }
 0x2e6   :  { %1614 = vst [vmem:[#allocation2 + $0xd0] sm:$0xff] %v1598_v48  ;;  %v1599_v62 = vadd.f32 %v2405_v40, %v1478_v56  ;;  %v1560_v5 = vpop.f32.mrb[11].mxu1 }
 0x2e7   :  { %1612 = vst [vmem:[#allocation2 + $0xc0] sm:$0xff] %v1596_v52  ;;  %v1597_v18 = vadd.f32 %v1560_v5, %v1476_v19 }
 0x2e8   :  { %1615 = vst [vmem:[#allocation2 + $0xd8] sm:$0xff] %v1599_v62 }
 0x2e9   :  { %1613 = vst [vmem:[#allocation2 + $0xc8] sm:$0xff] %v1597_v18 }
 0x2ef   :  { %v2376_v35 = vpop.f32.mrb[12].mxu0 }
 0x2f0   :  { %v929_v15 = vadd.f32 %v2376_v35, %v760_v22  ;;  %v900_v58 = vpop.f32.mrb[13].mxu0 }
 0x2f1   :  { %v927_v14 = vadd.f32 %v900_v58, %v758_v61  ;;  %v2377_v33 = vpop.f32.mrb[14].mxu0 }
 0x2f2   :  { %945 = vst [vmem:[#allocation2 + $0x70] sm:$0xff] %v929_v15  ;;  %v930_v49 = vadd.f32 %v2377_v33, %v761_v1  ;;  %v903_v37 = vpop.f32.mrb[15].mxu0 }
 0x2f3   :  { %943 = vst [vmem:[#allocation2 + $0x60] sm:$0xff] %v927_v14  ;;  %v928_v21 = vadd.f32 %v903_v37, %v759_v53  ;;  %v2408_v60 = vpop.f32.mrb[12].mxu1 }
 0x2f4   :  { %946 = vst [vmem:[#allocation2 + $0x78] sm:$0xff] %v930_v49  ;;  %v1602_v46 = vadd.f32 %v2408_v60, %v1481_v44  ;;  %v1573_v0 = vpop.f32.mrb[13].mxu1 }
 0x2f5   :  { %944 = vst [vmem:[#allocation2 + $0x68] sm:$0xff] %v928_v21  ;;  %v1600_v26 = vadd.f32 %v1573_v0, %v1479_v8  ;;  %v2409_v27 = vpop.f32.mrb[14].mxu1 }
 0x2f6   :  { %1618 = vst [vmem:[#allocation2 + $0xf0] sm:$0xff] %v1602_v46  ;;  %v1603_v2 = vadd.f32 %v2409_v27, %v1482_v55  ;;  %v1576_v59 = vpop.f32.mrb[15].mxu1 }
 0x2f7   :  { %1616 = vst [vmem:[#allocation2 + $0xe0] sm:$0xff] %v1600_v26  ;;  %v1601_v43 = vadd.f32 %v1576_v59, %v1480_v16 }
 0x2f8   :  { %1619 = vst [vmem:[#allocation2 + $0xf8] sm:$0xff] %v1603_v2 }
 0x2f9   :  { %1617 = vst [vmem:[#allocation2 + $0xe8] sm:$0xff] %v1601_v43 }
 0x2fa PF:  { %v3698_v34 = vld [vmem:[#allocation2 + $0x10] sm:$0xff]  ;;  %v3700_v42 = vld [vmem:[#allocation2] sm:$0xff]  ;;  %v3702_v4 = vld [vmem:[#allocation2 + $0x18] sm:$0xff]  ;;  %v2660_v51 = vmov 64  }
 0x2fb   :  { %2560 = vset.pattern.permute.xlu1 %v2660_v51  ;;  %2559 = vset.pattern.permute.xlu0 %v2660_v51  ;;  %v1657_v17 = vmax.f32 %v3698_v34, 1e-20  ;;  %v1655_v23 = vmax.f32 %v3700_v42, 1e-20  ;;  %v1658_v29 = vmax.f32 %v3702_v4, 1e-20 }
 0x2fc   :  { %v3707_v57 = vld [vmem:[#allocation2 + $0x8] sm:$0xff]  ;;  %v3712_v25 = vld [vmem:[#allocation2 + $0x20] sm:$0xff]  ;;  %v3716_v20 = vld [vmem:[#allocation2 + $0x38] sm:$0xff] }
 0x2fd   :  { %v3709_v9 = vld [vmem:[#allocation2 + $0x28] sm:$0xff]  ;;  %2561 = vrcp.f32 %v1657_v17  ;;  %v1656_v41 = vmax.f32 %v3707_v57, 1e-20  ;;  %v1659_v32 = vmax.f32 %v3712_v25, 1e-20  ;;  %v3718_v11 = vld [vmem:[#allocation2 + $0x30] sm:$0xff] }
 0x2fe   :  { %2563 = vrcp.f32 %v1655_v23  ;;  %v1660_v28 = vmax.f32 %v3709_v9, 1e-20  ;;  %v1662_v50 = vmax.f32 %v3716_v20, 1e-20  ;;  %v1661_v54 = vmax.f32 %v3718_v11, 1e-20 }
 0x2ff   :  { %2565 = vrcp.f32 %v1658_v29  ;;  %v3722_v30 = vld [vmem:[#allocation2 + $0x48] sm:$0xff]  ;;  %v3724_v7 = vld [vmem:[#allocation2 + $0x40] sm:$0xff]  ;;  %v3728_v52 = vld [vmem:[#allocation2 + $0x58] sm:$0xff] }
 0x300   :  { %2567 = vrcp.f32 %v1656_v41  ;;  %v1664_v48 = vmax.f32 %v3722_v30, 1e-20  ;;  %v1663_v19 = vmax.f32 %v3724_v7, 1e-20  ;;  %v3730_v62 = vld [vmem:[#allocation2 + $0x50] sm:$0xff]  ;;  %v3734_v63 = vld [vmem:[#allocation2 + $0x68] sm:$0xff] }
 0x301   :  { %2569 = vrcp.f32 %v1660_v28  ;;  %v1666_v18 = vmax.f32 %v3728_v52, 1e-20  ;;  %v1665_v10 = vmax.f32 %v3730_v62, 1e-20  ;;  %v3736_v13 = vld [vmem:[#allocation2 + $0x60] sm:$0xff]  ;;  %v3740_v61 = vld [vmem:[#allocation2 + $0x78] sm:$0xff] }
 0x302   :  { %2571 = vrcp.f32 %v1659_v32  ;;  %v1668_v6 = vmax.f32 %v3734_v63, 1e-20  ;;  %v1667_v22 = vmax.f32 %v3736_v13, 1e-20  ;;  %v3742_v24 = vld [vmem:[#allocation2 + $0x70] sm:$0xff]  ;;  %v3746_v15 = vld [vmem:[#allocation2 + $0x88] sm:$0xff] }
 0x303   :  { %2573 = vrcp.f32 %v1662_v50  ;;  %v1670_v1 = vmax.f32 %v3740_v61, 1e-20  ;;  %v1669_v31 = vmax.f32 %v3742_v24, 1e-20  ;;  %v3748_v53 = vld [vmem:[#allocation2 + $0x80] sm:$0xff]  ;;  %v3752_v33 = vld [vmem:[#allocation2 + $0x98] sm:$0xff] }
 0x304   :  { %2575 = vrcp.f32 %v1661_v54  ;;  %v1838_v38 = vmax.f32 %v3746_v15, 1e-20  ;;  %v1837_v14 = vmax.f32 %v3748_v53, 1e-20  ;;  %v3754_v44 = vld [vmem:[#allocation2 + $0x90] sm:$0xff]  ;;  %v3758_v21 = vld [vmem:[#allocation2 + $0xa8] sm:$0xff] }
 0x305   :  { %2577 = vrcp.f32 %v1664_v48  ;;  %v1840_v37 = vmax.f32 %v3752_v33, 1e-20  ;;  %v1839_v8 = vmax.f32 %v3754_v44, 1e-20  ;;  %v3760_v55 = vld [vmem:[#allocation2 + $0xa0] sm:$0xff]  ;;  %v3764_v26 = vld [vmem:[#allocation2 + $0xb8] sm:$0xff] }
 0x306   :  { %2579 = vrcp.f32 %v1663_v19  ;;  %v1842_v0 = vmax.f32 %v3758_v21, 1e-20  ;;  %v1841_v16 = vmax.f32 %v3760_v55, 1e-20  ;;  %v3766_v2 = vld [vmem:[#allocation2 + $0xb0] sm:$0xff]  ;;  %v3770_v17 = vld [vmem:[#allocation2 + $0xc8] sm:$0xff] }
 0x307   :  { %v2562_v56 = vpop.eup %2561  ;;  %2581 = vrcp.f32 %v1666_v18  ;;  %v1844_v43 = vmax.f32 %v3764_v26, 1e-20  ;;  %v1843_v51 = vmax.f32 %v3766_v2, 1e-20  ;;  %v3772_v29 = vld [vmem:[#allocation2 + $0xc0] sm:$0xff]  ;;  %v3776_v50 = vld [vmem:[#allocation2 + $0xd8] sm:$0xff] }
 0x308   :  { %v2564_v3 = vpop.eup %2563  ;;  %1700 = vperm.xlu1 %2560, %v2562_v56   ;;  %2583 = vrcp.f32 %v1665_v10  ;;  %v1846_v28 = vmax.f32 %v3770_v17, 1e-20  ;;  %v1845_v32 = vmax.f32 %v3772_v29, 1e-20  ;;  %v3778_v56 = vld [vmem:[#allocation2 + $0xd0] sm:$0xff]  ;;  %v3784_v18 = vld [vmem:[#allocation2 + $0xe0] sm:$0xff] }
 0x309   :  { %v2566_v40 = vpop.eup %2565  ;;  %1690 = vperm.xlu0 %2559, %v2564_v3   ;;  %2585 = vrcp.f32 %v1668_v6  ;;  %v1848_v3 = vmax.f32 %v3776_v50, 1e-20  ;;  %v1847_v19 = vmax.f32 %v3778_v56, 1e-20  ;;  %v3788_v6 = vld [vmem:[#allocation2 + $0xf8] sm:$0xff] }
 0x30a   :  { %v2568_v5 = vpop.eup %2567  ;;  %2587 = vrcp.f32 %v1667_v22 }
 0x30b   :  { %v2570_v39 = vpop.eup %2569  ;;  %2589 = vrcp.f32 %v1670_v1  ;;  %v1852_v1 = vmax.f32 %v3788_v6, 1e-20 }
 0x30c   :  { %1705 = vperm.xlu1 %2560, %v2566_v40   ;;  %v2572_v45 = vpop.eup %2571  ;;  %2591 = vrcp.f32 %v1669_v31  ;;  %v3782_v40 = vld [vmem:[#allocation2 + $0xe8] sm:$0xff] }
 0x30d   :  { %1695 = vperm.xlu0 %2559, %v2568_v5   ;;  %v2574_v12 = vpop.eup %2573  ;;  %2593 = vrcp.f32 %v1838_v38 }
 0x30e   :  { %v2576_v35 = vpop.eup %2575  ;;  %2595 = vrcp.f32 %v1837_v14 }
 0x30f   :  { %v2578_v58 = vpop.eup %2577  ;;  %2597 = vrcp.f32 %v1840_v37 }
 0x310   :  { %1715 = vperm.xlu1 %2560, %v2570_v39   ;;  %v2580_v36 = vpop.eup %2579  ;;  %2599 = vrcp.f32 %v1839_v8  ;;  %v1850_v39 = vmax.f32 %v3782_v40, 1e-20 }
 0x311   :  { %1710 = vperm.xlu0 %2559, %v2572_v45   ;;  %v2582_v47 = vpop.eup %2581  ;;  %2601 = vrcp.f32 %v1842_v0  ;;  %v1849_v45 = vmax.f32 %v3784_v18, 1e-20 }
 0x312   :  { %v2584_v49 = vpop.eup %2583  ;;  %2603 = vrcp.f32 %v1841_v16 }
 0x313   :  { %v2586_v60 = vpop.eup %2585  ;;  %2605 = vrcp.f32 %v1844_v43 }
 0x314   :  { %1725 = vperm.xlu1 %2560, %v2574_v12   ;;  %v2588_v46 = vpop.eup %2587  ;;  %2607 = vrcp.f32 %v1843_v51  ;;  %v3790_v12 = vld [vmem:[#allocation2 + $0xf0] sm:$0xff] }
 0x315   :  { %1720 = vperm.xlu0 %2559, %v2576_v35   ;;  %v2590_v27 = vpop.eup %2589  ;;  %2609 = vrcp.f32 %v1846_v28  ;;  %v1851_v31 = vmax.f32 %v3790_v12, 1e-20 }
 0x316   :  { %v2592_v59 = vpop.eup %2591  ;;  %2611 = vrcp.f32 %v1845_v32 }
 0x317   :  { %v2594_v23 = vpop.eup %2593  ;;  %2613 = vrcp.f32 %v1848_v3 }
 0x318   :  { %1735 = vperm.xlu1 %2560, %v2578_v58   ;;  %v2596_v41 = vpop.eup %2595  ;;  %2615 = vrcp.f32 %v1847_v19 }
 0x319   :  { %1730 = vperm.xlu0 %2559, %v2580_v36   ;;  %v2598_v54 = vpop.eup %2597  ;;  %2617 = vrcp.f32 %v1850_v39  ;;  %v3805_v39 = vld [vmem:[%s4006_s6 + $0x1] ss:$0 sm:$0xff] }
 0x31a   :  { %v2600_v48 = vpop.eup %2599  ;;  %2619 = vrcp.f32 %v1849_v45 }
 0x31b   :  { %v2602_v5 = vpop.eup %2601  ;;  %2621 = vrcp.f32 %v1852_v1 }
 0x31c   :  { %1745 = vperm.xlu1 %2560, %v2582_v47   ;;  %v2604_v10 = vpop.eup %2603  ;;  %2623 = vrcp.f32 %v1851_v31 }
 0x31d   :  { %1740 = vperm.xlu0 %2559, %v2584_v49   ;;  %v2606_v22 = vpop.eup %2605 }
 0x31e   :  { %v2608_v35 = vpop.eup %2607 }
 0x31f   :  { %v2610_v58 = vpop.eup %2609 }
 0x320   :  { %1755 = vperm.xlu1 %2560, %v2586_v60   ;;  %v2612_v36 = vpop.eup %2611 }
 0x321   :  { %1750 = vperm.xlu0 %2559, %v2588_v46   ;;  %v2614_v38 = vpop.eup %2613 }
 0x322   :  { %v2616_v14 = vpop.eup %2615 }
 0x323   :  { %v2618_v47 = vpop.eup %2617 }
 0x324   :  { %1765 = vperm.xlu1 %2560, %v2590_v27   ;;  %v2620_v49 = vpop.eup %2619 }
 0x325   :  { %1760 = vperm.xlu0 %2559, %v2592_v59   ;;  %v2622_v37 = vpop.eup %2621 }
 0x326   :  { %v2624_v8 = vpop.eup %2623 }
 0x328   :  { %1877 = vperm.xlu1 %2560, %v2594_v23  }
 0x329   :  { %1872 = vperm.xlu0 %2559, %v2596_v41  }
 0x32c   :  { %1887 = vperm.xlu1 %2560, %v2598_v54  }
 0x32d   :  { %1882 = vperm.xlu0 %2559, %v2600_v48  }
 0x330   :  { %1897 = vperm.xlu1 %2560, %v2602_v5  }
 0x331   :  { %1892 = vperm.xlu0 %2559, %v2604_v10  }
 0x334   :  { %1907 = vperm.xlu1 %2560, %v2606_v22   ;;  %v3810_v22 = vld [vmem:[%s4006_s6] ss:$0 sm:$0xff] }
 0x335   :  { %1902 = vperm.xlu0 %2559, %v2608_v35  }
 0x338   :  { %1917 = vperm.xlu1 %2560, %v2610_v58  }
 0x339   :  { %1912 = vperm.xlu0 %2559, %v2612_v36  }
 0x33c   :  { %1927 = vperm.xlu1 %2560, %v2614_v38  }
 0x33d   :  { %1922 = vperm.xlu0 %2559, %v2616_v14  }
 0x340   :  { %1937 = vperm.xlu1 %2560, %v2618_v47  }
 0x341   :  { %1932 = vperm.xlu0 %2559, %v2620_v49  }
 0x344   :  { %1947 = vperm.xlu1 %2560, %v2622_v37  }
 0x345   :  { %1942 = vperm.xlu0 %2559, %v2624_v8  }
 0x387   :  { %v1701_v60 = vpop.permute.xlu1 %1700 }
 0x388   :  { %v1691_v46 = vpop.permute.xlu0 %1690  ;;  %v1770_v35 = vmul.f32 %v1701_v60, %v3698_v34 }
 0x389   :  { %v1768_v10 = vmul.f32 %v1691_v46, %v3700_v42 }
 0x38b   :  { %v1706_v0 = vpop.permute.xlu1 %1705  ;;  %v1788_v47 = vmul.f32 %v3810_v22, %v1768_v10 }
 0x38c   :  { %v1696_v16 = vpop.permute.xlu0 %1695 }
 0x38d   :  { %v1769_v5 = vmul.f32 %v1696_v16, %v3707_v57  ;;  %v1771_v57 = vmul.f32 %v1706_v0, %v3702_v4  ;;  %v3826_v4 = vld [vmem:[%s4005_s5] ss:$0 sm:$0xff] }
 0x38f   :  { %v1716_v27 = vpop.permute.xlu1 %1715  ;;  %v1789_v58 = vmul.f32 %v3810_v22, %v1769_v5 }
 0x390   :  { %v1711_v59 = vpop.permute.xlu0 %1710  ;;  %v1773_v36 = vmul.f32 %v1716_v27, %v3709_v9  ;;  %v1790_v9 = vmul.f32 %v3810_v22, %v1770_v35 }
 0x391   :  { %v1772_v38 = vmul.f32 %v1711_v59, %v3712_v25 }
 0x392   :  { %v1793_v16 = vmul.f32 %v3810_v22, %v1773_v36 }
 0x393   :  { %v1726_v43 = vpop.permute.xlu1 %1725  ;;  %v1792_v27 = vmul.f32 %v3810_v22, %v1772_v38 }
 0x394   :  { %v1721_v51 = vpop.permute.xlu0 %1720  ;;  %v1775_v49 = vmul.f32 %v1726_v43, %v3716_v20  ;;  %v1791_v20 = vmul.f32 %v3810_v22, %v1771_v57 }
 0x395   :  { %v1774_v34 = vmul.f32 %v1721_v51, %v3718_v11 }
 0x396   :  { %v1795_v43 = vmul.f32 %v3810_v22, %v1775_v49 }
 0x397   :  { %v1736_v23 = vpop.permute.xlu1 %1735 }
 0x398   :  { %v1731_v41 = vpop.permute.xlu0 %1730  ;;  %v1777_v25 = vmul.f32 %v1736_v23, %v3722_v30 }
 0x399   :  { %v1776_v11 = vmul.f32 %v1731_v41, %v3724_v7 }
 0x39b   :  { %v1746_v28 = vpop.permute.xlu1 %1745  ;;  %v1796_v35 = vmul.f32 %v3810_v22, %v1776_v11 }
 0x39c   :  { %v1741_v32 = vpop.permute.xlu0 %1740 }
 0x39f   :  { %v1756_v54 = vpop.permute.xlu1 %1755 }
 0x3a0   :  { %v3794_v48 = vpop.permute.xlu0 %1750 }
 0x3a3   :  { %v3796_v3 = vpop.permute.xlu1 %1765 }
 0x3a4   :  { %v3798_v19 = vpop.permute.xlu0 %1760 }
 0x3a7   :  { %v1878_v45 = vpop.permute.xlu1 %1877 }
 0x3a8   :  { %v1951_v1 = vmul.f32 %v1878_v45, %v3746_v15  ;;  %v1873_v31 = vpop.permute.xlu0 %1872 }
 0x3a9   :  { %v1950_v42 = vmul.f32 %v1873_v31, %v3748_v53 }
 0x3aa   :  { %v1971_v14 = vmul.f32 %v3805_v39, %v1951_v1 }
 0x3ab   :  { %v1970_v15 = vmul.f32 %v3805_v39, %v1950_v42  ;;  %v1888_v53 = vpop.permute.xlu1 %1887  ;;  %v1779_v42 = vmul.f32 %v1746_v28, %v3728_v52 }
 0x3ac   :  { %v1987_v37 = vadd.f32 %v1971_v14, %v1789_v58  ;;  %v1953_v8 = vmul.f32 %v1888_v53, %v3752_v33  ;;  %v1883_v60 = vpop.permute.xlu0 %1882  ;;  %v1794_v33 = vmul.f32 %v3810_v22, %v1774_v34  ;;  %v1778_v14 = vmul.f32 %v1741_v32, %v3730_v62 }
 0x3ad   :  { %v1986_v46 = vadd.f32 %v1970_v15, %v1788_v47  ;;  %v1952_v0 = vmul.f32 %v1883_v60, %v3754_v44  ;;  %v3848_v44 = vmul.f32 %v3810_v22, %v1777_v25  ;;  %v1781_v15 = vmul.f32 %v1756_v54, %v3734_v63 }
 0x3ae   :  { %v3838_v59 = vadd.f32 %v3826_v4, %v1987_v37  ;;  %v1973_v30 = vmul.f32 %v3805_v39, %v1953_v8  ;;  %v1780_v53 = vmul.f32 %v3794_v48, %v3736_v13  ;;  %v1799_v54 = vmul.f32 %v3810_v22, %v1779_v42 }
 0x3af   :  { %v3844_v51 = vadd.f32 %v3826_v4, %v1986_v46  ;;  %v1972_v7 = vmul.f32 %v3805_v39, %v1952_v0  ;;  %v1898_v23 = vpop.permute.xlu1 %1897  ;;  %v3877_v8 = vmul.f32 %v3810_v22, %v1778_v14 }
 0x3b0   :  { %v2042_v41 = vmin.f32 %v3838_v59, 0.0  ;;  %v1989_v5 = vadd.f32 %v1973_v30, %v1791_v20  ;;  %v1955_v10 = vmul.f32 %v1898_v23, %v3758_v21  ;;  %v1893_v45 = vpop.permute.xlu0 %1892  ;;  %v3883_v20 = vmul.f32 %v3810_v22, %v1781_v15 }
 0x3b1   :  { %v2041_v1 = vmin.f32 %v3844_v51, 0.0  ;;  %v1988_v31 = vadd.f32 %v1972_v7, %v1790_v9  ;;  %v1954_v57 = vmul.f32 %v1893_v45, %v3760_v55  ;;  %vm2026_vm0 = vcmp.gt.f32.partialorder %v3838_v59, 0.0 }
 0x3b2   :  { %v2059_v58 = vmul.f32 1.442695, %v2042_v41  ;;  %v3857_v36 = vadd.f32 %v3826_v4, %v1989_v5  ;;  %v1975_v38 = vmul.f32 %v3805_v39, %v1955_v10  ;;  %v3896_v41 = vmul.f32 %v3796_v3, %v3740_v61 }
 0x3b3   :  { %v2057_v47 = vmul.f32 1.442695, %v2041_v1  ;;  %v3862_v21 = vadd.f32 %v3826_v4, %v1988_v31  ;;  %v1974_v49 = vmul.f32 %v3805_v39, %v1954_v57  ;;  %v1908_v34 = vpop.permute.xlu1 %1907  ;;  %v3900_v5 = vmul.f32 %v3798_v19, %v3742_v24 }
 0x3b4   :  { %2625 = vpow2.f32 %v2059_v58  ;;  %v2044_v52 = vmin.f32 %v3857_v36, 0.0  ;;  %v1991_v55 = vadd.f32 %v1975_v38, %v1793_v16  ;;  %v1903_v28 = vpop.permute.xlu0 %1902  ;;  %v1957_v37 = vmul.f32 %v1908_v34, %v3764_v26 }
 0x3b5   :  { %2627 = vpow2.f32 %v2057_v47  ;;  %v2043_v62 = vmin.f32 %v3862_v21, 0.0  ;;  %v1990_v32 = vadd.f32 %v1974_v49, %v1792_v27  ;;  %v1956_v63 = vmul.f32 %v1903_v28, %v3766_v2 }
 0x3b6   :  { %v2063_v9 = vmul.f32 1.442695, %v2044_v52  ;;  %v3871_v25 = vadd.f32 %v3826_v4, %v1991_v55  ;;  %v1977_v26 = vmul.f32 %v3805_v39, %v1957_v37  ;;  %v3888_v2 = vmul.f32 %v3810_v22, %v1780_v53 }
 0x3b7   :  { %v2061_v60 = vmul.f32 1.442695, %v2043_v62  ;;  %v3880_v13 = vadd.f32 %v3826_v4, %v1990_v32  ;;  %v1918_v48 = vpop.permute.xlu1 %1917  ;;  %v1976_v16 = vmul.f32 %v3805_v39, %v1956_v63  ;;  %vm2025_vm7 = vcmp.gt.f32.partialorder %v3844_v51, 0.0 }
 0x3b8   :  { %2629 = vpow2.f32 %v2063_v9  ;;  %v2046_v11 = vmin.f32 %v3871_v25, 0.0  ;;  %v1913_v46 = vpop.permute.xlu0 %1912  ;;  %v1993_v30 = vadd.f32 %v1977_v26, %v1795_v43  ;;  %v1959_v7 = vmul.f32 %v1918_v48, %v3770_v17 }
 0x3b9   :  { %2631 = vpow2.f32 %v2061_v60  ;;  %v2045_v0 = vmin.f32 %v3880_v13, 0.0  ;;  %v1958_v23 = vmul.f32 %v1913_v46, %v3772_v29  ;;  %v1992_v45 = vadd.f32 %v1976_v16, %v1794_v33 }
 0x3ba   :  { %v2067_v27 = vmul.f32 1.442695, %v2046_v11  ;;  %v3903_v31 = vadd.f32 %v3826_v4, %v1993_v30  ;;  %v1979_v43 = vmul.f32 %v3805_v39, %v1959_v7  ;;  %vm2028_vm8 = vcmp.gt.f32.partialorder %v3857_v36, 0.0 }
 0x3bb   :  { %v2065_v10 = vmul.f32 1.442695, %v2045_v0  ;;  %v1928_v1 = vpop.permute.xlu1 %1927  ;;  %v1978_v17 = vmul.f32 %v3805_v39, %v1958_v23  ;;  %v3908_v61 = vadd.f32 %v3826_v4, %v1992_v45  ;;  %vm2027_vm9 = vcmp.gt.f32.partialorder %v3862_v21, 0.0 }
 0x3bc   :  { %2633 = vpow2.f32 %v2067_v27  ;;  %v1923_v29 = vpop.permute.xlu0 %1922  ;;  %v1961_v3 = vmul.f32 %v1928_v1, %v3776_v50  ;;  %v2048_v33 = vmin.f32 %v3903_v31, 0.0  ;;  %v1995_v57 = vadd.f32 %v1979_v43, %v3848_v44 }
 0x3bd   :  { %2635 = vpow2.f32 %v2065_v10  ;;  %v1960_v24 = vmul.f32 %v1923_v29, %v3778_v56  ;;  %v1994_v42 = vadd.f32 %v1978_v17, %v1796_v35  ;;  %v2047_v14 = vmin.f32 %v3908_v61, 0.0 }
 0x3be   :  { %v2626_v19 = vpop.eup %2625  ;;  %v1981_v47 = vmul.f32 %v3805_v39, %v1961_v3  ;;  %v2071_v50 = vmul.f32 1.442695, %v2048_v33  ;;  %v3919_v56 = vadd.f32 %v3826_v4, %v1995_v57  ;;  %vm2030_vm10 = vcmp.gt.f32.partialorder %v3871_v25, 0.0 }
 0x3bf   :  { %v2628_v58 = vpop.eup %2627  ;;  %v2220_v38 = vadd.f32 -1.0, %v2626_v19  ;;  %v3922_v34 = vadd.f32 %v3826_v4, %v1994_v42  ;;  %v2069_v44 = vmul.f32 1.442695, %v2047_v14  ;;  %v1980_v52 = vmul.f32 %v3805_v39, %v1960_v24  ;;  %v1938_v55 = vpop.permute.xlu1 %1937 }
 0x3c0   :  { %v2219_v49 = vadd.f32 -1.0, %v2628_v58  ;;  %v1997_v35 = vadd.f32 %v1981_v47, %v1799_v54  ;;  %2637 = vpow2.f32 %v2071_v50  ;;  %v2050_v62 = vmin.f32 %v3919_v56, 0.0  ;;  %v1933_v32 = vpop.permute.xlu0 %1932 }
 0x3c1   :  { %v2106_v15 = vsel %vm2026_vm0, %v3838_v59, %v2220_v38  ;;  %2639 = vpow2.f32 %v2069_v44  ;;  %v2049_v60 = vmin.f32 %v3922_v34, 0.0  ;;  %v1996_v11 = vadd.f32 %v1980_v52, %v3877_v8 }
 0x3c2   :  { %v2630_v28 = vpop.eup %2629  ;;  %v2105_v53 = vsel %vm2025_vm7, %v3844_v51, %v2219_v49  ;;  %v2075_v54 = vmul.f32 1.442695, %v2050_v62  ;;  %v3932_v48 = vadd.f32 %v3826_v4, %v1997_v35  ;;  %v1963_v26 = vmul.f32 %v1938_v55, %v3782_v40 }
 0x3c3   :  { %v2632_v9 = vpop.eup %2631  ;;  %v2270_v37 = vpack.c.bf16 %v2106_v15, %v2105_v53  ;;  %v2222_v63 = vadd.f32 -1.0, %v2630_v28  ;;  %v1962_v46 = vmul.f32 %v1933_v32, %v3784_v18  ;;  %v2073_v27 = vmul.f32 1.442695, %v2049_v60  ;;  %v1948_v8 = vpop.permute.xlu1 %1947 }
 0x3c4   :  { %v2221_v59 = vadd.f32 -1.0, %v2632_v9  ;;  %2641 = vpow2.f32 %v2075_v54  ;;  %v2052_v10 = vmin.f32 %v3932_v48, 0.0  ;;  %v1983_v40 = vmul.f32 %v3805_v39, %v1963_v26 }
 0x3c5   :  { %2271 = vst [vmem:[%s4007_s7] sm:$0xff] %v2270_v37   ;;  %v2108_v51 = vsel %vm2028_vm8, %v3857_v36, %v2222_v63  ;;  %v3945_v36 = vadd.f32 %v3826_v4, %v1996_v11  ;;  %2643 = vpow2.f32 %v2073_v27  ;;  %v1982_v18 = vmul.f32 %v3805_v39, %v1962_v46 }
 0x3c6   :  { %v2634_v0 = vpop.eup %2633  ;;  %v2107_v16 = vsel %vm2027_vm9, %v3862_v21, %v2221_v59  ;;  %v1943_v21 = vpop.permute.xlu0 %1942  ;;  %vm2029_vm11 = vcmp.gt.f32.partialorder %v3880_v13, 0.0  ;;  %v2079_v43 = vmul.f32 1.442695, %v2052_v10  ;;  %v1999_v3 = vadd.f32 %v1983_v40, %v3883_v20 }
 0x3c7   :  { %v2636_v30 = vpop.eup %2635  ;;  %v2275_v7 = vpack.c.bf16 %v2108_v51, %v2107_v16  ;;  %v2224_v23 = vadd.f32 -1.0, %v2634_v0  ;;  %v2051_v17 = vmin.f32 %v3945_v36, 0.0  ;;  %v1998_v24 = vadd.f32 %v1982_v18, %v3888_v2 }
 0x3c8   :  { %v2223_v45 = vadd.f32 -1.0, %v2636_v30  ;;  %v1965_v19 = vmul.f32 %v1948_v8, %v3788_v6  ;;  %2645 = vpow2.f32 %v2079_v43  ;;  %v1964_v42 = vmul.f32 %v1943_v21, %v3790_v12 }
 0x3c9   :  { %2307 = vst [vmem:[%s4007_s7 + $0x8] sm:$0xff] %v2275_v7   ;;  %v2110_v1 = vsel %vm2030_vm10, %v3871_v25, %v2224_v23  ;;  %v2077_v57 = vmul.f32 1.442695, %v2051_v17  ;;  %v1803_v25 = vmul.f32 %v3810_v22, %v3896_v41  ;;  %v2022_v38 = vadd.f32 %v3826_v4, %v1999_v3 }
 0x3ca   :  { %v2109_v29 = vsel %vm2029_vm11, %v3880_v13, %v2223_v45  ;;  %v2638_v58 = vpop.eup %2637  ;;  %v2021_v14 = vadd.f32 %v3826_v4, %v1998_v24  ;;  %v1985_v13 = vmul.f32 %v3805_v39, %v1965_v19  ;;  %v1802_v2 = vmul.f32 %v3810_v22, %v3900_v5 }
 0x3cb   :  { %v2280_v33 = vpack.c.bf16 %v2110_v1, %v2109_v29  ;;  %v2640_v20 = vpop.eup %2639  ;;  %v2226_v6 = vadd.f32 -1.0, %v2638_v58  ;;  %2647 = vpow2.f32 %v2077_v57  ;;  %v1984_v12 = vmul.f32 %v3805_v39, %v1964_v42 }
 0x3cc   :  { %vm2032_vm12 = vcmp.gt.f32.partialorder %v3903_v31, 0.0  ;;  %vm2031_vm13 = vcmp.gt.f32.partialorder %v3908_v61, 0.0  ;;  %v2225_v41 = vadd.f32 -1.0, %v2640_v20  ;;  %v2054_v47 = vmin.f32 %v2022_v38, 0.0 }
 0x3cd   :  { %2308 = vst [vmem:[%s4007_s7 + $0x10] sm:$0xff] %v2280_v33   ;;  %v2112_v49 = vsel %vm2032_vm12, %v3903_v31, %v2226_v6  ;;  %v2053_v50 = vmin.f32 %v2021_v14, 0.0  ;;  %v2001_v15 = vadd.f32 %v1985_v13, %v1803_v25  ;;  %v2000_v44 = vadd.f32 %v1984_v12, %v1802_v2 }
 0x3ce   :  { %v2642_v22 = vpop.eup %2641  ;;  %v2111_v5 = vsel %vm2031_vm13, %v3908_v61, %v2225_v41  ;;  %v2083_v35 = vmul.f32 1.442695, %v2054_v47  ;;  %vm2034_vm14 = vcmp.gt.f32.partialorder %v3919_v56, 0.0  ;;  %vm2033_vm15 = vcmp.gt.f32.partialorder %v3922_v34, 0.0 }
 0x3cf   :  { %v2285_v52 = vpack.c.bf16 %v2112_v49, %v2111_v5  ;;  %v2228_v55 = vadd.f32 -1.0, %v2642_v22  ;;  %v2081_v28 = vmul.f32 1.442695, %v2053_v50  ;;  %v2024_v39 = vadd.f32 %v3826_v4, %v2001_v15  ;;  %v2644_v53 = vpop.eup %2643 }
 0x3d0   :  { %2649 = vpow2.f32 %v2083_v35  ;;  %v2023_v62 = vadd.f32 %v3826_v4, %v2000_v44  ;;  %v2227_v32 = vadd.f32 -1.0, %v2644_v53  ;;  %vm2036_vm1 = vcmp.gt.f32.partialorder %v3932_v48, 0.0 }
 0x3d1   :  { %2309 = vst [vmem:[%s4007_s7 + $0x18] sm:$0xff] %v2285_v52   ;;  %v2114_v31 = vsel %vm2034_vm14, %v3919_v56, %v2228_v55  ;;  %2651 = vpow2.f32 %v2081_v28  ;;  %v2056_v61 = vmin.f32 %v2024_v39, 0.0  ;;  %vm2035_vm2 = vcmp.gt.f32.partialorder %v3945_v36, 0.0 }
 0x3d2   :  { %v2055_v9 = vmin.f32 %v2023_v62, 0.0  ;;  %v2646_v37 = vpop.eup %2645  ;;  %v2113_v63 = vsel %vm2033_vm15, %v3922_v34, %v2227_v32  ;;  %vm2038_vm3 = vcmp.gt.f32.partialorder %v2022_v38, 0.0  ;;  %vm2037_vm4 = vcmp.gt.f32.partialorder %v2021_v14, 0.0 }
 0x3d3   :  { %v2290_v59 = vpack.c.bf16 %v2114_v31, %v2113_v63  ;;  %v2230_v54 = vadd.f32 -1.0, %v2646_v37  ;;  %v2087_v60 = vmul.f32 1.442695, %v2056_v61  ;;  %vm2040_vm5 = vcmp.gt.f32.partialorder %v2024_v39, 0.0 }
 0x3d4   :  { %v2085_v51 = vmul.f32 1.442695, %v2055_v9  ;;  %vm2039_vm6 = vcmp.gt.f32.partialorder %v2023_v62, 0.0 }
 0x3d5   :  { %v2648_v4 = vpop.eup %2647  ;;  %2310 = vst [vmem:[%s4007_s7 + $0x20] sm:$0xff] %v2290_v59   ;;  %v2116_v56 = vsel %vm2036_vm1, %v3932_v48, %v2230_v54  ;;  %2653 = vpow2.f32 %v2087_v60 }
 0x3d6   :  { %v2229_v11 = vadd.f32 -1.0, %v2648_v4  ;;  %2655 = vpow2.f32 %v2085_v51 }
 0x3d8   :  { %v2115_v34 = vsel %vm2035_vm2, %v3945_v36, %v2229_v11 }
 0x3d9   :  { %v2295_v26 = vpack.c.bf16 %v2116_v56, %v2115_v34 }
 0x3da   :  { %v2650_v46 = vpop.eup %2649 }
 0x3db   :  { %v2652_v0 = vpop.eup %2651  ;;  %2311 = vst [vmem:[%s4007_s7 + $0x28] sm:$0xff] %v2295_v26   ;;  %v2232_v16 = vadd.f32 -1.0, %v2650_v46 }
 0x3dc   :  { %v2231_v27 = vadd.f32 -1.0, %v2652_v0 }
 0x3dd   :  { %v2118_v30 = vsel %vm2038_vm3, %v2022_v38, %v2232_v16 }
 0x3de   :  { %v2117_v48 = vsel %vm2037_vm4, %v2021_v14, %v2231_v27 }
 0x3df   :  { %v2300_v7 = vpack.c.bf16 %v2118_v30, %v2117_v48  ;;  %v2654_v23 = vpop.eup %2653 }
 0x3e0   :  { %v2656_v10 = vpop.eup %2655  ;;  %v2234_v36 = vadd.f32 -1.0, %v2654_v23 }
 0x3e1   :  { %2312 = vst [vmem:[%s4007_s7 + $0x30] sm:$0xff] %v2300_v7   ;;  %v2233_v8 = vadd.f32 -1.0, %v2656_v10 }
 0x3e2   :  { %v2120_v45 = vsel %vm2040_vm5, %v2024_v39, %v2234_v36 }
 0x3e3   :  { %v2119_v40 = vsel %vm2039_vm6, %v2023_v62, %v2233_v8 }
 0x3e4   :  { %v2305_v18 = vpack.c.bf16 %v2120_v45, %v2119_v40 }
 0x3e6   :  { %2313 = vst [vmem:[%s4007_s7 + $0x38] sm:$0xff] %v2305_v18  }

// kernel: gat_encoder_forward.7
= control target key start
LH: loop header
LB: loop body
LE: loop exit
PB: predicated region body
PF: predicated region fallthrough
CT: control target
= control target key end

     0   :  { %vm48_vm0 = vcmask 7168   ;;  %v1350_v0 = vmov 0.0   ;;  %s1978_s0 = inlined_call_operand.<no memory space> [shape: s32[1,1], index: 0, kind: input, shape index: {}]   ;;  %s1979_s1 = inlined_call_operand.vmem [shape: bf16[128,128], index: 1, kind: input, shape index: {}]   ;;  %s1980_s2 = inlined_call_operand.vmem [shape: f32[1,128], index: 2, kind: input, shape index: {}]   ;;  %s1981_s3 = inlined_call_operand.vmem [shape: f32[128,1], index: 3, kind: input, shape index: {}]   ;;  %s1982_s4 = inlined_call_operand.vmem [shape: s8[128,128], index: 4, kind: input, shape index: {}]   ;;  %s1983_s5 = inlined_call_operand.vmem [shape: f32[1,128], index: 5, kind: input, shape index: {}]   ;;  %s1984_s6 = inlined_call_operand.vmem [shape: f32[1,128], index: 6, kind: input, shape index: {}]   ;;  %s1985_s7 = inlined_call_operand.vmem [shape: f32[128,128], index: 7, kind: output, shape index: {}]  }
   0x1   :  { %32 = vst [vmem:[#allocation2] sm:$0xff] %v1350_v0  ;;  %33 = vst [vmem:[#allocation2 + $0x8] sm:$0xff] %v1350_v0  ;;  %p1163_p0 = scmp.le.s32.totalorder %s1978_s0, 0 }
   0x2   :  { %34 = vst [vmem:[#allocation2 + $0x10] sm:$0xff] %v1350_v0  ;;  %35 = vst [vmem:[#allocation2 + $0x18] sm:$0xff] %v1350_v0  ;;  %v105_v1 = vld [vmem:[%s1981_s3 + $0x40] sm:$0xff] (!%p1163_p0)  ;;  %v1351_v3 = vmov (!%p1163_p0), 0   ;;  %v106_v4 = vld [vmem:[%s1981_s3 + $0x48] sm:$0xff] (!%p1163_p0) }
   0x3   :  { %36 = vst [vmem:[#allocation2 + $0x20] sm:$0xff] %v1350_v0  ;;  %37 = vst [vmem:[#allocation2 + $0x28] sm:$0xff] %v1350_v0  ;;  %v97_v2 = vld [vmem:[%s1981_s3] sm:$0xff] (!%p1163_p0)  ;;  %1243 = vset.pattern.permute.xlu1 (!%p1163_p0), %v1351_v3  ;;  %1242 = vset.pattern.permute.xlu0 (!%p1163_p0), %v1351_v3  ;;  %v98_v5 = vld [vmem:[%s1981_s3 + $0x8] sm:$0xff] (!%p1163_p0) }
   0x4   :  { %38 = vst [vmem:[#allocation2 + $0x30] sm:$0xff] %v1350_v0  ;;  %39 = vst [vmem:[#allocation2 + $0x38] sm:$0xff] %v1350_v0  ;;  %156 = vperm.xlu1 (!%p1163_p0), %1243, %v105_v1   ;;  %116 = vperm.xlu0 (!%p1163_p0), %1242, %v97_v2   ;;  %v100_v6 = vld [vmem:[%s1981_s3 + $0x18] sm:$0xff] (!%p1163_p0)  ;;  %v99_v7 = vld [vmem:[%s1981_s3 + $0x10] sm:$0xff] (!%p1163_p0) }
   0x5   :  { %40 = vst [vmem:[#allocation2 + $0x40] sm:$0xff] %v1350_v0  ;;  %41 = vst [vmem:[#allocation2 + $0x48] sm:$0xff] %v1350_v0  ;;  %v108_v8 = vld [vmem:[%s1981_s3 + $0x58] sm:$0xff] (!%p1163_p0)  ;;  %v107_v9 = vld [vmem:[%s1981_s3 + $0x50] sm:$0xff] (!%p1163_p0) }
   0x6   :  { %42 = vst [vmem:[#allocation2 + $0x50] sm:$0xff] %v1350_v0  ;;  %43 = vst [vmem:[#allocation2 + $0x58] sm:$0xff] %v1350_v0  ;;  %v102_v10 = vld [vmem:[%s1981_s3 + $0x28] sm:$0xff] (!%p1163_p0)  ;;  %v101_v11 = vld [vmem:[%s1981_s3 + $0x20] sm:$0xff] (!%p1163_p0) }
   0x7   :  { %44 = vst [vmem:[#allocation2 + $0x60] sm:$0xff] %v1350_v0  ;;  %45 = vst [vmem:[#allocation2 + $0x68] sm:$0xff] %v1350_v0  ;;  %v110_v12 = vld [vmem:[%s1981_s3 + $0x68] sm:$0xff] (!%p1163_p0)  ;;  %v109_v13 = vld [vmem:[%s1981_s3 + $0x60] sm:$0xff] (!%p1163_p0) }
   0x8   :  { %46 = vst [vmem:[#allocation2 + $0x70] sm:$0xff] %v1350_v0  ;;  %47 = vst [vmem:[#allocation2 + $0x78] sm:$0xff] %v1350_v0  ;;  %161 = vperm.xlu1 (!%p1163_p0), %1243, %v106_v4   ;;  %121 = vperm.xlu0 (!%p1163_p0), %1242, %v98_v5   ;;  %v104_v14 = vld [vmem:[%s1981_s3 + $0x38] sm:$0xff] (!%p1163_p0)  ;;  %v103_v15 = vld [vmem:[%s1981_s3 + $0x30] sm:$0xff] (!%p1163_p0) }
   0x9   :  { %49 = vst.msk [vmem:[#allocation3] sm:$0xff] %vm48_vm0, %v1350_v0  ;;  %50 = vst.msk [vmem:[#allocation3 + $0x8] sm:$0xff] %vm48_vm0, %v1350_v0  ;;  %v112_v16 = vld [vmem:[%s1981_s3 + $0x78] sm:$0xff] (!%p1163_p0)  ;;  %v111_v17 = vld [vmem:[%s1981_s3 + $0x70] sm:$0xff] (!%p1163_p0) }
   0xa   :  { %51 = vst.msk [vmem:[#allocation3 + $0x10] sm:$0xff] %vm48_vm0, %v1350_v0  ;;  %52 = vst.msk [vmem:[#allocation3 + $0x18] sm:$0xff] %vm48_vm0, %v1350_v0  ;;  %72 = sbr.rel (%p1163_p0) target bundleno = 678 (0x2a6), region = 33  ;;  %v73_v18 = vld [vmem:[%s1982_s4] sm:$0xff] (!%p1163_p0)  ;;  %v75_v19 = vld [vmem:[%s1982_s4 + $0x10] sm:$0xff] (!%p1163_p0) }
   0xb   :  { %53 = vst.msk [vmem:[#allocation3 + $0x20] sm:$0xff] %vm48_vm0, %v1350_v0  ;;  %54 = vst.msk [vmem:[#allocation3 + $0x28] sm:$0xff] %vm48_vm0, %v1350_v0  ;;  %vm77_vm1 = vnez (!%p1163_p0), %v73_v18  ;;  %vm79_vm2 = vnez (!%p1163_p0), %v75_v19  ;;  %v74_v33 = vld [vmem:[%s1982_s4 + $0x8] sm:$0xff] (!%p1163_p0)  ;;  %v76_v44 = vld [vmem:[%s1982_s4 + $0x18] sm:$0xff] (!%p1163_p0) }
   0xc   :  { %55 = vst.msk [vmem:[#allocation3 + $0x30] sm:$0xff] %vm48_vm0, %v1350_v0  ;;  %56 = vst.msk [vmem:[#allocation3 + $0x38] sm:$0xff] %vm48_vm0, %v1350_v0  ;;  %131 = vperm.xlu1 (!%p1163_p0), %1243, %v100_v6   ;;  %126 = vperm.xlu0 (!%p1163_p0), %1242, %v99_v7   ;;  %v248_v20 = vsel (!%p1163_p0), %vm77_vm1, 16843009, %v1351_v3  ;;  %v250_v21 = vsel (!%p1163_p0), %vm79_vm2, 16843009, %v1351_v3  ;;  %vm78_vm3 = vnez (!%p1163_p0), %v74_v33  ;;  %vm80_vm9 = vnez (!%p1163_p0), %v76_v44 }
   0xd   :  { %57 = vst.msk [vmem:[#allocation3 + $0x40] sm:$0xff] %vm48_vm0, %v1350_v0  ;;  %58 = vst.msk [vmem:[#allocation3 + $0x48] sm:$0xff] %vm48_vm0, %v1350_v0  ;;  %v252_v22 = vunpack.c.0.s8 (!%p1163_p0), %v248_v20  ;;  %v253_v23 = vunpack.c.1.s8 (!%p1163_p0), %v248_v20  ;;  %v260_v24 = vunpack.c.0.s8 (!%p1163_p0), %v250_v21  ;;  %v254_v25 = vunpack.c.2.s8 (!%p1163_p0), %v248_v20  ;;  %v1492_v58 = vld [vmem:[%s1980_s2] ss:$0 sm:$0xff] (!%p1163_p0) }
   0xe   :  { %59 = vst.msk [vmem:[#allocation3 + $0x50] sm:$0xff] %vm48_vm0, %v1350_v0  ;;  %60 = vst.msk [vmem:[#allocation3 + $0x58] sm:$0xff] %vm48_vm0, %v1350_v0  ;;  %v261_v28 = vunpack.c.1.s8 (!%p1163_p0), %v250_v21  ;;  %v255_v30 = vunpack.c.3.s8 (!%p1163_p0), %v248_v20  ;;  %v262_v32 = vunpack.c.2.s8 (!%p1163_p0), %v250_v21  ;;  %v263_v42 = vunpack.c.3.s8 (!%p1163_p0), %v250_v21 }
   0xf   :  { %61 = vst.msk [vmem:[#allocation3 + $0x60] sm:$0xff] %vm48_vm0, %v1350_v0  ;;  %62 = vst.msk [vmem:[#allocation3 + $0x68] sm:$0xff] %vm48_vm0, %v1350_v0  ;;  %v268_v26 = vpack.c.b16 (!%p1163_p0), %v252_v22, %v252_v22  ;;  %v270_v27 = vpack.c.b16 (!%p1163_p0), %v253_v23, %v253_v23  ;;  %v284_v29 = vpack.c.b16 (!%p1163_p0), %v260_v24, %v260_v24  ;;  %v1474_v43 = vsel (!%p1163_p0), %vm78_vm3, 16843009, %v1351_v3 }
  0x10   :  { %63 = vst.msk [vmem:[#allocation3 + $0x70] sm:$0xff] %vm48_vm0, %v1350_v0  ;;  %64 = vst.msk [vmem:[#allocation3 + $0x78] sm:$0xff] %vm48_vm0, %v1350_v0  ;;  %171 = vperm.xlu1 (!%p1163_p0), %1243, %v108_v8   ;;  %166 = vperm.xlu0 (!%p1163_p0), %1242, %v107_v9   ;;  %v272_v31 = vpack.c.b16 (!%p1163_p0), %v254_v25, %v254_v25  ;;  %v286_v36 = vpack.c.b16 (!%p1163_p0), %v261_v28, %v261_v28  ;;  %v256_v49 = vunpack.c.0.s8 (!%p1163_p0), %v1474_v43 }
  0x11   :  { %v269_v34 = vpack.c.b8 %v268_v26, %v268_v26  ;;  %v271_v35 = vpack.c.b8 %v270_v27, %v270_v27  ;;  %v285_v37 = vpack.c.b8 %v284_v29, %v284_v29  ;;  %v274_v38 = vpack.c.b16 %v255_v30, %v255_v30 }
  0x12   :  { %v273_v39 = vpack.c.b8 %v272_v31, %v272_v31  ;;  %v288_v40 = vpack.c.b16 %v262_v32, %v262_v32  ;;  %v287_v41 = vpack.c.b8 %v286_v36, %v286_v36  ;;  %v290_v50 = vpack.c.b16 %v263_v42, %v263_v42 }
  0x13   :  { %vm300_vm4 = vnez %v269_v34  ;;  %vm301_vm5 = vnez %v271_v35  ;;  %vm308_vm6 = vnez %v285_v37  ;;  %v275_v45 = vpack.c.b8 %v274_v38, %v274_v38 }
  0x14   :  { %141 = vperm.xlu1 %1243, %v102_v10   ;;  %136 = vperm.xlu0 %1242, %v101_v11   ;;  %v316_v46 = vsel %vm300_vm4, 16843009, %v1351_v3  ;;  %v317_v47 = vsel %vm301_vm5, 16843009, %v1351_v3  ;;  %vm302_vm7 = vnez %v273_v39  ;;  %v289_v48 = vpack.c.b8 %v288_v40, %v288_v40 }
  0x15   :  { %vm309_vm8 = vnez %v287_v41  ;;  %v324_v51 = vsel %vm308_vm6, 16843009, %v1351_v3  ;;  %v257_v52 = vunpack.c.1.s8 %v1474_v43  ;;  %v332_v53 = vunpack.c.0.s8 %v316_v46 }
  0x16   :  { %v318_v54 = vsel %vm302_vm7, 16843009, %v1351_v3  ;;  %v333_v55 = vunpack.c.0.s8 %v317_v47  ;;  %v325_v56 = vsel %vm309_vm8, 16843009, %v1351_v3  ;;  %vm303_vm10 = vnez %v275_v45 }
  0x17   :  { %v1487_v57 = vsel %vm80_vm9, 16843009, %v1351_v3  ;;  %v340_v59 = vunpack.c.0.s8 %v324_v51  ;;  %vm310_vm11 = vnez %v289_v48  ;;  %v276_v60 = vpack.c.b16 %v256_v49, %v256_v49 }
  0x18   :  { %181 = vperm.xlu1 %1243, %v110_v12   ;;  %176 = vperm.xlu0 %1242, %v109_v13   ;;  %v291_v61 = vpack.c.b8 %v290_v50, %v290_v50  ;;  %v334_v62 = vunpack.c.0.s8 %v318_v54  ;;  %v278_v63 = vpack.c.b16 %v257_v52, %v257_v52  ;;  %vm1494_vm12 = vcmp.ne.s32.totalorder %v332_v53, 0 }
  0x19   :  { %v341_v4 = vunpack.c.0.s8 %v325_v56  ;;  %v319_v5 = vsel %vm303_vm10, 16843009, %v1351_v3  ;;  %v264_v6 = vunpack.c.0.s8 %v1487_v57  ;;  %vm1502_vm13 = vcmp.ne.s32.totalorder %v333_v55, 0 }
  0x1a   :  { %v326_v10 = vsel %vm310_vm11, 16843009, %v1351_v3  ;;  %vm1507_vm14 = vcmp.ne.s32.totalorder %v340_v59, 0  ;;  %v277_v12 = vpack.c.b8 %v276_v60, %v276_v60  ;;  %vm1511_vm15 = vnez %v291_v61 }
  0x1b   :  { %v279_v18 = vpack.c.b8 %v278_v63, %v278_v63  ;;  %vm1516_vm1 = vcmp.ne.s32.totalorder %v334_v62, 0  ;;  %vm1520_vm2 = vcmp.ne.s32.totalorder %v341_v4, 0  ;;  %v342_v23 = vunpack.c.0.s8 %v326_v10 }
  0x1c   :  { %151 = vperm.xlu1 %1243, %v104_v14   ;;  %146 = vperm.xlu0 %1242, %v103_v15   ;;  %v265_v14 = vunpack.c.1.s8 %v1487_v57  ;;  %v292_v24 = vpack.c.b16 %v264_v6, %v264_v6  ;;  %v258_v25 = vunpack.c.2.s8 %v1474_v43  ;;  %v327_v29 = vsel %vm1511_vm15, 16843009, %v1351_v3 }
  0x1d   :  { %vm1530_vm3 = vnez %v277_v12  ;;  %v259_v33 = vunpack.c.3.s8 %v1474_v43  ;;  %vm305_vm5 = vnez %v279_v18  ;;  %vm1544_vm6 = vcmp.ne.s32.totalorder %v342_v23, 0 }
  0x1e   :  { %v294_v32 = vpack.c.b16 %v265_v14, %v265_v14  ;;  %v343_v41 = vunpack.c.0.s8 %v327_v29  ;;  %v293_v42 = vpack.c.b8 %v292_v24, %v292_v24  ;;  %v280_v43 = vpack.c.b16 %v258_v25, %v258_v25 }
  0x1f   :  { %v266_v44 = vunpack.c.2.s8 %v1487_v57  ;;  %v320_v48 = vsel %vm1530_vm3, 16843009, %v1351_v3  ;;  %v321_v51 = vsel %vm305_vm5, 16843009, %v1351_v3  ;;  %v282_v52 = vpack.c.b16 %v259_v33, %v259_v33 }
  0x20   :  { %191 = vperm.xlu1 %1243, %v112_v16   ;;  %186 = vperm.xlu0 %1242, %v111_v17   ;;  %v335_v17 = vunpack.c.0.s8 %v319_v5  ;;  %v295_v56 = vpack.c.b8 %v294_v32, %v294_v32  ;;  %v336_v61 = vunpack.c.0.s8 %v320_v48  ;;  %vm1565_vm7 = vcmp.ne.s32.totalorder %v343_v41, 0  ;;  %v1695_v32 = vld [vmem:[#allocation3 + $0x10] sm:$0xff] }
  0x21   :  { %vm1569_vm8 = vnez %v293_v42  ;;  %v296_v5 = vpack.c.b16 %v266_v44, %v266_v44  ;;  %v267_v9 = vunpack.c.3.s8 %v1487_v57 }
  0x22   :  { %vm1539_vm4 = vcmp.ne.s32.totalorder %v335_v17, 0  ;;  %vm313_vm9 = vnez %v295_v56  ;;  %vm1586_vm10 = vcmp.ne.s32.totalorder %v336_v61, 0  ;;  %v328_v57 = vsel %vm1569_vm8, 16843009, %v1351_v3 }
  0x23   :  { %v283_v17 = vpack.c.b8 %v282_v52, %v282_v52  ;;  %v297_v21 = vpack.c.b8 %v296_v5, %v296_v5  ;;  %v329_v24 = vsel %vm313_vm9, 16843009, %v1351_v3  ;;  %v298_v25 = vpack.c.b16 %v267_v9, %v267_v9 }
  0x24   :  { %v344_v31 = vunpack.c.0.s8 %v328_v57 }
  0x25   :  { %v299_v42 = vpack.c.b8 %v298_v25, %v298_v25  ;;  %v1681_v25 = vld [vmem:[#allocation3 + $0x40] sm:$0xff] }
  0x26   :  { %vm360_vm15 = vcmp.ne.s32.totalorder %v344_v31, 0 }
  0x83   :  { %v157_v0 = vpop.permute.xlu1 %156  ;;  %v117_v1 = vpop.permute.xlu0 %116 }
  0x84   :  { %v208_v7 = vadd.f32 %v1492_v58, %v157_v0  ;;  %v200_v8 = vadd.f32 %v1492_v58, %v117_v1  ;;  %v281_v0 = vpack.c.b8 %v280_v43, %v280_v43 }
  0x86   :  { %v224_v15 = vmul.f32 0.2, %v208_v7  ;;  %v216_v16 = vmul.f32 0.2, %v200_v8  ;;  %vm1593_vm11 = vnez %v281_v0 }
  0x87   :  { %v162_v19 = vpop.permute.xlu1 %161  ;;  %v122_v20 = vpop.permute.xlu0 %121  ;;  %v322_v33 = vsel %vm1593_vm11, 16843009, %v1351_v3 }
  0x88   :  { %v209_v26 = vadd.f32 %v1492_v58, %v162_v19  ;;  %v201_v27 = vadd.f32 %v1492_v58, %v122_v20  ;;  %v232_v28 = vmax.f32 %v200_v8, %v216_v16  ;;  %v240_v30 = vmax.f32 %v208_v7, %v224_v15 }
  0x89   :  { %v337_v8 = vunpack.c.0.s8 %v321_v51  ;;  %v338_v48 = vunpack.c.0.s8 %v322_v33  ;;  %v1697_v33 = vld [vmem:[#allocation3 + $0x48] sm:$0xff] }
  0x8a   :  { %v225_v34 = vmul.f32 0.2, %v209_v26  ;;  %v217_v35 = vmul.f32 0.2, %v201_v27  ;;  %v1537_v36 = vsel %vm1494_vm12, %v232_v28, -1e+09 }
  0x8b   :  { %v132_v38 = vpop.permute.xlu1 %131  ;;  %v127_v39 = vpop.permute.xlu0 %126  ;;  %396 = vmax.xlane.f32.xlu0 %v1537_v36  ;;  %v1556_v49 = vsel %vm1507_vm14, %v240_v30, -1e+09  ;;  %vm1610_vm12 = vcmp.ne.s32.totalorder %v337_v8, 0  ;;  %vm314_vm14 = vnez %v297_v21  ;;  %vm354_vm3 = vcmp.ne.s32.totalorder %v338_v48, 0 }
  0x8c   :  { %v203_v45 = vadd.f32 %v1492_v58, %v132_v38  ;;  %v202_v46 = vadd.f32 %v1492_v58, %v127_v39  ;;  %v233_v47 = vmax.f32 %v201_v27, %v217_v35  ;;  %v241_v50 = vmax.f32 %v209_v26, %v225_v34  ;;  %v1246_v34 = vld [vmem:[%s1979_s1 + $0x10] sm:$0xff]  }
  0x8d   :  { %v345_v39 = vunpack.c.0.s8 %v329_v24  ;;  %v1679_v24 = vld [vmem:[#allocation3 + $0x8] sm:$0xff] }
  0x8e   :  { %v219_v53 = vmul.f32 0.2, %v203_v45  ;;  %v218_v54 = vmul.f32 0.2, %v202_v46  ;;  %v1561_v55 = vsel %vm1502_vm13, %v233_v47, -1e+09  ;;  %vm1617_vm13 = vnez %v283_v17 }
  0x8f   :  { %v172_v59 = vpop.permute.xlu1 %171  ;;  %v167_v60 = vpop.permute.xlu0 %166  ;;  %398 = vmax.xlane.f32.xlu1 %v1561_v55  ;;  %412 = vmax.xlane.f32.xlu0 %v1556_v49  ;;  %v1577_v6 = vsel %vm1520_vm2, %v241_v50, -1e+09  ;;  %v323_v50 = vsel %vm1617_vm13, 16843009, %v1351_v3  ;;  %vm315_vm2 = vnez %v299_v42  ;;  %v1716_v42 = vld [vmem:[#allocation3 + $0x18] sm:$0xff] }
  0x90   :  { %v211_v1 = vadd.f32 %v1492_v58, %v172_v59  ;;  %v210_v2 = vadd.f32 %v1492_v58, %v167_v60  ;;  %v234_v4 = vmax.f32 %v202_v46, %v218_v54  ;;  %v235_v7 = vmax.f32 %v203_v45, %v219_v53 }
  0x91   :  { %v330_v54 = vsel %vm314_vm14, 16843009, %v1351_v3  ;;  %v331_v9 = vsel %vm315_vm2, 16843009, %v1351_v3 }
  0x92   :  { %v227_v10 = vmul.f32 0.2, %v211_v1  ;;  %v226_v11 = vmul.f32 0.2, %v210_v2  ;;  %v1582_v12 = vsel %vm1516_vm1, %v234_v4, -1e+09  ;;  %v339_v4 = vunpack.c.0.s8 %v323_v50 }
  0x93   :  { %v142_v13 = vpop.permute.xlu1 %141  ;;  %v137_v14 = vpop.permute.xlu0 %136  ;;  %400 = vmax.xlane.f32.xlu1 %v1582_v12  ;;  %414 = vmax.xlane.f32.xlu0 %v1577_v6  ;;  %v1601_v22 = vsel %vm1539_vm4, %v235_v7, -1e+09  ;;  %vm1643_vm1 = vcmp.ne.s32.totalorder %v345_v39, 0  ;;  %v347_v57 = vunpack.c.0.s8 %v331_v9  ;;  %v1731_v50 = vld [vmem:[#allocation3 + $0x20] sm:$0xff] }
  0x94   :  { %v205_v18 = vadd.f32 %v1492_v58, %v142_v13  ;;  %v204_v19 = vadd.f32 %v1492_v58, %v137_v14  ;;  %v242_v20 = vmax.f32 %v210_v2, %v226_v11  ;;  %v243_v23 = vmax.f32 %v211_v1, %v227_v10 }
  0x95   :  { %v346_v2 = vunpack.c.0.s8 %v330_v54  ;;  %vm355_vm5 = vcmp.ne.s32.totalorder %v339_v4, 0 }
  0x96   :  { %v221_v26 = vmul.f32 0.2, %v205_v18  ;;  %v220_v27 = vmul.f32 0.2, %v204_v19  ;;  %v1606_v28 = vsel %vm1544_vm6, %v242_v20, -1e+09 }
  0x97   :  { %v182_v29 = vpop.permute.xlu1 %181  ;;  %v177_v30 = vpop.permute.xlu0 %176  ;;  %416 = vmax.xlane.f32.xlu1 %v1606_v28  ;;  %402 = vmax.xlane.f32.xlu0 %v1601_v22  ;;  %v1625_v40 = vsel %vm1565_vm7, %v243_v23, -1e+09  ;;  %vm362_vm4 = vcmp.ne.s32.totalorder %v346_v2, 0  ;;  %vm363_vm6 = vcmp.ne.s32.totalorder %v347_v57, 0  ;;  %v1674_v20 = vld [vmem:[#allocation3] sm:$0xff]  ;;  %v1249_v2 = vld [vmem:[%s1979_s1 + $0x28] sm:$0xff]  }
  0x98   :  { %v213_v35 = vadd.f32 %v1492_v58, %v182_v29  ;;  %v212_v37 = vadd.f32 %v1492_v58, %v177_v30  ;;  %v236_v38 = vmax.f32 %v204_v19, %v220_v27  ;;  %v237_v41 = vmax.f32 %v205_v18, %v221_v26  ;;  %v1244_v19 = vld [vmem:[%s1979_s1] sm:$0xff]   ;;  %v1245_v26 = vld [vmem:[%s1979_s1 + $0x8] sm:$0xff]  }
  0x99   :  { %1191 = vmatprep.subr.bf16.mxu0 %v1244_v19  ;;  %1223 = vmatprep.subr.bf16.mxu1 %v1244_v19 }
  0x9a   :  { %v229_v43 = vmul.f32 0.2, %v213_v35  ;;  %v228_v44 = vmul.f32 0.2, %v212_v37  ;;  %v1629_v45 = vsel %vm1586_vm10, %v236_v38, -1e+09  ;;  %1192 = vmatpush3.bf16.msra.mxu0 %v1244_v19  ;;  %1231 = vmatpush3.bf16.msra.mxu1 %v1244_v19 }
  0x9b   :  { %v152_v46 = vpop.permute.xlu1 %151  ;;  %v147_v47 = vpop.permute.xlu0 %146  ;;  %404 = vmax.xlane.f32.xlu1 %v1629_v45  ;;  %418 = vmax.xlane.f32.xlu0 %v1625_v40  ;;  %v1641_v56 = vsel %vm1610_vm12, %v237_v41, -1e+09  ;;  %v1714_v41 = vld [vmem:[#allocation3 + $0x50] sm:$0xff] }
  0x9c   :  { %v207_v51 = vadd.f32 %v1492_v58, %v152_v46  ;;  %v206_v52 = vadd.f32 %v1492_v58, %v147_v47  ;;  %v244_v53 = vmax.f32 %v212_v37, %v228_v44  ;;  %v245_v59 = vmax.f32 %v213_v35, %v229_v43  ;;  %1193 = vmatprep.subr.bf16.mxu0 %v1245_v26  ;;  %v1247_v43 = vld [vmem:[%s1979_s1 + $0x18] sm:$0xff]  }
  0x9d   :  { %1224 = vmatprep.subr.bf16.mxu1 %v1245_v26 }
  0x9e   :  { %v223_v61 = vmul.f32 0.2, %v207_v51  ;;  %v222_v62 = vmul.f32 0.2, %v206_v52  ;;  %v1647_v63 = vsel %vm360_vm15, %v244_v53, -1e+09  ;;  %1194 = vmatpush3.bf16.msra.mxu0 %v1245_v26  ;;  %1232 = vmatpush3.bf16.msra.mxu1 %v1245_v26 }
  0x9f   :  { %v192_v0 = vpop.permute.xlu1 %191  ;;  %v187_v1 = vpop.permute.xlu0 %186  ;;  %420 = vmax.xlane.f32.xlu1 %v1647_v63  ;;  %406 = vmax.xlane.f32.xlu0 %v1641_v56  ;;  %v1656_v10 = vsel %vm1643_vm1, %v245_v59, -1e+09 }
  0xa0   :  { %v215_v5 = vadd.f32 %v1492_v58, %v192_v0  ;;  %v214_v7 = vadd.f32 %v1492_v58, %v187_v1  ;;  %v238_v8 = vmax.f32 %v206_v52, %v222_v62  ;;  %v239_v15 = vmax.f32 %v207_v51, %v223_v61  ;;  %1195 = vmatprep.subr.bf16.mxu0 %v1246_v34  ;;  %v1733_v51 = vld [vmem:[#allocation3 + $0x58] sm:$0xff]  ;;  %v1248_v52 = vld [vmem:[%s1979_s1 + $0x20] sm:$0xff]   ;;  %v1750_v0 = vld [vmem:[#allocation3 + $0x28] sm:$0xff] }
  0xa1   :  { %1225 = vmatprep.subr.bf16.mxu1 %v1246_v34  ;;  %v1748_v62 = vld [vmem:[#allocation3 + $0x60] sm:$0xff] }
  0xa2   :  { %v231_v11 = vmul.f32 0.2, %v215_v5  ;;  %v230_v13 = vmul.f32 0.2, %v214_v7  ;;  %v1658_v14 = vsel %vm354_vm3, %v238_v8, -1e+09  ;;  %1196 = vmatpush3.bf16.msra.mxu0 %v1246_v34  ;;  %1233 = vmatpush3.bf16.msra.mxu1 %v1246_v34 }
  0xa3   :  { %408 = vmax.xlane.f32.xlu1 %v1658_v14  ;;  %422 = vmax.xlane.f32.xlu0 %v1656_v10  ;;  %v1664_v3 = vsel %vm355_vm5, %v239_v15, -1e+09  ;;  %v1767_v15 = vld [vmem:[#allocation3 + $0x68] sm:$0xff]  ;;  %v1251_v34 = vld [vmem:[%s1979_s1 + $0x38] sm:$0xff]  }
  0xa4   :  { %v246_v58 = vmax.f32 %v214_v7, %v230_v13  ;;  %v247_v17 = vmax.f32 %v215_v5, %v231_v11  ;;  %1197 = vmatprep.subr.bf16.mxu0 %v1247_v43  ;;  %1226 = vmatprep.subr.bf16.mxu1 %v1247_v43  ;;  %v386_v13 = vld [vmem:[#allocation3 + $0x30] sm:$0xff] }
  0xa6   :  { %v1662_v16 = vsel %vm362_vm4, %v246_v58, -1e+09  ;;  %v1668_v18 = vsel %vm363_vm6, %v247_v17, -1e+09  ;;  %1198 = vmatpush3.bf16.msra.mxu0 %v1247_v43  ;;  %1234 = vmatpush3.bf16.msra.mxu1 %v1247_v43  ;;  %v1250_v17 = vld [vmem:[%s1979_s1 + $0x30] sm:$0xff]  }
  0xa7   :  { %424 = vmax.xlane.f32.xlu1 %v1662_v16  ;;  %410 = vmax.xlane.f32.xlu0 %v1664_v3 }
  0xa8   :  { %1199 = vmatprep.subr.bf16.mxu0 %v1248_v52  ;;  %1227 = vmatprep.subr.bf16.mxu1 %v1248_v52 }
  0xaa   :  { %1200 = vmatpush3.bf16.msra.mxu0 %v1248_v52  ;;  %1235 = vmatpush3.bf16.msra.mxu1 %v1248_v52 }
  0xab   :  { %426 = vmax.xlane.f32.xlu0 %v1668_v18  ;;  %1201 = vmatprep.subr.bf16.mxu0 %v1249_v2 }
  0xac   :  { %1228 = vmatprep.subr.bf16.mxu1 %v1249_v2 }
  0xae   :  { %1202 = vmatpush3.bf16.msra.mxu0 %v1249_v2  ;;  %1236 = vmatpush3.bf16.msra.mxu1 %v1249_v2 }
  0xaf   :  { %1203 = vmatprep.subr.bf16.mxu0 %v1250_v17  ;;  %1229 = vmatprep.subr.bf16.mxu1 %v1250_v17 }
  0xb2   :  { %1204 = vmatpush3.bf16.msra.mxu0 %v1250_v17  ;;  %1237 = vmatpush3.bf16.msra.mxu1 %v1250_v17 }
  0xb3   :  { %1205 = vmatprep.subr.bf16.mxu0 %v1251_v34  ;;  %1230 = vmatprep.subr.bf16.mxu1 %v1251_v34 }
  0xb6   :  { %1206 = vmatpush3.bf16.msra.mxu0 %v1251_v34  ;;  %1238 = vmatpush3.bf16.msra.mxu1 %v1251_v34 }
 0x118   :  { %v397_v21 = vpop.xlane.xlu0 %396 }
 0x119   :  { %v1677_v23 = vmax.f32 %v1674_v20, %v397_v21 }
 0x11b   :  { %918 = vst.msk [vmem:[#allocation3] sm:$0xff] %vm48_vm0, %v1677_v23  ;;  %494 = vperm.xlu1 %1243, %v1677_v23   ;;  %v444_v53 = vsub.f32 %v1674_v20, %v1677_v23 }
 0x11c   :  { %v399_v27 = vpop.xlane.xlu1 %398  ;;  %v413_v29 = vpop.xlane.xlu0 %412 }
 0x11d   :  { %v1690_v30 = vmax.f32 %v1679_v24, %v399_v27  ;;  %v1693_v31 = vmax.f32 %v1681_v25, %v413_v29  ;;  %v460_v4 = vmul.f32 1.442695, %v444_v53  ;;  %v1781_v27 = vld [vmem:[#allocation3 + $0x70] sm:$0xff]  ;;  %v387_v29 = vld [vmem:[#allocation3 + $0x38] sm:$0xff] }
 0x11f   :  { %919 = vst.msk [vmem:[#allocation3 + $0x8] sm:$0xff] %vm48_vm0, %v1690_v30  ;;  %926 = vst.msk [vmem:[#allocation3 + $0x40] sm:$0xff] %vm48_vm0, %v1693_v31  ;;  %499 = vperm.xlu0 %1242, %v1690_v30   ;;  %534 = vperm.xlu1 %1243, %v1693_v31   ;;  %v445_v1 = vsub.f32 %v1679_v24, %v1690_v30  ;;  %1252 = vpow2.f32 %v460_v4 }
 0x120   :  { %v401_v35 = vpop.xlane.xlu1 %400  ;;  %v415_v37 = vpop.xlane.xlu0 %414 }
 0x121   :  { %v1709_v38 = vmax.f32 %v1695_v32, %v401_v35  ;;  %v1712_v39 = vmax.f32 %v1697_v33, %v415_v37  ;;  %v462_v57 = vmul.f32 1.442695, %v445_v1 }
 0x123   :  { %920 = vst.msk [vmem:[#allocation3 + $0x10] sm:$0xff] %vm48_vm0, %v1709_v38  ;;  %927 = vst.msk [vmem:[#allocation3 + $0x48] sm:$0xff] %vm48_vm0, %v1712_v39  ;;  %504 = vperm.xlu0 %1242, %v1709_v38   ;;  %539 = vperm.xlu1 %1243, %v1712_v39   ;;  %v446_v5 = vsub.f32 %v1695_v32, %v1709_v38  ;;  %1254 = vpow2.f32 %v462_v57  ;;  %v453_v1 = vsub.f32 %v1697_v33, %v1712_v39 }
 0x124   :  { %v417_v44 = vpop.xlane.xlu1 %416  ;;  %v403_v46 = vpop.xlane.xlu0 %402 }
 0x125   :  { %v1728_v47 = vmax.f32 %v1714_v41, %v417_v44  ;;  %v431_v48 = vmax.f32 %v1716_v42, %v403_v46  ;;  %v464_v19 = vmul.f32 1.442695, %v446_v5  ;;  %v395_v46 = vld [vmem:[#allocation3 + $0x78] sm:$0xff]  ;;  %v478_v5 = vmul.f32 1.442695, %v453_v1 }
 0x127   :  { %928 = vst.msk [vmem:[#allocation3 + $0x50] sm:$0xff] %vm48_vm0, %v1728_v47  ;;  %921 = vst.msk [vmem:[#allocation3 + $0x18] sm:$0xff] %vm48_vm0, %v431_v48  ;;  %544 = vperm.xlu0 %1242, %v1728_v47   ;;  %509 = vperm.xlu1 %1243, %v431_v48   ;;  %v447_v58 = vsub.f32 %v1716_v42, %v431_v48  ;;  %1256 = vpow2.f32 %v464_v19  ;;  %v452_v48 = vsub.f32 %v1681_v25, %v1693_v31 }
 0x128   :  { %v405_v54 = vpop.xlane.xlu1 %404  ;;  %v419_v59 = vpop.xlane.xlu0 %418  ;;  %v454_v25 = vsub.f32 %v1714_v41, %v1728_v47 }
 0x129   :  { %v432_v60 = vmax.f32 %v1731_v50, %v405_v54  ;;  %v1746_v61 = vmax.f32 %v1733_v51, %v419_v59  ;;  %v466_v30 = vmul.f32 1.442695, %v447_v58 }
 0x12a   :  { %v480_v33 = vmul.f32 1.442695, %v454_v25 }
 0x12b   :  { %922 = vst.msk [vmem:[#allocation3 + $0x20] sm:$0xff] %vm48_vm0, %v432_v60  ;;  %929 = vst.msk [vmem:[#allocation3 + $0x58] sm:$0xff] %vm48_vm0, %v1746_v61  ;;  %514 = vperm.xlu0 %1242, %v432_v60   ;;  %549 = vperm.xlu1 %1243, %v1746_v61   ;;  %v448_v20 = vsub.f32 %v1731_v50, %v432_v60  ;;  %1258 = vpow2.f32 %v466_v30  ;;  %v1253_v60 = vpop.eup %1252 }
 0x12c   :  { %v421_v7 = vpop.xlane.xlu1 %420  ;;  %v407_v8 = vpop.xlane.xlu0 %406 }
 0x12d   :  { %v1764_v9 = vmax.f32 %v1748_v62, %v421_v7  ;;  %v433_v11 = vmax.f32 %v1750_v0, %v407_v8  ;;  %v468_v35 = vmul.f32 1.442695, %v448_v20  ;;  %v1255_v2 = vpop.eup %1254  ;;  %v455_v7 = vsub.f32 %v1733_v51, %v1746_v61 }
 0x12f   :  { %930 = vst.msk [vmem:[#allocation3 + $0x60] sm:$0xff] %vm48_vm0, %v1764_v9  ;;  %923 = vst.msk [vmem:[#allocation3 + $0x28] sm:$0xff] %vm48_vm0, %v433_v11  ;;  %554 = vperm.xlu0 %1242, %v1764_v9   ;;  %519 = vperm.xlu1 %1243, %v433_v11   ;;  %v449_v32 = vsub.f32 %v1750_v0, %v433_v11  ;;  %1260 = vpow2.f32 %v468_v35  ;;  %v476_v0 = vmul.f32 1.442695, %v452_v48  ;;  %v482_v41 = vmul.f32 1.442695, %v455_v7 }
 0x130   :  { %v409_v21 = vpop.xlane.xlu1 %408  ;;  %v423_v23 = vpop.xlane.xlu0 %422  ;;  %v456_v39 = vsub.f32 %v1748_v62, %v1764_v9 }
 0x131   :  { %v434_v24 = vmax.f32 %v386_v13, %v409_v21  ;;  %v1779_v26 = vmax.f32 %v1767_v15, %v423_v23  ;;  %v470_v50 = vmul.f32 1.442695, %v449_v32  ;;  %v1257_v4 = vpop.eup %1256 }
 0x133   :  { %924 = vst.msk [vmem:[#allocation3 + $0x30] sm:$0xff] %vm48_vm0, %v434_v24  ;;  %931 = vst.msk [vmem:[#allocation3 + $0x68] sm:$0xff] %vm48_vm0, %v1779_v26  ;;  %524 = vperm.xlu0 %1242, %v434_v24   ;;  %559 = vperm.xlu1 %1243, %v1779_v26   ;;  %v450_v37 = vsub.f32 %v386_v13, %v434_v24  ;;  %1262 = vpow2.f32 %v470_v50  ;;  %v457_v47 = vsub.f32 %v1767_v15, %v1779_v26 }
 0x134   :  { %v425_v38 = vpop.xlane.xlu1 %424  ;;  %v411_v42 = vpop.xlane.xlu0 %410  ;;  %v484_v13 = vmul.f32 1.442695, %v456_v39 }
 0x135   :  { %v442_v43 = vmax.f32 %v1781_v27, %v425_v38  ;;  %v435_v44 = vmax.f32 %v387_v29, %v411_v42  ;;  %v472_v52 = vmul.f32 1.442695, %v450_v37  ;;  %v1259_v8 = vpop.eup %1258  ;;  %v486_v58 = vmul.f32 1.442695, %v457_v47 }
 0x137   :  { %932 = vst.msk [vmem:[#allocation3 + $0x70] sm:$0xff] %vm48_vm0, %v442_v43  ;;  %925 = vst.msk [vmem:[#allocation3 + $0x38] sm:$0xff] %vm48_vm0, %v435_v44  ;;  %564 = vperm.xlu0 %1242, %v442_v43   ;;  %529 = vperm.xlu1 %1243, %v435_v44   ;;  %v451_v53 = vsub.f32 %v387_v29, %v435_v44  ;;  %1264 = vpow2.f32 %v472_v52  ;;  %v458_v51 = vsub.f32 %v1781_v27, %v442_v43 }
 0x138   :  { %v427_v54 = vpop.xlane.xlu0 %426  ;;  %1266 = vpow2.f32 %v476_v0 }
 0x139   :  { %v443_v59 = vmax.f32 %v395_v46, %v427_v54  ;;  %v474_v31 = vmul.f32 1.442695, %v451_v53  ;;  %v1261_v11 = vpop.eup %1260  ;;  %v488_v62 = vmul.f32 1.442695, %v458_v51 }
 0x13b   :  { %933 = vst.msk [vmem:[#allocation3 + $0x78] sm:$0xff] %vm48_vm0, %v443_v59  ;;  %638 = vperm.xlu0 %1242, %v1253_v60   ;;  %569 = vperm.xlu1 %1243, %v443_v59   ;;  %1268 = vpow2.f32 %v474_v31  ;;  %v459_v9 = vsub.f32 %v395_v46, %v443_v59 }
 0x13c   :  { %1270 = vpow2.f32 %v478_v5 }
 0x13d   :  { %1272 = vpow2.f32 %v480_v33  ;;  %v1263_v61 = vpop.eup %1262  ;;  %v490_v15 = vmul.f32 1.442695, %v459_v9 }
 0x13e   :  { %1274 = vpow2.f32 %v482_v41 }
 0x13f   :  { %648 = vperm.xlu0 %1242, %v1257_v4   ;;  %643 = vperm.xlu1 %1243, %v1255_v2   ;;  %1276 = vpow2.f32 %v484_v13 }
 0x140   :  { %1278 = vpow2.f32 %v486_v58 }
 0x141   :  { %v1265_v57 = vpop.eup %1264  ;;  %1280 = vpow2.f32 %v488_v62 }
 0x142   :  { %v1267_v17 = vpop.eup %1266  ;;  %1282 = vpow2.f32 %v490_v15 }
 0x143   :  { %658 = vperm.xlu0 %1242, %v1261_v11   ;;  %653 = vperm.xlu1 %1243, %v1259_v8  }
 0x145   :  { %v1269_v19 = vpop.eup %1268 }
 0x146   :  { %v1271_v20 = vpop.eup %1270 }
 0x147   :  { %668 = vperm.xlu0 %1242, %v1265_v57   ;;  %663 = vperm.xlu1 %1243, %v1263_v61   ;;  %v1273_v21 = vpop.eup %1272 }
 0x148   :  { %v1275_v23 = vpop.eup %1274 }
 0x149   :  { %v1277_v24 = vpop.eup %1276 }
 0x14a   :  { %v1279_v26 = vpop.eup %1278 }
 0x14b   :  { %678 = vperm.xlu0 %1242, %v1267_v17   ;;  %673 = vperm.xlu1 %1243, %v1269_v19   ;;  %v1281_v27 = vpop.eup %1280 }
 0x14c   :  { %v1283_v29 = vpop.eup %1282 }
 0x14f   :  { %688 = vperm.xlu0 %1242, %v1273_v21   ;;  %683 = vperm.xlu1 %1243, %v1271_v20  }
 0x153   :  { %698 = vperm.xlu0 %1242, %v1277_v24   ;;  %693 = vperm.xlu1 %1243, %v1275_v23  }
 0x157   :  { %708 = vperm.xlu0 %1242, %v1281_v27   ;;  %703 = vperm.xlu1 %1243, %v1279_v26  }
 0x15b   :  { %713 = vperm.xlu1 %1243, %v1283_v29  }
 0x19a   :  { %v495_v30 = vpop.permute.xlu1 %494 }
 0x19b   :  { %v572_v32 = vsub.f32 %v1537_v36, %v495_v30 }
 0x19d   :  { %v588_v37 = vmul.f32 1.442695, %v572_v32 }
 0x19e   :  { %v535_v34 = vpop.permute.xlu1 %534  ;;  %v500_v35 = vpop.permute.xlu0 %499 }
 0x19f   :  { %v580_v38 = vsub.f32 %v1556_v49, %v535_v34  ;;  %v573_v42 = vsub.f32 %v1561_v55, %v500_v35  ;;  %1284 = vpow2.f32 %v588_v37 }
 0x1a1   :  { %v590_v43 = vmul.f32 1.442695, %v573_v42  ;;  %v604_v44 = vmul.f32 1.442695, %v580_v38 }
 0x1a2   :  { %v540_v46 = vpop.permute.xlu1 %539  ;;  %v505_v48 = vpop.permute.xlu0 %504 }
 0x1a3   :  { %v581_v50 = vsub.f32 %v1577_v6, %v540_v46  ;;  %v574_v52 = vsub.f32 %v1582_v12, %v505_v48  ;;  %1286 = vpow2.f32 %v590_v43 }
 0x1a4   :  { %1288 = vpow2.f32 %v604_v44 }
 0x1a5   :  { %v606_v53 = vmul.f32 1.442695, %v581_v50  ;;  %v592_v36 = vmul.f32 1.442695, %v574_v52 }
 0x1a6   :  { %v510_v54 = vpop.permute.xlu1 %509  ;;  %v545_v59 = vpop.permute.xlu0 %544 }
 0x1a7   :  { %1290 = vpow2.f32 %v606_v53  ;;  %v575_v49 = vsub.f32 %v1601_v22, %v510_v54  ;;  %v582_v55 = vsub.f32 %v1606_v28, %v545_v59 }
 0x1a8   :  { %1292 = vpow2.f32 %v592_v36 }
 0x1a9   :  { %v594_v60 = vmul.f32 1.442695, %v575_v49  ;;  %v608_v0 = vmul.f32 1.442695, %v582_v55  ;;  %v1285_v31 = vpop.eup %1284  ;;  %v622_v49 = vld [vmem:[#allocation2 + $0x10] sm:$0xff] }
 0x1aa   :  { %v550_v1 = vpop.permute.xlu1 %549  ;;  %v515_v25 = vpop.permute.xlu0 %514 }
 0x1ab   :  { %1294 = vpow2.f32 %v594_v60  ;;  %v583_v6 = vsub.f32 %v1625_v40, %v550_v1  ;;  %v576_v12 = vsub.f32 %v1629_v45, %v515_v25  ;;  %v620_v60 = vld [vmem:[#allocation2] sm:$0xff]  ;;  %v621_v1 = vld [vmem:[#allocation2 + $0x8] sm:$0xff] }
 0x1ac   :  { %1296 = vpow2.f32 %v608_v0  ;;  %v623_v0 = vld [vmem:[#allocation2 + $0x18] sm:$0xff] }
 0x1ad   :  { %v610_v2 = vmul.f32 1.442695, %v583_v6  ;;  %v1287_v4 = vpop.eup %1286  ;;  %v596_v5 = vmul.f32 1.442695, %v576_v12  ;;  %v630_v12 = vld [vmem:[#allocation2 + $0x50] sm:$0xff] }
 0x1ae   :  { %v520_v7 = vpop.permute.xlu1 %519  ;;  %v555_v33 = vpop.permute.xlu0 %554  ;;  %v732_v39 = vpack.c.bf16 %v1287_v4, %v1285_v31 }
 0x1af   :  { %1298 = vpow2.f32 %v610_v2  ;;  %v577_v22 = vsub.f32 %v1641_v56, %v520_v7  ;;  %v584_v28 = vsub.f32 %v1647_v63, %v555_v33  ;;  %v1289_v8 = vpop.eup %1288 }
 0x1b0   :  { %1207 = vmatprep.mubr.bf16.mxu0 %v732_v39  ;;  %1300 = vpow2.f32 %v596_v5  ;;  %v628_v5 = vld [vmem:[#allocation2 + $0x40] sm:$0xff] }
 0x1b1   :  { %v1291_v11 = vpop.eup %1290  ;;  %v598_v41 = vmul.f32 1.442695, %v577_v22  ;;  %v612_v40 = vmul.f32 1.442695, %v584_v28  ;;  %v631_v28 = vld [vmem:[#allocation2 + $0x58] sm:$0xff] }
 0x1b2   :  { %v560_v45 = vpop.permute.xlu1 %559  ;;  %v525_v47 = vpop.permute.xlu0 %524  ;;  %v736_v13 = vpack.c.bf16 %v1291_v11, %v1289_v8 }
 0x1b3   :  { %1302 = vpow2.f32 %v598_v41  ;;  %v585_v51 = vsub.f32 %v1656_v10, %v560_v45  ;;  %v578_v61 = vsub.f32 %v1658_v14, %v525_v47  ;;  %v1293_v57 = vpop.eup %1292  ;;  %v629_v41 = vld [vmem:[#allocation2 + $0x48] sm:$0xff] }
 0x1b4   :  { %1215 = vmatprep.mubr.bf16.mxu1 %v736_v13  ;;  %1304 = vpow2.f32 %v612_v40 }
 0x1b5   :  { %v1295_v56 = vpop.eup %1294  ;;  %v614_v58 = vmul.f32 1.442695, %v585_v51  ;;  %v600_v63 = vmul.f32 1.442695, %v578_v61 }
 0x1b6   :  { %v530_v62 = vpop.permute.xlu1 %529  ;;  %v565_v9 = vpop.permute.xlu0 %564  ;;  %v733_v17 = vpack.c.bf16 %v1295_v56, %v1293_v57 }
 0x1b7   :  { %1306 = vpow2.f32 %v614_v58  ;;  %v579_v19 = vsub.f32 %v1664_v3, %v530_v62  ;;  %v586_v15 = vsub.f32 %v1662_v16, %v565_v9  ;;  %v1297_v20 = vpop.eup %1296 }
 0x1b8   :  { %1208 = vmatmul.mubr.bf16.vlgmr.msra.gmra.mrb[0].mxu0 %v733_v17  ;;  %1308 = vpow2.f32 %v600_v63 }
 0x1b9   :  { %v1299_v21 = vpop.eup %1298  ;;  %v602_v10 = vmul.f32 1.442695, %v579_v19  ;;  %v616_v14 = vmul.f32 1.442695, %v586_v15 }
 0x1ba   :  { %v570_v23 = vpop.permute.xlu1 %569  ;;  %v737_v24 = vpack.c.bf16 %v1299_v21, %v1297_v20  ;;  %v1301_v27 = vpop.eup %1300  ;;  %v626_v21 = vld [vmem:[#allocation2 + $0x30] sm:$0xff] }
 0x1bb   :  { %1310 = vpow2.f32 %v602_v10  ;;  %v587_v26 = vsub.f32 %v1668_v18, %v570_v23  ;;  %v639_v18 = vpop.permute.xlu0 %638  ;;  %v627_v23 = vld [vmem:[#allocation2 + $0x38] sm:$0xff] }
 0x1bc   :  { %1216 = vmatmul.mubr.bf16.vlgmr.msra.gmra.mrb[0].mxu1 %v737_v24  ;;  %1312 = vpow2.f32 %v616_v14  ;;  %v716_v6 = vmul.f32 %v639_v18, %v620_v60  ;;  %v624_v14 = vld [vmem:[#allocation2 + $0x20] sm:$0xff]  ;;  %v625_v24 = vld [vmem:[#allocation2 + $0x28] sm:$0xff] }
 0x1bd   :  { %v1303_v29 = vpop.eup %1302  ;;  %v618_v30 = vmul.f32 1.442695, %v587_v26  ;;  %v633_v18 = vld [vmem:[#allocation2 + $0x68] sm:$0xff] }
 0x1be   :  { %v734_v32 = vpack.c.bf16 %v1303_v29, %v1301_v27  ;;  %v1305_v3 = vpop.eup %1304  ;;  %v644_v46 = vpop.permute.xlu1 %643  ;;  %v634_v29 = vld [vmem:[#allocation2 + $0x70] sm:$0xff] }
 0x1bf   :  { %1314 = vpow2.f32 %v618_v30  ;;  %v649_v48 = vpop.permute.xlu0 %648  ;;  %v717_v22 = vmul.f32 %v644_v46, %v621_v1 }
 0x1c0   :  { %1211 = vmatprep.mubr.bf16.mxu0 %v734_v32  ;;  %v718_v25 = vmul.f32 %v649_v48, %v622_v49 }
 0x1c1   :  { %v1307_v16 = vpop.eup %1306 }
 0x1c2   :  { %v738_v34 = vpack.c.bf16 %v1307_v16, %v1305_v3  ;;  %v1309_v35 = vpop.eup %1308  ;;  %v654_v50 = vpop.permute.xlu1 %653  ;;  %v632_v16 = vld [vmem:[#allocation2 + $0x60] sm:$0xff] }
 0x1c3   :  { %v659_v52 = vpop.permute.xlu0 %658  ;;  %v719_v4 = vmul.f32 %v654_v50, %v623_v0 }
 0x1c4   :  { %1219 = vmatprep.mubr.bf16.mxu1 %v738_v34  ;;  %v720_v27 = vmul.f32 %v659_v52, %v624_v14 }
 0x1c5   :  { %v1311_v37 = vpop.eup %1310 }
 0x1c6   :  { %v735_v38 = vpack.c.bf16 %v1311_v37, %v1309_v35  ;;  %v1313_v42 = vpop.eup %1312  ;;  %v664_v53 = vpop.permute.xlu1 %663 }
 0x1c7   :  { %v669_v36 = vpop.permute.xlu0 %668  ;;  %v721_v37 = vmul.f32 %v664_v53, %v625_v24 }
 0x1c8   :  { %1212 = vmatmul.mubr.bf16.gmra.mrb[4].mxu0 %v735_v38  ;;  %v722_v26 = vmul.f32 %v669_v36, %v626_v21  ;;  %v635_v38 = vld [vmem:[#allocation2 + $0x78] sm:$0xff] }
 0x1c9   :  { %v1315_v43 = vpop.eup %1314 }
 0x1ca   :  { %v739_v44 = vpack.c.bf16 %v1315_v43, %v1313_v42  ;;  %v674_v54 = vpop.permute.xlu1 %673 }
 0x1cb   :  { %v679_v59 = vpop.permute.xlu0 %678  ;;  %v723_v3 = vmul.f32 %v674_v54, %v627_v23 }
 0x1cc   :  { %1220 = vmatmul.mubr.bf16.gmra.mrb[4].mxu1 %v739_v44  ;;  %v724_v13 = vmul.f32 %v679_v59, %v628_v5 }
 0x1ce   :  { %v684_v55 = vpop.permute.xlu1 %683 }
 0x1cf   :  { %v689_v31 = vpop.permute.xlu0 %688  ;;  %v725_v63 = vmul.f32 %v684_v55, %v629_v41 }
 0x1d0   :  { %v726_v40 = vmul.f32 %v689_v31, %v630_v12 }
 0x1d2   :  { %v694_v39 = vpop.permute.xlu1 %693 }
 0x1d3   :  { %v727_v57 = vmul.f32 %v694_v39, %v631_v28  ;;  %v699_v20 = vpop.permute.xlu0 %698 }
 0x1d4   :  { %v728_v59 = vmul.f32 %v699_v20, %v632_v16 }
 0x1d6   :  { %v704_v10 = vpop.permute.xlu1 %703 }
 0x1d7   :  { %v709_v30 = vpop.permute.xlu0 %708  ;;  %v729_v60 = vmul.f32 %v704_v10, %v633_v18 }
 0x1d8   :  { %v730_v46 = vmul.f32 %v709_v30, %v634_v29 }
 0x1da   :  { %v714_v42 = vpop.permute.xlu1 %713 }
 0x1db   :  { %v731_v49 = vmul.f32 %v714_v42, %v635_v38 }
 0x28b   :  { %v1209_v2 = vpop.f32.mrb[0].mxu0 }
 0x28c   :  { %v887_v7 = vadd.f32 %v1209_v2, %v718_v25  ;;  %v822_v33 = vpop.f32.mrb[1].mxu0 }
 0x28d   :  { %v885_v8 = vadd.f32 %v822_v33, %v716_v6  ;;  %v1210_v11 = vpop.f32.mrb[2].mxu0 }
 0x28e   :  { %903 = vst [vmem:[#allocation2 + $0x10] sm:$0xff] %v887_v7  ;;  %v888_v45 = vadd.f32 %v1210_v11, %v719_v4  ;;  %v825_v47 = vpop.f32.mrb[3].mxu0 }
 0x28f   :  { %901 = vst [vmem:[#allocation2] sm:$0xff] %v885_v8  ;;  %v886_v51 = vadd.f32 %v825_v47, %v717_v22  ;;  %v1217_v61 = vpop.f32.mrb[0].mxu1 }
 0x290   :  { %904 = vst [vmem:[#allocation2 + $0x18] sm:$0xff] %v888_v45  ;;  %v895_v56 = vadd.f32 %v1217_v61, %v726_v40  ;;  %v854_v58 = vpop.f32.mrb[1].mxu1 }
 0x291   :  { %902 = vst [vmem:[#allocation2 + $0x8] sm:$0xff] %v886_v51  ;;  %v893_v62 = vadd.f32 %v854_v58, %v724_v13  ;;  %v1218_v9 = vpop.f32.mrb[2].mxu1 }
 0x292   :  { %911 = vst [vmem:[#allocation2 + $0x50] sm:$0xff] %v895_v56  ;;  %v896_v17 = vadd.f32 %v1218_v9, %v727_v57  ;;  %v857_v19 = vpop.f32.mrb[3].mxu1 }
 0x293   :  { %909 = vst [vmem:[#allocation2 + $0x40] sm:$0xff] %v893_v62  ;;  %v894_v15 = vadd.f32 %v857_v19, %v725_v63 }
 0x294   :  { %912 = vst [vmem:[#allocation2 + $0x58] sm:$0xff] %v896_v17 }
 0x295   :  { %910 = vst [vmem:[#allocation2 + $0x48] sm:$0xff] %v894_v15 }
 0x29b   :  { %v1213_v32 = vpop.f32.mrb[4].mxu0 }
 0x29c   :  { %v891_v34 = vadd.f32 %v1213_v32, %v722_v26  ;;  %v838_v35 = vpop.f32.mrb[5].mxu0 }
 0x29d   :  { %v889_v43 = vadd.f32 %v838_v35, %v720_v27  ;;  %v1214_v44 = vpop.f32.mrb[6].mxu0 }
 0x29e   :  { %907 = vst [vmem:[#allocation2 + $0x30] sm:$0xff] %v891_v34  ;;  %v892_v48 = vadd.f32 %v1214_v44, %v723_v3  ;;  %v841_v50 = vpop.f32.mrb[7].mxu0 }
 0x29f   :  { %905 = vst [vmem:[#allocation2 + $0x20] sm:$0xff] %v889_v43  ;;  %v890_v52 = vadd.f32 %v841_v50, %v721_v37  ;;  %v1221_v36 = vpop.f32.mrb[4].mxu1 }
 0x2a0   :  { %908 = vst [vmem:[#allocation2 + $0x38] sm:$0xff] %v892_v48  ;;  %v899_v54 = vadd.f32 %v1221_v36, %v730_v46  ;;  %v870_v55 = vpop.f32.mrb[5].mxu1 }
 0x2a1   :  { %906 = vst [vmem:[#allocation2 + $0x28] sm:$0xff] %v890_v52  ;;  %v897_v53 = vadd.f32 %v870_v55, %v728_v59  ;;  %v1222_v0 = vpop.f32.mrb[6].mxu1 }
 0x2a2   :  { %915 = vst [vmem:[#allocation2 + $0x70] sm:$0xff] %v899_v54  ;;  %v900_v1 = vadd.f32 %v1222_v0, %v731_v49  ;;  %v873_v25 = vpop.f32.mrb[7].mxu1 }
 0x2a3   :  { %913 = vst [vmem:[#allocation2 + $0x60] sm:$0xff] %v897_v53  ;;  %v898_v6 = vadd.f32 %v873_v25, %v729_v60 }
 0x2a4   :  { %916 = vst [vmem:[#allocation2 + $0x78] sm:$0xff] %v900_v1 }
 0x2a5   :  { %914 = vst [vmem:[#allocation2 + $0x68] sm:$0xff] %v898_v6 }
 0x2a6 PF:  { %v1824_v12 = vld [vmem:[#allocation2 + $0x10] sm:$0xff]  ;;  %v1826_v31 = vld [vmem:[#allocation2] sm:$0xff]  ;;  %v1828_v2 = vld [vmem:[#allocation2 + $0x18] sm:$0xff]  ;;  %v1352_v4 = vmov 8  }
 0x2a7   :  { %1317 = vset.pattern.permute.xlu1 %v1352_v4  ;;  %1316 = vset.pattern.permute.xlu0 %v1352_v4  ;;  %v955_v5 = vmax.f32 %v1824_v12, 1e-20  ;;  %v953_v7 = vmax.f32 %v1826_v31, 1e-20  ;;  %v956_v33 = vmax.f32 %v1828_v2, 1e-20 }
 0x2a8   :  { %v1833_v22 = vld [vmem:[#allocation2 + $0x8] sm:$0xff]  ;;  %v1838_v8 = vld [vmem:[#allocation2 + $0x20] sm:$0xff]  ;;  %v1842_v40 = vld [vmem:[#allocation2 + $0x38] sm:$0xff] }
 0x2a9   :  { %v1835_v28 = vld [vmem:[#allocation2 + $0x28] sm:$0xff]  ;;  %1318 = vrcp.f32 %v955_v5  ;;  %v954_v39 = vmax.f32 %v1833_v22, 1e-20  ;;  %v957_v41 = vmax.f32 %v1838_v8, 1e-20  ;;  %v1844_v45 = vld [vmem:[#allocation2 + $0x30] sm:$0xff] }
 0x2aa   :  { %1320 = vrcp.f32 %v953_v7  ;;  %v958_v11 = vmax.f32 %v1835_v28, 1e-20  ;;  %v960_v47 = vmax.f32 %v1842_v40, 1e-20  ;;  %v959_v13 = vmax.f32 %v1844_v45, 1e-20 }
 0x2ab   :  { %1322 = vrcp.f32 %v956_v33  ;;  %v1848_v51 = vld [vmem:[#allocation2 + $0x48] sm:$0xff]  ;;  %v1850_v61 = vld [vmem:[#allocation2 + $0x40] sm:$0xff]  ;;  %v1854_v62 = vld [vmem:[#allocation2 + $0x58] sm:$0xff] }
 0x2ac   :  { %1324 = vrcp.f32 %v954_v39  ;;  %v962_v56 = vmax.f32 %v1848_v51, 1e-20  ;;  %v961_v63 = vmax.f32 %v1850_v61, 1e-20  ;;  %v1856_v17 = vld [vmem:[#allocation2 + $0x50] sm:$0xff]  ;;  %v1860_v21 = vld [vmem:[#allocation2 + $0x68] sm:$0xff] }
 0x2ad   :  { %1326 = vrcp.f32 %v958_v11  ;;  %v964_v15 = vmax.f32 %v1854_v62, 1e-20  ;;  %v963_v20 = vmax.f32 %v1856_v17, 1e-20  ;;  %v1862_v14 = vld [vmem:[#allocation2 + $0x60] sm:$0xff]  ;;  %v1866_v27 = vld [vmem:[#allocation2 + $0x78] sm:$0xff] }
 0x2ae   :  { %1328 = vrcp.f32 %v957_v41  ;;  %v966_v24 = vmax.f32 %v1860_v21, 1e-20  ;;  %v965_v26 = vmax.f32 %v1862_v14, 1e-20  ;;  %v1868_v30 = vld [vmem:[#allocation2 + $0x70] sm:$0xff] }
 0x2af   :  { %1330 = vrcp.f32 %v960_v47  ;;  %v968_v3 = vmax.f32 %v1866_v27, 1e-20  ;;  %v967_v16 = vmax.f32 %v1868_v30, 1e-20  ;;  %v1875_v46 = vld [vmem:[%s1984_s6] ss:$0 sm:$0xff] }
 0x2b0   :  { %1332 = vrcp.f32 %v959_v13  ;;  %v1881_v52 = vld [vmem:[%s1983_s5] ss:$0 sm:$0xff] }
 0x2b1   :  { %1334 = vrcp.f32 %v962_v56 }
 0x2b2   :  { %1336 = vrcp.f32 %v961_v63 }
 0x2b3   :  { %v1319_v57 = vpop.eup %1318  ;;  %1338 = vrcp.f32 %v964_v15 }
 0x2b4   :  { %v1321_v58 = vpop.eup %1320  ;;  %998 = vperm.xlu1 %1317, %v1319_v57   ;;  %1340 = vrcp.f32 %v963_v20 }
 0x2b5   :  { %v1323_v9 = vpop.eup %1322  ;;  %988 = vperm.xlu0 %1316, %v1321_v58   ;;  %1342 = vrcp.f32 %v966_v24 }
 0x2b6   :  { %v1325_v19 = vpop.eup %1324  ;;  %1344 = vrcp.f32 %v965_v26 }
 0x2b7   :  { %v1327_v10 = vpop.eup %1326  ;;  %1346 = vrcp.f32 %v968_v3 }
 0x2b8   :  { %1003 = vperm.xlu1 %1317, %v1323_v9   ;;  %v1329_v23 = vpop.eup %1328  ;;  %1348 = vrcp.f32 %v967_v16 }
 0x2b9   :  { %993 = vperm.xlu0 %1316, %v1325_v19   ;;  %v1331_v29 = vpop.eup %1330 }
 0x2ba   :  { %v1333_v32 = vpop.eup %1332 }
 0x2bb   :  { %v1335_v34 = vpop.eup %1334 }
 0x2bc   :  { %1013 = vperm.xlu1 %1317, %v1327_v10   ;;  %v1337_v35 = vpop.eup %1336 }
 0x2bd   :  { %1008 = vperm.xlu0 %1316, %v1329_v23   ;;  %v1339_v37 = vpop.eup %1338 }
 0x2be   :  { %v1341_v38 = vpop.eup %1340 }
 0x2bf   :  { %v1343_v42 = vpop.eup %1342 }
 0x2c0   :  { %1023 = vperm.xlu1 %1317, %v1331_v29   ;;  %v1345_v43 = vpop.eup %1344 }
 0x2c1   :  { %1018 = vperm.xlu0 %1316, %v1333_v32   ;;  %v1347_v44 = vpop.eup %1346 }
 0x2c2   :  { %v1349_v18 = vpop.eup %1348 }
 0x2c4   :  { %1033 = vperm.xlu1 %1317, %v1335_v34  }
 0x2c5   :  { %1028 = vperm.xlu0 %1316, %v1337_v35  }
 0x2c8   :  { %1043 = vperm.xlu1 %1317, %v1339_v37  }
 0x2c9   :  { %1038 = vperm.xlu0 %1316, %v1341_v38  }
 0x2cc   :  { %1053 = vperm.xlu1 %1317, %v1343_v42  }
 0x2cd   :  { %1048 = vperm.xlu0 %1316, %v1345_v43  }
 0x2d0   :  { %1063 = vperm.xlu1 %1317, %v1347_v44  }
 0x2d1   :  { %1058 = vperm.xlu0 %1316, %v1349_v18  }
 0x333   :  { %v999_v48 = vpop.permute.xlu1 %998 }
 0x334   :  { %v1068_v50 = vmul.f32 %v999_v48, %v1824_v12  ;;  %v989_v59 = vpop.permute.xlu0 %988 }
 0x335   :  { %v1066_v36 = vmul.f32 %v989_v59, %v1826_v31 }
 0x336   :  { %v1090_v49 = vmul.f32 %v1875_v46, %v1068_v50 }
 0x337   :  { %v1088_v54 = vmul.f32 %v1875_v46, %v1066_v36  ;;  %v1004_v55 = vpop.permute.xlu1 %1003 }
 0x338   :  { %v1129_v60 = vadd.f32 %v1881_v52, %v1090_v49  ;;  %v1069_v53 = vmul.f32 %v1004_v55, %v1828_v2  ;;  %v994_v0 = vpop.permute.xlu0 %993 }
 0x339   :  { %v1127_v1 = vadd.f32 %v1881_v52, %v1088_v54  ;;  %v1067_v25 = vmul.f32 %v994_v0, %v1833_v22 }
 0x33a   :  { %1145 = vst [vmem:[%s1985_s7 + $0x10] sm:$0xff] %v1129_v60  ;;  %v1091_v6 = vmul.f32 %v1875_v46, %v1069_v53 }
 0x33b   :  { %1143 = vst [vmem:[%s1985_s7] sm:$0xff] %v1127_v1  ;;  %v1089_v12 = vmul.f32 %v1875_v46, %v1067_v25  ;;  %v1014_v31 = vpop.permute.xlu1 %1013 }
 0x33c   :  { %v1130_v2 = vadd.f32 %v1881_v52, %v1091_v6  ;;  %v1071_v4 = vmul.f32 %v1014_v31, %v1835_v28  ;;  %v1009_v5 = vpop.permute.xlu0 %1008 }
 0x33d   :  { %v1128_v7 = vadd.f32 %v1881_v52, %v1089_v12  ;;  %v1070_v33 = vmul.f32 %v1009_v5, %v1838_v8 }
 0x33e   :  { %1146 = vst [vmem:[%s1985_s7 + $0x18] sm:$0xff] %v1130_v2  ;;  %v1093_v22 = vmul.f32 %v1875_v46, %v1071_v4 }
 0x33f   :  { %1144 = vst [vmem:[%s1985_s7 + $0x8] sm:$0xff] %v1128_v7  ;;  %v1092_v39 = vmul.f32 %v1875_v46, %v1070_v33  ;;  %v1024_v11 = vpop.permute.xlu1 %1023 }
 0x340   :  { %v1132_v28 = vadd.f32 %v1881_v52, %v1093_v22  ;;  %v1073_v41 = vmul.f32 %v1024_v11, %v1842_v40  ;;  %v1019_v47 = vpop.permute.xlu0 %1018 }
 0x341   :  { %v1131_v8 = vadd.f32 %v1881_v52, %v1092_v39  ;;  %v1072_v13 = vmul.f32 %v1019_v47, %v1844_v45 }
 0x342   :  { %1148 = vst [vmem:[%s1985_s7 + $0x28] sm:$0xff] %v1132_v28  ;;  %v1095_v57 = vmul.f32 %v1875_v46, %v1073_v41 }
 0x343   :  { %1147 = vst [vmem:[%s1985_s7 + $0x20] sm:$0xff] %v1131_v8  ;;  %v1094_v56 = vmul.f32 %v1875_v46, %v1072_v13  ;;  %v1034_v58 = vpop.permute.xlu1 %1033 }
 0x344   :  { %v1134_v40 = vadd.f32 %v1881_v52, %v1095_v57  ;;  %v1075_v63 = vmul.f32 %v1034_v58, %v1848_v51  ;;  %v1029_v9 = vpop.permute.xlu0 %1028 }
 0x345   :  { %v1133_v45 = vadd.f32 %v1881_v52, %v1094_v56  ;;  %v1074_v19 = vmul.f32 %v1029_v9, %v1850_v61 }
 0x346   :  { %1150 = vst [vmem:[%s1985_s7 + $0x38] sm:$0xff] %v1134_v40  ;;  %v1097_v15 = vmul.f32 %v1875_v46, %v1075_v63 }
 0x347   :  { %1149 = vst [vmem:[%s1985_s7 + $0x30] sm:$0xff] %v1133_v45  ;;  %v1096_v20 = vmul.f32 %v1875_v46, %v1074_v19  ;;  %v1044_v10 = vpop.permute.xlu1 %1043 }
 0x348   :  { %v1136_v51 = vadd.f32 %v1881_v52, %v1097_v15  ;;  %v1077_v23 = vmul.f32 %v1044_v10, %v1854_v62  ;;  %v1039_v24 = vpop.permute.xlu0 %1038 }
 0x349   :  { %v1135_v61 = vadd.f32 %v1881_v52, %v1096_v20  ;;  %v1076_v26 = vmul.f32 %v1039_v24, %v1856_v17 }
 0x34a   :  { %1152 = vst [vmem:[%s1985_s7 + $0x48] sm:$0xff] %v1136_v51  ;;  %v1099_v29 = vmul.f32 %v1875_v46, %v1077_v23 }
 0x34b   :  { %1151 = vst [vmem:[%s1985_s7 + $0x40] sm:$0xff] %v1135_v61  ;;  %v1098_v32 = vmul.f32 %v1875_v46, %v1076_v26  ;;  %v1054_v3 = vpop.permute.xlu1 %1053 }
 0x34c   :  { %v1138_v62 = vadd.f32 %v1881_v52, %v1099_v29  ;;  %v1079_v16 = vmul.f32 %v1054_v3, %v1860_v21  ;;  %v1049_v34 = vpop.permute.xlu0 %1048 }
 0x34d   :  { %v1137_v17 = vadd.f32 %v1881_v52, %v1098_v32  ;;  %v1078_v35 = vmul.f32 %v1049_v34, %v1862_v14 }
 0x34e   :  { %1154 = vst [vmem:[%s1985_s7 + $0x58] sm:$0xff] %v1138_v62  ;;  %v1101_v37 = vmul.f32 %v1875_v46, %v1079_v16 }
 0x34f   :  { %1153 = vst [vmem:[%s1985_s7 + $0x50] sm:$0xff] %v1137_v17  ;;  %v1100_v38 = vmul.f32 %v1875_v46, %v1078_v35  ;;  %v1064_v42 = vpop.permute.xlu1 %1063 }
 0x350   :  { %v1140_v21 = vadd.f32 %v1881_v52, %v1101_v37  ;;  %v1081_v43 = vmul.f32 %v1064_v42, %v1866_v27  ;;  %v1059_v44 = vpop.permute.xlu0 %1058 }
 0x351   :  { %v1139_v14 = vadd.f32 %v1881_v52, %v1100_v38  ;;  %v1080_v18 = vmul.f32 %v1059_v44, %v1868_v30 }
 0x352   :  { %1156 = vst [vmem:[%s1985_s7 + $0x68] sm:$0xff] %v1140_v21  ;;  %v1103_v48 = vmul.f32 %v1875_v46, %v1081_v43 }
 0x353   :  { %1155 = vst [vmem:[%s1985_s7 + $0x60] sm:$0xff] %v1139_v14  ;;  %v1102_v50 = vmul.f32 %v1875_v46, %v1080_v18 }
 0x354   :  { %v1142_v59 = vadd.f32 %v1881_v52, %v1103_v48 }
 0x355   :  { %v1141_v27 = vadd.f32 %v1881_v52, %v1102_v50 }
 0x356   :  { %1158 = vst [vmem:[%s1985_s7 + $0x78] sm:$0xff] %v1142_v59 }
 0x357   :  { %1157 = vst [vmem:[%s1985_s7 + $0x70] sm:$0xff] %v1141_v27 }

</bundles_post_ra>
